<compile_context>
chip_gen: v7x
topology: tpu7x:2x2x1
jax: 0.10.0
libtpu: 0.0.40
codegen_flags: <defaults>
</compile_context>

<pallas_src>
import functools
import math

import jax
import jax.numpy as jnp
from jax.experimental import pallas as pl
from jax.experimental.pallas import tpu as pltpu


# ----------------------------------------------------------------------------
# Pallas kernel 1: fused-im2col 3x3 stride-1 conv (+ bias, + optional ReLU).
# One grid step = one image; the padded image (Hp, Wp, Cin) is VMEM resident.
# ----------------------------------------------------------------------------
def _fused_conv_kernel(x_ref, w_ref, b_ref, o_ref, *, taps, H, W, relu):
    cin = x_ref.shape[-1]
    acc = None
    for t, (dh, dw) in enumerate(taps):
        xs = x_ref[dh:dh + H, dw:dw + W, :]            # (H, W, Cin) bf16
        xs = xs.reshape(H * W, cin)                    # W % 8 == 0 -> pure regroup
        p = jnp.dot(xs, w_ref[t], preferred_element_type=jnp.float32)
        acc = p if acc is None else acc + p
    acc = acc + b_ref[...]
    if relu:
        acc = jnp.maximum(acc, 0.0)
    o_ref[...] = acc.astype(o_ref.dtype)


def _fused_conv(xp, w_taps, b, *, H, W, relu):
    """xp: (N, H+2, W+2, Cin) bf16 padded input -> (N, H*W, Cout) bf16."""
    N, Hp, Wp, Cin = xp.shape
    T, _, Cout = w_taps.shape
    k = 3
    assert T == k * k and Hp == H + 2 and Wp == W + 2
    taps = tuple((dh, dw) for dh in range(k) for dw in range(k))
    return pl.pallas_call(
        functools.partial(_fused_conv_kernel, taps=taps, H=H, W=W, relu=relu),
        out_shape=jax.ShapeDtypeStruct((N, H * W, Cout), jnp.bfloat16),
        grid_spec=pltpu.PrefetchScalarGridSpec(
            num_scalar_prefetch=0,
            grid=(N,),
            in_specs=[
                pl.BlockSpec((None, Hp, Wp, Cin), lambda n: (n, 0, 0, 0)),
                pl.BlockSpec((T, Cin, Cout), lambda n: (0, 0, 0)),
                pl.BlockSpec((1, Cout), lambda n: (0, 0)),
            ],
            out_specs=pl.BlockSpec((None, H * W, Cout), lambda n: (n, 0, 0)),
        ),
        compiler_params=pltpu.CompilerParams(
            dimension_semantics=("parallel",)),
    )(xp, w_taps, b)


# ----------------------------------------------------------------------------
# Pallas kernel 2: fallback fused matmul  out = relu?(patches @ W + b)
# (used for stride-2 convs and the tiny W<8 scales, where patches are <100 KB)
# ----------------------------------------------------------------------------
def _mm_kernel(p_ref, w_ref, b_ref, o_ref, *, relu):
    acc = jnp.dot(p_ref[...], w_ref[...], preferred_element_type=jnp.float32)
    acc = acc + b_ref[...]
    if relu:
        acc = jnp.maximum(acc, 0.0)
    o_ref[...] = acc.astype(o_ref.dtype)


def _matmul_bias(patches, wmat, bias, relu):
    M, K = patches.shape
    _, Cout = wmat.shape
    tm = M if M <= 512 else 512
    Mp = ((M + tm - 1) // tm) * tm
    if Mp != M:
        patches = jnp.pad(patches, ((0, Mp - M), (0, 0)))
    out = pl.pallas_call(
        functools.partial(_mm_kernel, relu=relu),
        out_shape=jax.ShapeDtypeStruct((Mp, Cout), jnp.bfloat16),
        grid_spec=pltpu.PrefetchScalarGridSpec(
            num_scalar_prefetch=0,
            grid=(Mp // tm,),
            in_specs=[
                pl.BlockSpec((tm, K), lambda i: (i, 0)),
                pl.BlockSpec((K, Cout), lambda i: (0, 0)),
                pl.BlockSpec((1, Cout), lambda i: (0, 0)),
            ],
            out_specs=pl.BlockSpec((tm, Cout), lambda i: (i, 0)),
        ),
        compiler_params=pltpu.CompilerParams(
            dimension_semantics=("parallel",)),
    )(patches, wmat, bias)
    return out[:M] if Mp != M else out


# ----------------------------------------------------------------------------
# Conv wrappers (NHWC, bf16 activations).  Weights are pre-packed as
# (9, Cin, Cout) bf16 tap matrices; bias as (1, Cout) f32.
# ----------------------------------------------------------------------------
_FUSED_ENABLED = True  # may be flipped by the runtime capability probe in main


def conv2d(x, w_taps, b, stride=1, relu=False):
    """3x3 conv, pad=1.  x: (N,H,W,Cin) bf16; w_taps: (9,Cin,Cout) bf16."""
    N, H, W, Cin = x.shape
    T, wcin, Cout = w_taps.shape
    assert T == 9 and wcin == Cin
    k, pad = 3, 1
    Ho = (H + 2 * pad - k) // stride + 1
    Wo = (W + 2 * pad - k) // stride + 1
    xp = jnp.pad(x, ((0, 0), (pad, pad), (pad, pad), (0, 0)))
    if stride == 1 and (Wo % 8 == 0) and _FUSED_ENABLED:
        out = _fused_conv(xp, w_taps, b, H=Ho, W=Wo, relu=relu)
        return out.reshape(N, Ho, Wo, Cout)
    # fallback: im2col in plain JAX (tiny here), matmul in Pallas
    cols = [xp[:, dh:dh + stride * Ho:stride, dw:dw + stride * Wo:stride, :]
            for dh in range(k) for dw in range(k)]
    patches = jnp.concatenate(cols, axis=-1).reshape(N * Ho * Wo, k * k * Cin)
    wmat = w_taps.reshape(k * k * Cin, Cout)
    out = _matmul_bias(patches, wmat, b, relu)
    return out.reshape(N, Ho, Wo, Cout)


def conv_transpose2d(x, w_taps, b, relu=False):
    """PyTorch ConvTranspose2d(k=4, s=2, p=1) via merged 4-phase decomposition.

    w_taps: (9, Cin, 4*Cout) bf16 -- the four 2x2 phase sub-kernels embedded in
    a 3x3 support and stacked along Cout.  One stride-1 conv launch produces
    all four output parity phases, which are then interleaved (free reshape).
    """
    N, H, W, Cin = x.shape
    Cout = w_taps.shape[-1] // 4
    out = conv2d(x, w_taps, b, stride=1, relu=relu)       # (N, H, W, 4*Cout)
    out = out.reshape(N, H, W, 2, 2, Cout)                # (..., ph, pw, C)
    out = jnp.transpose(out, (0, 1, 3, 2, 4, 5))          # (N, H, ph, W, pw, C)
    return out.reshape(N, 2 * H, 2 * W, Cout)


# ----------------------------------------------------------------------------
# Parameters: torch-layout init (matching MoireCNN.__init__ shapes), then a
# one-time conversion into the kernel layouts (done OUTSIDE the jitted fwd).
# ----------------------------------------------------------------------------
def build_raw_params(key):
    keys = iter(jax.random.split(key, 64))

    def conv(cin, cout, k=3):
        k1, k2 = jax.random.split(next(keys))
        bound = 1.0 / math.sqrt(cin * k * k)
        w = jax.random.uniform(k1, (cout, cin, k, k), jnp.float32, -bound, bound)
        b = jax.random.uniform(k2, (cout,), jnp.float32, -bound, bound)
        return ("conv", w, b)

    def convt(cin, cout, k=4):
        k1, k2 = jax.random.split(next(keys))
        bound = 1.0 / math.sqrt(cout * k * k)
        w = jax.random.uniform(k1, (cin, cout, k, k), jnp.float32, -bound, bound)
        b = jax.random.uniform(k2, (cout,), jnp.float32, -bound, bound)
        return ("convt", w, b)

    p = {}
    p["s11"] = [conv(3, 32), conv(32, 32)]
    p["s12"] = [conv(32, 3)]
    p["s13"] = [conv(32, 32) for _ in range(5)]
    p["s21"] = [conv(32, 32), conv(32, 64)]
    p["s22"] = [convt(64, 32), conv(32, 3)]
    p["s23"] = [conv(64, 64) for _ in range(5)]
    p["s31"] = [conv(64, 64), conv(64, 64)]
    p["s32"] = [convt(64, 64), convt(64, 32), conv(32, 3)]
    p["s33"] = [conv(64, 64) for _ in range(5)]
    p["s41"] = [conv(64, 64), conv(64, 64)]
    p["s42"] = [convt(64, 64), convt(64, 32), convt(32, 32), conv(32, 3)]
    p["s43"] = [conv(64, 64) for _ in range(5)]
    p["s51"] = [conv(64, 64), conv(64, 64)]
    p["s52"] = [convt(64, 64), convt(64, 32), convt(32, 32), convt(32, 32),
                conv(32, 3)]
    p["s53"] = [conv(64, 64) for _ in range(5)]
    return p


def _prep_conv(w, b):
    cout, cin, kh, kw = w.shape
    taps = jnp.transpose(w, (2, 3, 1, 0)).reshape(kh * kw, cin, cout)
    return taps.astype(jnp.bfloat16), b.reshape(1, cout).astype(jnp.float32)


def _prep_convT(w, b):
    """torch ConvTranspose2d weight (Cin,Cout,4,4) -> merged (9, Cin, 4*Cout).

    Output phase (ph, pw) (parity of oh, ow) is a 2x2 stride-1 conv on the
    1-padded input; its taps are embedded in a common 3x3 support so that all
    four phases share one set of patches and one kernel launch.
    """
    cin, cout = w.shape[0], w.shape[1]
    wm = jnp.zeros((3, 3, cin, 2, 2, cout), jnp.float32)
    for ph in range(2):
        for pw in range(2):
            for dh in range(2):
                for dw in range(2):
                    oh, ow = ph + dh, pw + dw
                    kh, kw = 3 - ph - 2 * dh, 3 - pw - 2 * dw
                    wm = wm.at[oh, ow, :, ph, pw, :].set(w[:, :, kh, kw])
    wm = wm.reshape(9, cin, 4 * cout).astype(jnp.bfloat16)
    bm = jnp.tile(b.reshape(1, cout), (1, 4)).reshape(1, 4 * cout)
    return wm, bm.astype(jnp.float32)


def prep_params(raw):
    prepped = {}
    for name, layers in raw.items():
        prepped[name] = [
            _prep_conv(w, b) if kind == "conv" else _prep_convT(w, b)
            for (kind, w, b) in layers
        ]
    return prepped


# ----------------------------------------------------------------------------
# MoireCNN forward (NHWC bf16 internally, NCHW f32 at the boundary)
# ----------------------------------------------------------------------------
def _block(x, layers):                 # self.conv(channels): 5x [Conv3x3, ReLU]
    for w, b in layers:
        x = conv2d(x, w, b, stride=1, relu=True)
    return x


def _down(x, p):                       # sX1 (X>=2): Conv s2 + ReLU, Conv s1
    x = conv2d(x, *p[0], stride=2, relu=True)
    x = conv2d(x, *p[1], stride=1, relu=False)
    return x


def _up(x, p):                         # sX2: [ConvT + ReLU]* then final Conv3x3
    for w, b in p[:-1]:
        x = conv_transpose2d(x, w, b, relu=True)
    return conv2d(x, *p[-1], stride=1, relu=False)


def moire_forward(params, x_nchw):
    x = jnp.transpose(x_nchw, (0, 2, 3, 1)).astype(jnp.bfloat16)   # NCHW -> NHWC
    x1 = conv2d(x, *params["s11"][0], stride=1, relu=True)
    x1 = conv2d(x1, *params["s11"][1], stride=1, relu=False)
    x2 = _down(x1, params["s21"])
    x3 = _down(x2, params["s31"])
    x4 = _down(x3, params["s41"])
    x5 = _down(x4, params["s51"])
    x1 = conv2d(_block(x1, params["s13"]), *params["s12"][0],
                stride=1, relu=False)
    x2 = _up(_block(x2, params["s23"]), params["s22"])
    x3 = _up(_block(x3, params["s33"]), params["s32"])
    x4 = _up(_block(x4, params["s43"]), params["s42"])
    x5 = _up(_block(x5, params["s53"]), params["s52"])
    out = (x1 + x2 + x3 + x4 + x5).astype(jnp.float32)
    return jnp.transpose(out, (0, 3, 1, 2))                        # NHWC -> NCHW


# ----------------------------------------------------------------------------
# lax references (for sanity checks) and a fused-kernel capability probe
# ----------------------------------------------------------------------------
def _lax_conv_ref(x, w_torch, b, stride):
    w_hwio = jnp.transpose(w_torch, (2, 3, 1, 0)).astype(jnp.bfloat16)
    y = jax.lax.conv_general_dilated(
        x, w_hwio, (stride, stride), padding=((1, 1), (1, 1)),
        dimension_numbers=("NHWC", "HWIO", "NHWC"),
        preferred_element_type=jnp.float32)
    return y + b.astype(jnp.float32)


def _lax_convT_ref(x, w_torch, b):
    w_flip = jnp.flip(w_torch, axis=(2, 3))
    w_hwio = jnp.transpose(w_flip, (2, 3, 0, 1)).astype(jnp.bfloat16)
    y = jax.lax.conv_general_dilated(
        x, w_hwio, (1, 1), padding=((2, 2), (2, 2)), lhs_dilation=(2, 2),
        dimension_numbers=("NHWC", "HWIO", "NHWC"),
        preferred_element_type=jnp.float32)
    return y + b.astype(jnp.float32)


def _probe_fused():
    """Compile/run the fused-im2col kernel on representative shapes; if the
    backend rejects it, fall back to the im2col+matmul path everywhere."""
    try:
        for hw, cin, cout in ((16, 3, 32), (8, 64, 256)):
            xp = jnp.zeros((2, hw + 2, hw + 2, cin), jnp.bfloat16)
            wt = jnp.zeros((9, cin, cout), jnp.bfloat16)
            bt = jnp.zeros((1, cout), jnp.float32)
            jax.block_until_ready(_fused_conv(xp, wt, bt, H=hw, W=hw, relu=True))
        return True
    except Exception:
        return False


# ----------------------------------------------------------------------------
# main
# ----------------------------------------------------------------------------
if __name__ == "__main__":
    key = jax.random.PRNGKey(0)
    kx, kp, kd = jax.random.split(key, 3)
    x = jax.random.normal(kx, (2, 3, 16, 16), jnp.float32)         # NCHW input
    raw = build_raw_params(kp)
    params = prep_params(raw)

    _FUSED_ENABLED = _probe_fused()

    # ---- sanity checks against lax references (bf16 operands everywhere) ----
    x_nhwc = jnp.transpose(x, (0, 2, 3, 1)).astype(jnp.bfloat16)

    _, w0, b0 = raw["s11"][0]
    wt0, bt0 = params["s11"][0]
    got = conv2d(x_nhwc, wt0, bt0, stride=1, relu=False)
    ref = _lax_conv_ref(x_nhwc, w0, b0, stride=1)
    assert jnp.allclose(got.astype(jnp.float32), ref, atol=5e-2, rtol=5e-2), \
        "stride-1 conv mismatch"

    a = jnp.maximum(got, 0)
    _, w1, b1 = raw["s21"][0]
    wt1, bt1 = params["s21"][0]
    got2 = conv2d(a, wt1, bt1, stride=2, relu=False)
    ref2 = _lax_conv_ref(a, w1, b1, stride=2)
    assert jnp.allclose(got2.astype(jnp.float32), ref2, atol=5e-2, rtol=5e-2), \
        "stride-2 conv mismatch"

    xd8 = jax.random.normal(kd, (2, 8, 8, 64), jnp.float32).astype(jnp.bfloat16)
    _, wT, bT = raw["s22"][0]
    wTt, bTt = params["s22"][0]
    gotT = conv_transpose2d(xd8, wTt, bTt, relu=False)
    refT = _lax_convT_ref(xd8, wT, bT)
    assert jnp.allclose(gotT.astype(jnp.float32), refT, atol=5e-2, rtol=5e-2), \
        "conv-transpose (8x8, fused path) mismatch"

    xd4 = xd8[:, :4, :4, :]
    _, wT2, bT2 = raw["s32"][0]
    wT2t, bT2t = params["s32"][0]
    gotT2 = conv_transpose2d(xd4, wT2t, bT2t, relu=False)
    refT2 = _lax_convT_ref(xd4, wT2, bT2)
    assert jnp.allclose(gotT2.astype(jnp.float32), refT2, atol=5e-2, rtol=5e-2), \
        "conv-transpose (4x4, fallback path) mismatch"

    # ---- full forward ----
    fwd = jax.jit(moire_forward)
    out = jax.block_until_ready(fwd(params, x))
    assert out.shape == (2, 3, 16, 16)
    assert bool(jnp.all(jnp.isfinite(out)))
    print("KERNEL_OK")
</pallas_src>

<mosaic_0001>
module attributes {stable_mosaic.version = 11 : i64} {
  func.func @_fused_conv_kernel(%arg0: i32, %arg1: memref<1x18x18x3xbf16, #tpu.memory_space<vmem>>, %arg2: memref<9x3x32xbf16, #tpu.memory_space<vmem>>, %arg3: memref<1x32xf32, #tpu.memory_space<vmem>>, %arg4: memref<1x256x32xbf16, #tpu.memory_space<vmem>>) attributes {dimension_semantics = [#tpu.dimension_semantics<parallel>], iteration_bounds = array<i64: 2>, scalar_prefetch = 0 : i64, scratch_operands = 0 : i64, tpu.core_type = #tpu.core_type<tc>, window_params = [{transform_indices = @transform_0, window_bounds = array<i64: 1, 18, 18, 3>}, {pipeline_mode = #tpu.pipeline_mode<synchronous>, transform_indices = @transform_1, window_bounds = array<i64: 9, 3, 32>}, {pipeline_mode = #tpu.pipeline_mode<synchronous>, transform_indices = @transform_2, window_bounds = array<i64: 1, 32>}, {transform_indices = @transform_3, window_bounds = array<i64: 1, 256, 32>}]} {
    %c0 = arith.constant 0 : index
    %c0_0 = arith.constant 0 : index
    %c0_1 = arith.constant 0 : index
    %c0_2 = arith.constant 0 : index
    %0 = vector.load %arg1[%c0, %c0_0, %c0_1, %c0_2] : memref<1x18x18x3xbf16, #tpu.memory_space<vmem>>, vector<1x16x16x3xbf16>
    %1 = vector.shape_cast %0 : vector<1x16x16x3xbf16> to vector<16x16x3xbf16>
    %2 = vector.shape_cast %1 : vector<16x16x3xbf16> to vector<256x3xbf16>
    %c0_3 = arith.constant 0 : index
    %c0_4 = arith.constant 0 : index
    %c0_5 = arith.constant 0 : index
    %3 = vector.load %arg2[%c0_3, %c0_4, %c0_5] : memref<9x3x32xbf16, #tpu.memory_space<vmem>>, vector<1x3x32xbf16>
    %4 = vector.shape_cast %3 : vector<1x3x32xbf16> to vector<3x32xbf16>
    %cst = arith.constant dense<0.000000e+00> : vector<256x32xf32>
    %5 = tpu.matmul %2, %4, %cst {dimension_numbers = #tpu.dot_dimension_numbers<[1], [0], [0], [1], [0, 0, 1, 1], [], []>} : vector<256x3xbf16>, vector<3x32xbf16>, vector<256x32xf32> -> vector<256x32xf32>
    %c0_6 = arith.constant 0 : index
    %c0_7 = arith.constant 0 : index
    %c1 = arith.constant 1 : index
    %c0_8 = arith.constant 0 : index
    %6 = vector.load %arg1[%c0_6, %c0_7, %c1, %c0_8] : memref<1x18x18x3xbf16, #tpu.memory_space<vmem>>, vector<1x16x16x3xbf16>
    %7 = vector.shape_cast %6 : vector<1x16x16x3xbf16> to vector<16x16x3xbf16>
    %8 = vector.shape_cast %7 : vector<16x16x3xbf16> to vector<256x3xbf16>
    %c1_9 = arith.constant 1 : index
    %c0_10 = arith.constant 0 : index
    %c0_11 = arith.constant 0 : index
    %9 = vector.load %arg2[%c1_9, %c0_10, %c0_11] : memref<9x3x32xbf16, #tpu.memory_space<vmem>>, vector<1x3x32xbf16>
    %10 = vector.shape_cast %9 : vector<1x3x32xbf16> to vector<3x32xbf16>
    %cst_12 = arith.constant dense<0.000000e+00> : vector<256x32xf32>
    %11 = tpu.matmul %8, %10, %cst_12 {dimension_numbers = #tpu.dot_dimension_numbers<[1], [0], [0], [1], [0, 0, 1, 1], [], []>} : vector<256x3xbf16>, vector<3x32xbf16>, vector<256x32xf32> -> vector<256x32xf32>
    %12 = arith.addf %5, %11 : vector<256x32xf32>
    %c0_13 = arith.constant 0 : index
    %c0_14 = arith.constant 0 : index
    %c2 = arith.constant 2 : index
    %c0_15 = arith.constant 0 : index
    %13 = vector.load %arg1[%c0_13, %c0_14, %c2, %c0_15] : memref<1x18x18x3xbf16, #tpu.memory_space<vmem>>, vector<1x16x16x3xbf16>
    %14 = vector.shape_cast %13 : vector<1x16x16x3xbf16> to vector<16x16x3xbf16>
    %15 = vector.shape_cast %14 : vector<16x16x3xbf16> to vector<256x3xbf16>
    %c2_16 = arith.constant 2 : index
    %c0_17 = arith.constant 0 : index
    %c0_18 = arith.constant 0 : index
    %16 = vector.load %arg2[%c2_16, %c0_17, %c0_18] : memref<9x3x32xbf16, #tpu.memory_space<vmem>>, vector<1x3x32xbf16>
    %17 = vector.shape_cast %16 : vector<1x3x32xbf16> to vector<3x32xbf16>
    %cst_19 = arith.constant dense<0.000000e+00> : vector<256x32xf32>
    %18 = tpu.matmul %15, %17, %cst_19 {dimension_numbers = #tpu.dot_dimension_numbers<[1], [0], [0], [1], [0, 0, 1, 1], [], []>} : vector<256x3xbf16>, vector<3x32xbf16>, vector<256x32xf32> -> vector<256x32xf32>
    %19 = arith.addf %12, %18 : vector<256x32xf32>
    %c0_20 = arith.constant 0 : index
    %c1_21 = arith.constant 1 : index
    %c0_22 = arith.constant 0 : index
    %c0_23 = arith.constant 0 : index
    %20 = vector.load %arg1[%c0_20, %c1_21, %c0_22, %c0_23] : memref<1x18x18x3xbf16, #tpu.memory_space<vmem>>, vector<1x16x16x3xbf16>
    %21 = vector.shape_cast %20 : vector<1x16x16x3xbf16> to vector<16x16x3xbf16>
    %22 = vector.shape_cast %21 : vector<16x16x3xbf16> to vector<256x3xbf16>
    %c3 = arith.constant 3 : index
    %c0_24 = arith.constant 0 : index
    %c0_25 = arith.constant 0 : index
    %23 = vector.load %arg2[%c3, %c0_24, %c0_25] : memref<9x3x32xbf16, #tpu.memory_space<vmem>>, vector<1x3x32xbf16>
    %24 = vector.shape_cast %23 : vector<1x3x32xbf16> to vector<3x32xbf16>
    %cst_26 = arith.constant dense<0.000000e+00> : vector<256x32xf32>
    %25 = tpu.matmul %22, %24, %cst_26 {dimension_numbers = #tpu.dot_dimension_numbers<[1], [0], [0], [1], [0, 0, 1, 1], [], []>} : vector<256x3xbf16>, vector<3x32xbf16>, vector<256x32xf32> -> vector<256x32xf32>
    %26 = arith.addf %19, %25 : vector<256x32xf32>
    %c0_27 = arith.constant 0 : index
    %c1_28 = arith.constant 1 : index
    %c1_29 = arith.constant 1 : index
    %c0_30 = arith.constant 0 : index
    %27 = vector.load %arg1[%c0_27, %c1_28, %c1_29, %c0_30] : memref<1x18x18x3xbf16, #tpu.memory_space<vmem>>, vector<1x16x16x3xbf16>
    %28 = vector.shape_cast %27 : vector<1x16x16x3xbf16> to vector<16x16x3xbf16>
    %29 = vector.shape_cast %28 : vector<16x16x3xbf16> to vector<256x3xbf16>
    %c4 = arith.constant 4 : index
    %c0_31 = arith.constant 0 : index
    %c0_32 = arith.constant 0 : index
    %30 = vector.load %arg2[%c4, %c0_31, %c0_32] : memref<9x3x32xbf16, #tpu.memory_space<vmem>>, vector<1x3x32xbf16>
    %31 = vector.shape_cast %30 : vector<1x3x32xbf16> to vector<3x32xbf16>
    %cst_33 = arith.constant dense<0.000000e+00> : vector<256x32xf32>
    %32 = tpu.matmul %29, %31, %cst_33 {dimension_numbers = #tpu.dot_dimension_numbers<[1], [0], [0], [1], [0, 0, 1, 1], [], []>} : vector<256x3xbf16>, vector<3x32xbf16>, vector<256x32xf32> -> vector<256x32xf32>
    %33 = arith.addf %26, %32 : vector<256x32xf32>
    %c0_34 = arith.constant 0 : index
    %c1_35 = arith.constant 1 : index
    %c2_36 = arith.constant 2 : index
    %c0_37 = arith.constant 0 : index
    %34 = vector.load %arg1[%c0_34, %c1_35, %c2_36, %c0_37] : memref<1x18x18x3xbf16, #tpu.memory_space<vmem>>, vector<1x16x16x3xbf16>
    %35 = vector.shape_cast %34 : vector<1x16x16x3xbf16> to vector<16x16x3xbf16>
    %36 = vector.shape_cast %35 : vector<16x16x3xbf16> to vector<256x3xbf16>
    %c5 = arith.constant 5 : index
    %c0_38 = arith.constant 0 : index
    %c0_39 = arith.constant 0 : index
    %37 = vector.load %arg2[%c5, %c0_38, %c0_39] : memref<9x3x32xbf16, #tpu.memory_space<vmem>>, vector<1x3x32xbf16>
    %38 = vector.shape_cast %37 : vector<1x3x32xbf16> to vector<3x32xbf16>
    %cst_40 = arith.constant dense<0.000000e+00> : vector<256x32xf32>
    %39 = tpu.matmul %36, %38, %cst_40 {dimension_numbers = #tpu.dot_dimension_numbers<[1], [0], [0], [1], [0, 0, 1, 1], [], []>} : vector<256x3xbf16>, vector<3x32xbf16>, vector<256x32xf32> -> vector<256x32xf32>
    %40 = arith.addf %33, %39 : vector<256x32xf32>
    %c0_41 = arith.constant 0 : index
    %c2_42 = arith.constant 2 : index
    %c0_43 = arith.constant 0 : index
    %c0_44 = arith.constant 0 : index
    %41 = vector.load %arg1[%c0_41, %c2_42, %c0_43, %c0_44] : memref<1x18x18x3xbf16, #tpu.memory_space<vmem>>, vector<1x16x16x3xbf16>
    %42 = vector.shape_cast %41 : vector<1x16x16x3xbf16> to vector<16x16x3xbf16>
    %43 = vector.shape_cast %42 : vector<16x16x3xbf16> to vector<256x3xbf16>
    %c6 = arith.constant 6 : index
    %c0_45 = arith.constant 0 : index
    %c0_46 = arith.constant 0 : index
    %44 = vector.load %arg2[%c6, %c0_45, %c0_46] : memref<9x3x32xbf16, #tpu.memory_space<vmem>>, vector<1x3x32xbf16>
    %45 = vector.shape_cast %44 : vector<1x3x32xbf16> to vector<3x32xbf16>
    %cst_47 = arith.constant dense<0.000000e+00> : vector<256x32xf32>
    %46 = tpu.matmul %43, %45, %cst_47 {dimension_numbers = #tpu.dot_dimension_numbers<[1], [0], [0], [1], [0, 0, 1, 1], [], []>} : vector<256x3xbf16>, vector<3x32xbf16>, vector<256x32xf32> -> vector<256x32xf32>
    %47 = arith.addf %40, %46 : vector<256x32xf32>
    %c0_48 = arith.constant 0 : index
    %c2_49 = arith.constant 2 : index
    %c1_50 = arith.constant 1 : index
    %c0_51 = arith.constant 0 : index
    %48 = vector.load %arg1[%c0_48, %c2_49, %c1_50, %c0_51] : memref<1x18x18x3xbf16, #tpu.memory_space<vmem>>, vector<1x16x16x3xbf16>
    %49 = vector.shape_cast %48 : vector<1x16x16x3xbf16> to vector<16x16x3xbf16>
    %50 = vector.shape_cast %49 : vector<16x16x3xbf16> to vector<256x3xbf16>
    %c7 = arith.constant 7 : index
    %c0_52 = arith.constant 0 : index
    %c0_53 = arith.constant 0 : index
    %51 = vector.load %arg2[%c7, %c0_52, %c0_53] : memref<9x3x32xbf16, #tpu.memory_space<vmem>>, vector<1x3x32xbf16>
    %52 = vector.shape_cast %51 : vector<1x3x32xbf16> to vector<3x32xbf16>
    %cst_54 = arith.constant dense<0.000000e+00> : vector<256x32xf32>
    %53 = tpu.matmul %50, %52, %cst_54 {dimension_numbers = #tpu.dot_dimension_numbers<[1], [0], [0], [1], [0, 0, 1, 1], [], []>} : vector<256x3xbf16>, vector<3x32xbf16>, vector<256x32xf32> -> vector<256x32xf32>
    %54 = arith.addf %47, %53 : vector<256x32xf32>
    %c0_55 = arith.constant 0 : index
    %c2_56 = arith.constant 2 : index
    %c2_57 = arith.constant 2 : index
    %c0_58 = arith.constant 0 : index
    %55 = vector.load %arg1[%c0_55, %c2_56, %c2_57, %c0_58] : memref<1x18x18x3xbf16, #tpu.memory_space<vmem>>, vector<1x16x16x3xbf16>
    %56 = vector.shape_cast %55 : vector<1x16x16x3xbf16> to vector<16x16x3xbf16>
    %57 = vector.shape_cast %56 : vector<16x16x3xbf16> to vector<256x3xbf16>
    %c8 = arith.constant 8 : index
    %c0_59 = arith.constant 0 : index
    %c0_60 = arith.constant 0 : index
    %58 = vector.load %arg2[%c8, %c0_59, %c0_60] : memref<9x3x32xbf16, #tpu.memory_space<vmem>>, vector<1x3x32xbf16>
    %59 = vector.shape_cast %58 : vector<1x3x32xbf16> to vector<3x32xbf16>
    %cst_61 = arith.constant dense<0.000000e+00> : vector<256x32xf32>
    %60 = tpu.matmul %57, %59, %cst_61 {dimension_numbers = #tpu.dot_dimension_numbers<[1], [0], [0], [1], [0, 0, 1, 1], [], []>} : vector<256x3xbf16>, vector<3x32xbf16>, vector<256x32xf32> -> vector<256x32xf32>
    %61 = arith.addf %54, %60 : vector<256x32xf32>
    %c0_62 = arith.constant 0 : index
    %c0_63 = arith.constant 0 : index
    %62 = vector.load %arg3[%c0_62, %c0_63] : memref<1x32xf32, #tpu.memory_space<vmem>>, vector<1x32xf32>
    %63 = vector.broadcast %62 : vector<1x32xf32> to vector<256x32xf32>
    %64 = arith.addf %61, %63 : vector<256x32xf32>
    %cst_64 = arith.constant 0.000000e+00 : f32
    %65 = vector.broadcast %cst_64 : f32 to vector<256x32xf32>
    %66 = arith.maximumf %64, %65 : vector<256x32xf32>
    %67 = arith.truncf %66 : vector<256x32xf32> to vector<256x32xbf16>
    %c0_65 = arith.constant 0 : index
    %c0_66 = arith.constant 0 : index
    %c0_67 = arith.constant 0 : index
    %68 = vector.load %arg4[%c0_65, %c0_66, %c0_67] : memref<1x256x32xbf16, #tpu.memory_space<vmem>>, vector<1x256x32xbf16>
    %69 = vector.shape_cast %68 : vector<1x256x32xbf16> to vector<256x32xbf16>
    %70 = vector.shape_cast %67 : vector<256x32xbf16> to vector<1x256x32xbf16>
    tpu.vector_store %arg4[%c0_65, %c0_66, %c0_67], %70 {strides = array<i32>} : memref<1x256x32xbf16, #tpu.memory_space<vmem>>, vector<1x256x32xbf16>,
    return
  }
  func.func @transform_0(%arg0: i32) -> (i32, i32, i32, i32) {
    %c0_i32 = arith.constant 0 : i32
    %c0_i32_0 = arith.constant 0 : i32
    %c0_i32_1 = arith.constant 0 : i32
    %c0_i32_2 = arith.constant 0 : i32
    return %arg0, %c0_i32, %c0_i32_0, %c0_i32_1 : i32, i32, i32, i32
  }
  func.func @transform_1(%arg0: i32) -> (i32, i32, i32) {
    %c0_i32 = arith.constant 0 : i32
    %c0_i32_0 = arith.constant 0 : i32
    %c0_i32_1 = arith.constant 0 : i32
    %c0_i32_2 = arith.constant 0 : i32
    return %c0_i32, %c0_i32_0, %c0_i32_1 : i32, i32, i32
  }
  func.func @transform_2(%arg0: i32) -> (i32, i32) {
    %c0_i32 = arith.constant 0 : i32
    %c0_i32_0 = arith.constant 0 : i32
    %c0_i32_1 = arith.constant 0 : i32
    return %c0_i32, %c0_i32_0 : i32, i32
  }
  func.func @transform_3(%arg0: i32) -> (i32, i32, i32) {
    %c0_i32 = arith.constant 0 : i32
    %c0_i32_0 = arith.constant 0 : i32
    %c0_i32_1 = arith.constant 0 : i32
    return %arg0, %c0_i32, %c0_i32_0 : i32, i32, i32
  }
}

module attributes {stable_mosaic.version = 11 : i64} {
  func.func @_mm_kernel(%arg0: i32, %arg1: memref<512x27xbf16, #tpu.memory_space<vmem>>, %arg2: memref<27x32xbf16, #tpu.memory_space<vmem>>, %arg3: memref<1x32xf32, #tpu.memory_space<vmem>>, %arg4: memref<512x32xbf16, #tpu.memory_space<vmem>>) attributes {dimension_semantics = [#tpu.dimension_semantics<parallel>], iteration_bounds = array<i64: 1>, scalar_prefetch = 0 : i64, scratch_operands = 0 : i64, tpu.core_type = #tpu.core_type<tc>, window_params = [{transform_indices = @transform_0, window_bounds = array<i64: 512, 27>}, {pipeline_mode = #tpu.pipeline_mode<synchronous>, transform_indices = @transform_1, window_bounds = array<i64: 27, 32>}, {pipeline_mode = #tpu.pipeline_mode<synchronous>, transform_indices = @transform_2, window_bounds = array<i64: 1, 32>}, {transform_indices = @transform_3, window_bounds = array<i64: 512, 32>}]} {
    %c0 = arith.constant 0 : index
    %c0_0 = arith.constant 0 : index
    %0 = vector.load %arg1[%c0, %c0_0] : memref<512x27xbf16, #tpu.memory_space<vmem>>, vector<512x27xbf16>
    %c0_1 = arith.constant 0 : index
    %c0_2 = arith.constant 0 : index
    %1 = vector.load %arg2[%c0_1, %c0_2] : memref<27x32xbf16, #tpu.memory_space<vmem>>, vector<27x32xbf16>
    %cst = arith.constant dense<0.000000e+00> : vector<512x32xf32>
    %2 = tpu.matmul %0, %1, %cst {dimension_numbers = #tpu.dot_dimension_numbers<[1], [0], [0], [1], [0, 0, 1, 1], [], []>} : vector<512x27xbf16>, vector<27x32xbf16>, vector<512x32xf32> -> vector<512x32xf32>
    %c0_3 = arith.constant 0 : index
    %c0_4 = arith.constant 0 : index
    %3 = vector.load %arg3[%c0_3, %c0_4] : memref<1x32xf32, #tpu.memory_space<vmem>>, vector<1x32xf32>
    %4 = vector.broadcast %3 : vector<1x32xf32> to vector<512x32xf32>
    %5 = arith.addf %2, %4 : vector<512x32xf32>
    %6 = arith.truncf %5 : vector<512x32xf32> to vector<512x32xbf16>
    %c0_5 = arith.constant 0 : index
    %c0_6 = arith.constant 0 : index
    %7 = vector.load %arg4[%c0_5, %c0_6] : memref<512x32xbf16, #tpu.memory_space<vmem>>, vector<512x32xbf16>
    tpu.vector_store %arg4[%c0_5, %c0_6], %6 {strides = array<i32>} : memref<512x32xbf16, #tpu.memory_space<vmem>>, vector<512x32xbf16>,
    return
  }
  func.func @transform_0(%arg0: i32) -> (i32, i32) {
    %c0_i32 = arith.constant 0 : i32
    %c0_i32_0 = arith.constant 0 : i32
    return %arg0, %c0_i32 : i32, i32
  }
  func.func @transform_1(%arg0: i32) -> (i32, i32) {
    %c0_i32 = arith.constant 0 : i32
    %c0_i32_0 = arith.constant 0 : i32
    %c0_i32_1 = arith.constant 0 : i32
    return %c0_i32, %c0_i32_0 : i32, i32
  }
  func.func @transform_2(%arg0: i32) -> (i32, i32) {
    %c0_i32 = arith.constant 0 : i32
    %c0_i32_0 = arith.constant 0 : i32
    %c0_i32_1 = arith.constant 0 : i32
    return %c0_i32, %c0_i32_0 : i32, i32
  }
  func.func @transform_3(%arg0: i32) -> (i32, i32) {
    %c0_i32 = arith.constant 0 : i32
    %c0_i32_0 = arith.constant 0 : i32
    return %arg0, %c0_i32 : i32, i32
  }
}

</mosaic_0001>

<bundles_post_ra>
// kernel: tpu_custom_call.1
= control target key start
LH: loop header
LB: loop body
LE: loop exit
PB: predicated region body
PF: predicated region fallthrough
CT: control target
= control target key end

     0   :  { %s6491_s12 = smov 0   ;;  %s8348_s0 = inlined_call_operand.vmem [shape: bf16[2,18,18,3], index: 0, kind: input, shape index: {}]   ;;  %s8349_s1 = inlined_call_operand.vmem [shape: bf16[9,3,32], index: 1, kind: input, shape index: {}]   ;;  %s8350_s2 = inlined_call_operand.vmem [shape: f32[1,32], index: 2, kind: input, shape index: {}]   ;;  %s8351_s3 = inlined_call_operand.vmem [shape: bf16[2,256,32], index: 3, kind: output, shape index: {}]  }
   0x1 LB: > { %s5021_s13 = sadd.s32 4294967295, %s6468_s12   ;;  %p5025_p0 = scmp.ge.s32.totalorder %s6468_s12, 1  ;;  %s6468_s12 = sphi %s6491_s12, %s13_s12  }
   0x2   : > { %p137_p1 = scmp.lt.s32.totalorder %s6468_s12, 3 }
   0x4   : > { %p138_p2 = pnand %p5025_p0, %p137_p1 }
   0x6   : > { %141 = sbr.rel (%p138_p2) target bundleno = 589 (0x24d), region = 32 }
   0xd   : > { %v5029_v0 = vld [vmem:[%s8349_s1 + $0x2] sm:$0x3]  ;;  %vm707_vm0 = vcmask 1040384   ;;  %vm708_vm1 = vcmask 1041408   ;;  %p161_p3 = scmp.lt.s32.totalorder %s5021_s13, 1  ;;  %v6470_v1 = vmov 65535  }
   0xe   : > { %v709_v2 = vsel %vm707_vm0, 4294967295, %v6470_v1  ;;  %v5256_v3 = vld [vmem:[%s8349_s1 + $0x8] sm:$0x3]  ;;  %v204_v5 = vld [vmem:[%s8349_s1] sm:$0x3]  ;;  %vm658_vm4 = vcmask 23552  }
   0xf   : > { %v6505_v4 = vsel %vm708_vm1, %v709_v2, 0  ;;  %s8430_s13 = smov (!%p161_p3, %s5021_s13), 1  ;;  %v5321_v9 = vld [vmem:[%s8349_s1 + $0xa] sm:$0x3]  ;;  %vm221_vm2 = vsmask.f32 3328 }
  0x10   : > { %v712_v6 = vand.u32 %v5029_v0, %v6505_v4  ;;  %v6514_v7 = vand.u32 %v5256_v3, %v6505_v4  ;;  %v6517_v8 = vand.u32 %v6505_v4, %v204_v5  ;;  %s6350_s22 = smul.u32 216, %s8430_s13  ;;  %v6524_v10 = vand.u32 %v5321_v9, %v6505_v4  ;;  %v5386_v26 = vld [vmem:[%s8349_s1 + $0xc] sm:$0x3]  ;;  %v5110_v31 = vld [vmem:[%s8349_s1 + $0x4] sm:$0x3]  ;;  %s5600_s11 = sshll.u32 %s8430_s13, 7 }
  0x11   : > { %vm222_vm3 = vsmask.f32 7440  ;;  %v6563_v42 = vand.u32 %v5386_v26, %v6505_v4  ;;  %v6566_v46 = vand.u32 %v5110_v31, %v6505_v4  ;;  %vm1215_vm6 = vcmask 1042432   ;;  %s8244_s16 = scalar_lea.vmem %s8351_s3, %s5600_s11 }
  0x12   : > { %8368 = vst [vmem:[#allocation2_spill] sm:$0xff] %v6514_v7  ;;  %5786 = vmatprep.subr.bf16.mxu1 %v712_v6  ;;  %5922 = vmatprep.subr.bf16.mxu0 %v6514_v7  ;;  %s6531_s25 = scalar_lea.vmem %s8348_s0, %s6350_s22  ;;  %vm6557_vm5 = vmor %vm221_vm2, %vm222_vm3  ;;  %vm1216_vm7 = vcmask 1046532   ;;  %vm4933_vm9 = vcmask 257024  }
  0x13   : > { %5787 = vmatpush3.bf16.msra.mxu1 %v712_v6  ;;  %5923 = vmatpush3.bf16.msra.mxu0 %v6514_v7  ;;  %v172_v11 = vld [vmem:[%s6531_s25] sm:$0xf]  ;;  %v173_v12 = vld [vmem:[%s6531_s25 + $0x4] sm:$0xf]  ;;  %v205_v13 = vld [vmem:[%s6531_s25 + $0x8] sm:$0x1] }
  0x14   : > { %5820 = vmatprep.subr.bf16.mxu1 %v6517_v8  ;;  %5956 = vmatprep.subr.bf16.mxu0 %v6524_v10  ;;  %v225_v14 = vshrl.u32 %v172_v11, 16  ;;  %v228_v15 = vshll.u32 %v172_v11, 16  ;;  %v234_v16 = vshll.u32 %v173_v12, 16  ;;  %v238_v17 = vshrl.u32 %v173_v12, 16  ;;  %v5208_v18 = vld [vmem:[%s6531_s25 + $0xc] sm:$0xf]  ;;  %vm6778_vm8 = vmor %vm1215_vm6, %vm1216_vm7 }
  0x15   : > { %v244_v19 = vshll.u32 %v205_v13, 16  ;;  %v6540_v20 = vld [vmem:[%s6531_s25 + $0x10] sm:$0xf]  ;;  %v6543_v21 = vld [vmem:[%s6531_s25 + $0x14] sm:$0x1]  ;;  %v2032_v28 = vshrl.u32 %v5208_v18, 16 }
  0x16   : > { %v227_v22 = vrot.slane %v225_v14, 4  ;;  %v230_v23 = vrot.slane %v228_v15, 5  ;;  %v236_v24 = vrot.slane %v234_v16, 5  ;;  %v240_v25 = vrot.slane %v238_v17, 4  ;;  %v174_v36 = vld [vmem:[%s6531_s25 + $0xc] sm:$0xf] }
  0x17   : > { %v246_v27 = vrot.slane %v244_v19, 5  ;;  %v2035_v29 = vshll.u32 %v5208_v18, 16  ;;  %v2041_v30 = vshll.u32 %v6540_v20, 16  ;;  %v2045_v34 = vshrl.u32 %v6540_v20, 16  ;;  %v175_v41 = vld [vmem:[%s6531_s25 + $0x10] sm:$0xf] }
  0x18   : > { %v231_v32 = vor.u32 %v230_v23, %v227_v22  ;;  %v241_v33 = vor.u32 %v240_v25, %v236_v24  ;;  %v2051_v35 = vshll.u32 %v6543_v21, 16  ;;  %v2034_v38 = vrot.slane %v2032_v28, 4  ;;  %v206_v49 = vld [vmem:[%s6531_s25 + $0x14] sm:$0x1]  ;;  %v5211_v60 = vld [vmem:[%s6531_s25 + $0x18] sm:$0xf] }
  0x19   : > { %v2037_v39 = vrot.slane %v2035_v29, 5  ;;  %v2043_v40 = vrot.slane %v2041_v30, 5  ;;  %v2047_v45 = vrot.slane %v2045_v34, 4  ;;  %v249_v50 = vshrl.u32 %v174_v36, 16  ;;  %v6575_v1 = vld [vmem:[%s6531_s25 + $0x1c] sm:$0xf] }
  0x1a   : > { %v232_v43 = vrot.slane %v231_v32, 4  ;;  %v242_v44 = vrot.slane %v241_v33, 4  ;;  %v2053_v48 = vrot.slane %v2051_v35, 5  ;;  %v252_v51 = vshll.u32 %v174_v36, 16  ;;  %v6583_v9 = vld [vmem:[%s6531_s25 + $0x20] sm:$0x1] }
  0x1b   : > { %v2038_v47 = vor.u32 %v2037_v39, %v2034_v38  ;;  %v2048_v54 = vor.u32 %v2047_v45, %v2043_v40  ;;  %v258_v55 = vshll.u32 %v175_v41, 16  ;;  %v251_v58 = vrot.slane %v249_v50, 4  ;;  %v176_v25 = vld [vmem:[%s6531_s25 + $0x18] sm:$0xf]  ;;  %v177_v30 = vld [vmem:[%s6531_s25 + $0x1c] sm:$0xf] }
  0x1c   : > { %v237_v52 = vsel %vm6557_vm5, %v232_v43, %v236_v24  ;;  %v247_v53 = vsel %vm6557_vm5, %v242_v44, %v246_v27  ;;  %v254_v59 = vrot.slane %v252_v51, 5  ;;  %v262_v63 = vshrl.u32 %v175_v41, 16  ;;  %v207_v38 = vld [vmem:[%s6531_s25 + $0x20] sm:$0x1] }
  0x1d   : > { %v5030_v56 = vcombine.low %v237_v52, %v247_v53  ;;  %v2039_v57 = vrot.slane %v2038_v47, 4  ;;  %v2049_v61 = vrot.slane %v2048_v54, 4  ;;  %v260_v62 = vrot.slane %v258_v55, 5  ;;  %v5214_v47 = vld [vmem:[%s6531_s25 + $0x24] sm:$0xf] }
  0x1e   : > { %v268_v0 = vshll.u32 %v206_v49, 16  ;;  %v2775_v3 = vrot.slane %v6540_v20, 5  ;;  %v2778_v5 = vrot.slane %v6543_v21, 5  ;;  %v255_v6 = vor.u32 %v254_v59, %v251_v58  ;;  %v6606_v52 = vld [vmem:[%s6531_s25 + $0x28] sm:$0xf] }
  0x1f   : > { %5788 = vmatprep.mubr.msk.bf16.mxu1 %vm658_vm4, %v5030_v56  ;;  %v2044_v2 = vsel %vm6557_vm5, %v2039_v57, %v2043_v40  ;;  %v2054_v11 = vsel %vm6557_vm5, %v2049_v61, %v2053_v48  ;;  %v264_v12 = vrot.slane %v262_v63, 4  ;;  %v2056_v14 = vshrl.u32 %v5211_v60, 16  ;;  %v6612_v59 = vld [vmem:[%s6531_s25 + $0x2c] sm:$0x1]  ;;  %v6811_v21 = vld [vmem:[%s6531_s25 + $0x7c] sm:$0xf] }
  0x20   : > { %v270_v13 = vrot.slane %v268_v0, 5  ;;  %v5257_v15 = vcombine.low %v2044_v2, %v2054_v11  ;;  %v256_v16 = vrot.slane %v255_v6, 4  ;;  %v2059_v17 = vshll.u32 %v5211_v60, 16  ;;  %v178_v6 = vld [vmem:[%s6531_s25 + $0x24] sm:$0xf] }
  0x21   : > { %v2065_v18 = vshll.u32 %v6575_v1, 16  ;;  %v265_v19 = vor.u32 %v264_v12, %v260_v62  ;;  %v2058_v22 = vrot.slane %v2056_v14, 4  ;;  %v2069_v23 = vshrl.u32 %v6575_v1, 16 }
  0x22   : > { %v2075_v24 = vshll.u32 %v6583_v9, 16  ;;  %5924 = vmatprep.mubr.msk.bf16.mxu0 %vm658_vm4, %v5257_v15  ;;  %v261_v26 = vsel %vm6557_vm5, %v256_v16, %v260_v62  ;;  %v2061_v27 = vrot.slane %v2059_v17, 5  ;;  %v2782_v29 = vrot.slane %v6575_v1, 5  ;;  %v179_v15 = vld [vmem:[%s6531_s25 + $0x28] sm:$0xf] }
  0x23   : > { %v2067_v28 = vrot.slane %v2065_v18, 5  ;;  %v266_v31 = vrot.slane %v265_v19, 4  ;;  %v2071_v32 = vrot.slane %v2069_v23, 4  ;;  %v2785_v34 = vrot.slane %v6583_v9, 5  ;;  %v208_v23 = vld [vmem:[%s6531_s25 + $0x2c] sm:$0x1] }
  0x24   : > { %v2077_v33 = vrot.slane %v2075_v24, 5  ;;  %v2062_v35 = vor.u32 %v2061_v27, %v2058_v22  ;;  %v6599_v36 = vrot.slane %v2782_v29, 4  ;;  %v273_v39 = vshrl.u32 %v176_v25, 16 }
  0x25   : > { %v276_v40 = vshll.u32 %v176_v25, 16  ;;  %v271_v41 = vsel %vm6557_vm5, %v266_v31, %v270_v13  ;;  %v2072_v43 = vor.u32 %v2071_v32, %v2067_v28  ;;  %v282_v44 = vshll.u32 %v177_v30, 16  ;;  %v5217_v31 = vld [vmem:[%s6531_s25 + $0x30] sm:$0xf] }
  0x26   : > { %v286_v45 = vshrl.u32 %v177_v30, 16  ;;  %v5031_v48 = vcombine.low %v261_v26, %v271_v41  ;;  %v2063_v49 = vrot.slane %v2062_v35, 4  ;;  %v275_v50 = vrot.slane %v273_v39, 4  ;;  %v6632_v39 = vld [vmem:[%s6531_s25 + $0x34] sm:$0xf] }
  0x27   : > { %v278_v51 = vrot.slane %v276_v40, 5  ;;  %v2073_v53 = vrot.slane %v2072_v43, 4  ;;  %v284_v54 = vrot.slane %v282_v44, 5  ;;  %v292_v56 = vshll.u32 %v207_v38, 16 }
  0x28   : > { %v288_v55 = vrot.slane %v286_v45, 4  ;;  %5789 = vmatmul.mubr.msk.bf16.vlgmr.msra.gmra.mrb[0].mxu1 %vm658_vm4, %v5031_v48  ;;  %v2068_v57 = vsel %vm6557_vm5, %v2063_v49, %v2067_v28  ;;  %v2080_v60 = vshrl.u32 %v5214_v47, 16  ;;  %v2083_v61 = vshll.u32 %v5214_v47, 16  ;;  %v6639_v47 = vld [vmem:[%s6531_s25 + $0x38] sm:$0x1] }
  0x29   : > { %v279_v58 = vor.u32 %v278_v51, %v275_v50  ;;  %5821 = vmatpush3.bf16.msra.mxu1 %v6517_v8  ;;  %v2078_v62 = vsel %vm6557_vm5, %v2073_v53, %v2077_v33  ;;  %v294_v0 = vrot.slane %v292_v56, 5  ;;  %v2089_v2 = vshll.u32 %v6606_v52, 16 }
  0x2a   : > { %v289_v63 = vor.u32 %v288_v55, %v284_v54  ;;  %v5258_v11 = vcombine.low %v2068_v57, %v2078_v62  ;;  %v2082_v13 = vrot.slane %v2080_v60, 4  ;;  %v2085_v14 = vrot.slane %v2083_v61, 5  ;;  %5854 = vmatprep.subr.bf16.mxu1 %v6566_v46  ;;  %v180_v60 = vld [vmem:[%s6531_s25 + $0x30] sm:$0xf] }
  0x2b   : > { %v280_v12 = vrot.slane %v279_v58, 4  ;;  %v2091_v17 = vrot.slane %v2089_v2, 5  ;;  %v2093_v8 = vshrl.u32 %v6606_v52, 16  ;;  %v2099_v18 = vshll.u32 %v6612_v59, 16  ;;  %v181_v2 = vld [vmem:[%s6531_s25 + $0x34] sm:$0xf] }
  0x2c   : > { %v290_v16 = vrot.slane %v289_v63, 4  ;;  %5925 = vmatmul.mubr.msk.bf16.vlgmr.msra.gmra.mrb[0].mxu0 %vm658_vm4, %v5258_v11  ;;  %v2086_v22 = vor.u32 %v2085_v14, %v2082_v13  ;;  %v297_v24 = vshrl.u32 %v178_v6, 16  ;;  %v300_v25 = vshll.u32 %v178_v6, 16  ;;  %v209_v14 = vld [vmem:[%s6531_s25 + $0x38] sm:$0x1] }
  0x2d   : > { %v285_v19 = vsel %vm6557_vm5, %v280_v12, %v284_v54  ;;  %5957 = vmatpush3.bf16.msra.mxu0 %v6524_v10  ;;  %v2095_v27 = vrot.slane %v2093_v8, 4  ;;  %v2101_v28 = vrot.slane %v2099_v18, 5  ;;  %v306_v30 = vshll.u32 %v179_v15, 16 }
  0x2e   : > { %v295_v26 = vsel %vm6557_vm5, %v290_v16, %v294_v0  ;;  %v2087_v33 = vrot.slane %v2086_v22, 4  ;;  %v299_v35 = vrot.slane %v297_v24, 4  ;;  %v302_v38 = vrot.slane %v300_v25, 5  ;;  %5990 = vmatprep.subr.bf16.mxu0 %v6563_v42  ;;  %v5220_v24 = vld [vmem:[%s6531_s25 + $0x3c] sm:$0xf] }
  0x2f   : > { %v5032_v32 = vcombine.low %v285_v19, %v295_v26  ;;  %v2096_v40 = vor.u32 %v2095_v27, %v2091_v17  ;;  %v308_v41 = vrot.slane %v306_v30, 5  ;;  %v310_v43 = vshrl.u32 %v179_v15, 16  ;;  %v6656_v30 = vld [vmem:[%s6531_s25 + $0x40] sm:$0xf] }
  0x30   : > { %v316_v10 = vshll.u32 %v208_v23, 16  ;;  %v2092_v44 = vsel %vm6557_vm5, %v2087_v33, %v2091_v17  ;;  %v303_v45 = vor.u32 %v302_v38, %v299_v35  ;;  %v2104_v48 = vshrl.u32 %v5217_v31, 16 }
  0x31   : > { %5792 = vmatprep.mubr.msk.bf16.mxu1 %vm658_vm4, %v5032_v32  ;;  %v2107_v49 = vshll.u32 %v5217_v31, 16  ;;  %v2097_v50 = vrot.slane %v2096_v40, 4  ;;  %v312_v51 = vrot.slane %v310_v43, 4  ;;  %v2113_v54 = vshll.u32 %v6632_v39, 16  ;;  %v6661_v43 = vld [vmem:[%s6531_s25 + $0x44] sm:$0x1] }
  0x32   : > { %v318_v53 = vrot.slane %v316_v10, 5  ;;  %v304_v55 = vrot.slane %v303_v45, 4  ;;  %v2106_v56 = vrot.slane %v2104_v48, 4  ;;  %v2117_v58 = vshrl.u32 %v6632_v39, 16 }
  0x33   : > { %v2109_v57 = vrot.slane %v2107_v49, 5  ;;  %v2102_v61 = vsel %vm6557_vm5, %v2097_v50, %v2101_v28  ;;  %v313_v62 = vor.u32 %v312_v51, %v308_v41  ;;  %v2115_v63 = vrot.slane %v2113_v54, 5  ;;  %v182_v50 = vld [vmem:[%s6531_s25 + $0x3c] sm:$0xf] }
  0x34   : > { %v2123_v0 = vshll.u32 %v6639_v47, 16  ;;  %v5259_v6 = vcombine.low %v2092_v44, %v2102_v61  ;;  %v309_v11 = vsel %vm6557_vm5, %v304_v55, %v308_v41  ;;  %v2119_v13 = vrot.slane %v2117_v58, 4 }
  0x35   : > { %v2110_v12 = vor.u32 %v2109_v57, %v2106_v56  ;;  %v314_v15 = vrot.slane %v313_v62, 4  ;;  %v321_v17 = vshrl.u32 %v180_v60, 16  ;;  %v324_v8 = vshll.u32 %v180_v60, 16  ;;  %v183_v56 = vld [vmem:[%s6531_s25 + $0x40] sm:$0xf] }
  0x36   : > { %v2125_v16 = vrot.slane %v2123_v0, 5  ;;  %5928 = vmatprep.mubr.msk.bf16.mxu0 %vm658_vm4, %v5259_v6  ;;  %v2120_v19 = vor.u32 %v2119_v13, %v2115_v63  ;;  %v330_v22 = vshll.u32 %v181_v2, 16  ;;  %v334_v23 = vshrl.u32 %v181_v2, 16  ;;  %v210_v13 = vld [vmem:[%s6531_s25 + $0x44] sm:$0x1] }
  0x37   : > { %v2111_v18 = vrot.slane %v2110_v12, 4  ;;  %v319_v25 = vsel %vm6557_vm5, %v314_v15, %v318_v53  ;;  %v323_v26 = vrot.slane %v321_v17, 4  ;;  %v326_v27 = vrot.slane %v324_v8, 5  ;;  %v5223_v15 = vld [vmem:[%s6531_s25 + $0x48] sm:$0xf] }
  0x38   : > { %v340_v28 = vshll.u32 %v209_v14, 16  ;;  %v5033_v31 = vcombine.low %v309_v11, %v319_v25  ;;  %v2121_v33 = vrot.slane %v2120_v19, 4  ;;  %v332_v35 = vrot.slane %v330_v22, 5  ;;  %v6679_v19 = vld [vmem:[%s6531_s25 + $0x4c] sm:$0xf] }
  0x39   : > { %v2116_v32 = vsel %vm6557_vm5, %v2111_v18, %v2115_v63  ;;  %v327_v38 = vor.u32 %v326_v27, %v323_v26  ;;  %v336_v40 = vrot.slane %v334_v23, 4  ;;  %v2128_v10 = vshrl.u32 %v5220_v24, 16 }
  0x3a   : > { %v342_v41 = vrot.slane %v340_v28, 5  ;;  %5793 = vmatmul.mubr.msk.bf16.gmra.mrb[4].mxu1 %vm658_vm4, %v5033_v31  ;;  %v2126_v44 = vsel %vm6557_vm5, %v2121_v33, %v2125_v16  ;;  %v2131_v45 = vshll.u32 %v5220_v24, 16  ;;  %v2137_v48 = vshll.u32 %v6656_v30, 16 }
  0x3b   : > { %v2141_v49 = vshrl.u32 %v6656_v30, 16  ;;  %v5260_v51 = vcombine.low %v2116_v32, %v2126_v44  ;;  %v328_v53 = vrot.slane %v327_v38, 4  ;;  %v337_v54 = vor.u32 %v336_v40, %v332_v35 }
  0x3c   : > { %v2130_v55 = vrot.slane %v2128_v10, 4  ;;  %v2133_v57 = vrot.slane %v2131_v45, 5  ;;  %v2139_v58 = vrot.slane %v2137_v48, 5  ;;  %v2147_v61 = vshll.u32 %v6661_v43, 16 }
  0x3d   : > { %v2143_v60 = vrot.slane %v2141_v49, 4  ;;  %5929 = vmatmul.mubr.msk.bf16.gmra.mrb[4].mxu0 %vm658_vm4, %v5260_v51  ;;  %v333_v62 = vsel %vm6557_vm5, %v328_v53, %v332_v35  ;;  %v338_v63 = vrot.slane %v337_v54, 4  ;;  %v345_v0 = vshrl.u32 %v182_v50, 16  ;;  %v6687_v35 = vld [vmem:[%s6531_s25 + $0x50] sm:$0x1] }
  0x3e   : > { %v348_v2 = vshll.u32 %v182_v50, 16  ;;  %v2134_v6 = vor.u32 %v2133_v57, %v2130_v55  ;;  %v2149_v12 = vrot.slane %v2147_v61, 5  ;;  %v354_v14 = vshll.u32 %v183_v56, 16  ;;  %v6694_v49 = vld [vmem:[%s6531_s25 + $0x4c] sm:$0xf] }
  0x3f   : > { %v2144_v11 = vor.u32 %v2143_v60, %v2139_v58  ;;  %v343_v16 = vsel %vm6557_vm5, %v338_v63, %v342_v41  ;;  %v347_v17 = vrot.slane %v345_v0, 4  ;;  %v358_v18 = vshrl.u32 %v183_v56, 16  ;;  %v6691_v41 = vld [vmem:[%s6531_s25 + $0x48] sm:$0xf] }
  0x40   : > { %v350_v8 = vrot.slane %v348_v2, 5  ;;  %v5034_v22 = vcombine.low %v333_v62, %v343_v16  ;;  %v2135_v23 = vrot.slane %v2134_v6, 4  ;;  %v356_v25 = vrot.slane %v354_v14, 5  ;;  %v5226_v2 = vld [vmem:[%s6531_s25 + $0x54] sm:$0xf] }
  0x41   : > { %v2145_v24 = vrot.slane %v2144_v11, 4  ;;  %v360_v27 = vrot.slane %v358_v18, 4  ;;  %v364_v28 = vshll.u32 %v210_v13, 16  ;;  %v2152_v31 = vshrl.u32 %v5223_v15, 16 }
  0x42   : > { %v351_v26 = vor.u32 %v350_v8, %v347_v17  ;;  %5796 = vmatprep.mubr.msk.bf16.mxu1 %vm658_vm4, %v5034_v22  ;;  %v2140_v32 = vsel %vm6557_vm5, %v2135_v23, %v2139_v58  ;;  %v2155_v38 = vshll.u32 %v5223_v15, 16  ;;  %v2161_v40 = vshll.u32 %v6679_v19, 16  ;;  %v211_v58 = vld [vmem:[%s6531_s25 + $0x50] sm:$0x1]  ;;  %v6710_v8 = vld [vmem:[%s6531_s25 + $0x58] sm:$0xf] }
  0x43   : > { %v2150_v33 = vsel %vm6557_vm5, %v2145_v24, %v2149_v12  ;;  %v361_v45 = vor.u32 %v360_v27, %v356_v25  ;;  %v366_v48 = vrot.slane %v364_v28, 5  ;;  %v2154_v50 = vrot.slane %v2152_v31, 4  ;;  %v6716_v28 = vld [vmem:[%s6531_s25 + $0x5c] sm:$0x1] }
  0x44   : > { %v5261_v10 = vcombine.low %v2140_v32, %v2150_v33  ;;  %v352_v44 = vrot.slane %v351_v26, 4  ;;  %v2157_v51 = vrot.slane %v2155_v38, 5  ;;  %v2163_v53 = vrot.slane %v2161_v40, 5 }
  0x45   : > { %v2165_v54 = vshrl.u32 %v6679_v19, 16  ;;  %v362_v56 = vrot.slane %v361_v45, 4  ;;  %v2171_v57 = vshll.u32 %v6687_v35, 16  ;;  %v369_v60 = vshrl.u32 %v6691_v41, 16 }
  0x46   : > { %5932 = vmatprep.mubr.msk.bf16.mxu0 %vm658_vm4, %v5261_v10  ;;  %v357_v55 = vsel %vm6557_vm5, %v352_v44, %v356_v25  ;;  %v2158_v61 = vor.u32 %v2157_v51, %v2154_v50  ;;  %v372_v63 = vshll.u32 %v6691_v41, 16  ;;  %v378_v0 = vshll.u32 %v6694_v49, 16  ;;  %v6720_v10 = vld [vmem:[%s6531_s25 + $0x54] sm:$0xf]  ;;  %v6726_v51 = vld [vmem:[%s6531_s25 + $0x58] sm:$0xf] }
  0x47   : > { %v2167_v62 = vrot.slane %v2165_v54, 4  ;;  %v367_v6 = vsel %vm6557_vm5, %v362_v56, %v366_v48  ;;  %v2173_v11 = vrot.slane %v2171_v57, 5  ;;  %v371_v12 = vrot.slane %v369_v60, 4 }
  0x48   : > { %v382_v13 = vshrl.u32 %v6694_v49, 16  ;;  %v5035_v14 = vcombine.low %v357_v55, %v367_v6  ;;  %v2159_v15 = vrot.slane %v2158_v61, 4  ;;  %v374_v17 = vrot.slane %v372_v63, 5  ;;  %v212_v61 = vld [vmem:[%s6531_s25 + $0x5c] sm:$0x1] }
  0x49   : > { %v2168_v16 = vor.u32 %v2167_v62, %v2163_v53  ;;  %v380_v18 = vrot.slane %v378_v0, 5  ;;  %v388_v23 = vshll.u32 %v211_v58, 16  ;;  %v2176_v24 = vshrl.u32 %v5226_v2, 16 }
  0x4a   : > { %v384_v22 = vrot.slane %v382_v13, 4  ;;  %5797 = vmatmul.mubr.msk.bf16.gmra.mrb[8].mxu1 %vm658_vm4, %v5035_v14  ;;  %v2164_v25 = vsel %vm6557_vm5, %v2159_v15, %v2163_v53  ;;  %v375_v27 = vor.u32 %v374_v17, %v371_v12  ;;  %v2179_v31 = vshll.u32 %v5226_v2, 16 }
  0x4b   : > { %v2169_v26 = vrot.slane %v2168_v16, 4  ;;  %v390_v33 = vrot.slane %v388_v23, 5  ;;  %v2178_v38 = vrot.slane %v2176_v24, 4  ;;  %v2185_v40 = vshll.u32 %v6710_v8, 16  ;;  %v6740_v16 = vld [vmem:[%s6531_s25 + $0x64] sm:$0xf] }
  0x4c   : > { %v385_v32 = vor.u32 %v384_v22, %v380_v18  ;;  %v376_v45 = vrot.slane %v375_v27, 4  ;;  %v2181_v48 = vrot.slane %v2179_v31, 5  ;;  %v2189_v50 = vshrl.u32 %v6710_v8, 16 }
  0x4d   : > { %v2174_v44 = vsel %vm6557_vm5, %v2169_v26, %v2173_v11  ;;  %v2187_v55 = vrot.slane %v2185_v40, 5  ;;  %v2195_v56 = vshll.u32 %v6716_v28, 16  ;;  %v393_v62 = vshrl.u32 %v6720_v10, 16  ;;  %v5229_v11 = vld [vmem:[%s6531_s25 + $0x60] sm:$0xf] }
  0x4e   : > { %v5262_v53 = vcombine.low %v2164_v25, %v2174_v44  ;;  %v386_v54 = vrot.slane %v385_v32, 4  ;;  %v381_v57 = vsel %vm6557_vm5, %v376_v45, %v380_v18  ;;  %v2182_v58 = vor.u32 %v2181_v48, %v2178_v38  ;;  %v6747_v26 = vld [vmem:[%s6531_s25 + $0x68] sm:$0x1]  ;;  %v6751_v44 = vld [vmem:[%s6531_s25 + $0x60] sm:$0xf] }
  0x4f   : > { %v2191_v60 = vrot.slane %v2189_v50, 4  ;;  %v2197_v0 = vrot.slane %v2195_v56, 5  ;;  %v396_v2 = vshll.u32 %v6720_v10, 16  ;;  %v402_v6 = vshll.u32 %v6726_v51, 16 }
  0x50   : > { %5933 = vmatmul.mubr.msk.bf16.gmra.mrb[8].mxu0 %vm658_vm4, %v5262_v53  ;;  %v391_v63 = vsel %vm6557_vm5, %v386_v54, %v390_v33  ;;  %v2183_v13 = vrot.slane %v2182_v58, 4  ;;  %v395_v15 = vrot.slane %v393_v62, 4  ;;  %v406_v22 = vshrl.u32 %v6726_v51, 16  ;;  %v6757_v54 = vld [vmem:[%s6531_s25 + $0x64] sm:$0xf] }
  0x51   : > { %v5036_v12 = vcombine.low %v381_v57, %v391_v63  ;;  %v2192_v14 = vor.u32 %v2191_v60, %v2187_v55  ;;  %v398_v17 = vrot.slane %v396_v2, 5  ;;  %v404_v18 = vrot.slane %v402_v6, 5  ;;  %v213_v6 = vld [vmem:[%s6531_s25 + $0x68] sm:$0x1] }
  0x52   : > { %v412_v23 = vshll.u32 %v212_v61, 16  ;;  %v2188_v24 = vsel %vm6557_vm5, %v2183_v13, %v2187_v55  ;;  %v2200_v27 = vshrl.u32 %v5229_v11, 16  ;;  %v2203_v31 = vshll.u32 %v5229_v11, 16 }
  0x53   : > { %5800 = vmatprep.mubr.msk.bf16.mxu1 %vm658_vm4, %v5036_v12  ;;  %v2193_v25 = vrot.slane %v2192_v14, 4  ;;  %v399_v32 = vor.u32 %v398_v17, %v395_v15  ;;  %v408_v33 = vrot.slane %v406_v22, 4  ;;  %v2209_v40 = vshll.u32 %v6740_v16, 16  ;;  %v5289_v22 = vld [vmem:[%s6531_s25 + $0xc] sm:$0xe] }
  0x54   : > { %v414_v38 = vrot.slane %v412_v23, 5  ;;  %v2202_v48 = vrot.slane %v2200_v27, 4  ;;  %v2205_v50 = vrot.slane %v2203_v31, 5  ;;  %v2213_v53 = vshrl.u32 %v6740_v16, 16 }
  0x55   : > { %v2198_v45 = vsel %vm6557_vm5, %v2193_v25, %v2197_v0  ;;  %v400_v56 = vrot.slane %v399_v32, 4  ;;  %v409_v57 = vor.u32 %v408_v33, %v404_v18  ;;  %v2211_v58 = vrot.slane %v2209_v40, 5 }
  0x56   : > { %v5263_v55 = vcombine.low %v2188_v24, %v2198_v45  ;;  %v2206_v60 = vor.u32 %v2205_v50, %v2202_v48  ;;  %v2215_v61 = vrot.slane %v2213_v53, 4  ;;  %v2219_v62 = vshll.u32 %v6747_v26, 16 }
  0x57   : > { %v417_v63 = vshrl.u32 %v6751_v44, 16  ;;  %v405_v0 = vsel %vm6557_vm5, %v400_v56, %v404_v18  ;;  %v410_v2 = vrot.slane %v409_v57, 4  ;;  %v420_v11 = vshll.u32 %v6751_v44, 16  ;;  %v6772_v18 = vld [vmem:[%s6531_s25 + $0x6c] sm:$0xf] }
  0x58   : > { %5936 = vmatprep.mubr.msk.bf16.mxu0 %vm658_vm4, %v5263_v55  ;;  %v426_v12 = vshll.u32 %v6757_v54, 16  ;;  %v2207_v13 = vrot.slane %v2206_v60, 4  ;;  %v2216_v14 = vor.u32 %v2215_v61, %v2211_v58  ;;  %v2221_v15 = vrot.slane %v2219_v62, 5  ;;  %v6785_v55 = vld [vmem:[%s6531_s25 + $0x70] sm:$0xf] }
  0x59   : > { %v419_v17 = vrot.slane %v417_v63, 4  ;;  %v415_v23 = vsel %vm6557_vm5, %v410_v2, %v414_v38  ;;  %v422_v24 = vrot.slane %v420_v11, 5  ;;  %v430_v27 = vshrl.u32 %v6757_v54, 16  ;;  %v214_v2 = vld [vmem:[%s6531_s25 + $0x74] sm:$0x1] }
  0x5a   : > { %v428_v25 = vrot.slane %v426_v12, 5  ;;  %v5037_v31 = vcombine.low %v405_v0, %v415_v23  ;;  %v2212_v32 = vsel %vm6557_vm5, %v2207_v13, %v2211_v58  ;;  %v2217_v33 = vrot.slane %v2216_v14, 4  ;;  %v215_v23 = vld [vmem:[%s6531_s25 + $0x80] sm:$0x1] }
  0x5b   : > { %v436_v40 = vshll.u32 %v213_v6, 16  ;;  %v423_v38 = vor.u32 %v422_v24, %v419_v17  ;;  %v432_v48 = vrot.slane %v430_v27, 4  ;;  %v5305_v50 = vrot.slane %v5289_v22, 9  ;;  %v5290_v6 = vld [vmem:[%s6531_s25 + $0x18] sm:$0xe] }
  0x5c   : > { %v2777_v53 = vrot.slane %v2775_v3, 4  ;;  %5801 = vmatmul.mubr.msk.bf16.gmra.mrb[12].mxu1 %vm658_vm4, %v5037_v31  ;;  %v2222_v56 = vsel %vm6557_vm5, %v2217_v33, %v2221_v15  ;;  %v441_v58 = vshrl.u32 %v6772_v18, 16  ;;  %v444_v60 = vshll.u32 %v6772_v18, 16  ;;  %v6804_v15 = vld [vmem:[%s6531_s25 + $0x78] sm:$0xf] }
  0x5d   : > { %v438_v57 = vrot.slane %v436_v40, 5  ;;  %v5264_v61 = vcombine.low %v2212_v32, %v2222_v56  ;;  %v424_v62 = vrot.slane %v423_v38, 4  ;;  %v433_v63 = vor.u32 %v432_v48, %v428_v25  ;;  %v5291_v38 = vld [vmem:[%s6531_s25 + $0x24] sm:$0xe] }
  0x5e   : > { %v2776_v0 = vsel %vm6778_vm8, %v5305_v50, %v2775_v3  ;;  %v2779_v11 = vsel %vm6778_vm8, %v2777_v53, %v2778_v5  ;;  %v443_v12 = vrot.slane %v441_v58, 4  ;;  %v446_v13 = vrot.slane %v444_v60, 5 }
  0x5f   : > { %v450_v14 = vshll.u32 %v6785_v55, 16  ;;  %5937 = vmatmul.mubr.msk.bf16.gmra.mrb[12].mxu0 %vm658_vm4, %v5264_v61  ;;  %v429_v20 = vsel %vm6557_vm5, %v424_v62, %v428_v25  ;;  %v434_v3 = vrot.slane %v433_v63, 4  ;;  %v5322_v17 = vcombine.low %v2776_v0, %v2779_v11  ;;  %v6830_v61 = vld [vmem:[%s6531_s25 + $0x84] sm:$0xf] }
  0x60   : > { %v454_v22 = vshrl.u32 %v6785_v55, 16  ;;  %v447_v5 = vor.u32 %v446_v13, %v443_v12  ;;  %v460_v27 = vshll.u32 %v214_v2, 16  ;;  %v5306_v31 = vrot.slane %v5290_v6, 9 }
  0x61   : > { %v452_v24 = vrot.slane %v450_v14, 5  ;;  %v439_v32 = vsel %vm6557_vm5, %v434_v3, %v438_v57  ;;  %5958 = vmatprep.mubr.msk.bf16.mxu0 %vm658_vm4, %v5322_v17  ;;  %v2786_v25 = vsel %vm6778_vm8, %v6599_v36, %v2785_v34  ;;  %v465_v40 = vshrl.u32 %v6804_v15, 16 }
  0x62   : > { %v456_v33 = vrot.slane %v454_v22, 4  ;;  %v5038_v48 = vcombine.low %v429_v20, %v439_v32  ;;  %v448_v50 = vrot.slane %v447_v5, 4  ;;  %v462_v53 = vrot.slane %v460_v27, 5  ;;  %v216_v20 = vld [vmem:[%s6531_s25 + $0x8c] sm:$0x1] }
  0x63   : > { %v2783_v56 = vsel %vm6778_vm8, %v5306_v31, %v2782_v29  ;;  %v467_v60 = vrot.slane %v465_v40, 4  ;;  %v468_v9 = vshll.u32 %v6804_v15, 16  ;;  %v474_v36 = vshll.u32 %v6811_v21, 16  ;;  %v6838_v29 = vld [vmem:[%s6531_s25 + $0x88] sm:$0xf] }
  0x64   : > { %v457_v57 = vor.u32 %v456_v33, %v452_v24  ;;  %v5323_v58 = vcombine.low %v2783_v56, %v2786_v25  ;;  %5804 = vmatprep.mubr.msk.bf16.mxu1 %vm658_vm4, %v5038_v48  ;;  %v453_v34 = vsel %vm6557_vm5, %v448_v50, %v452_v24  ;;  %v478_v1 = vshrl.u32 %v6811_v21, 16  ;;  %v5292_v5 = vld [vmem:[%s6531_s25 + $0x30] sm:$0xe] }
  0x65   : > { %v484_v62 = vshll.u32 %v215_v23, 16  ;;  %v470_v0 = vrot.slane %v468_v9, 5  ;;  %v5307_v2 = vrot.slane %v5291_v38, 9  ;;  %v2789_v6 = vrot.slane %v6606_v52, 5  ;;  %v6857_v40 = vld [vmem:[%s6531_s25 + $0x90] sm:$0xf] }
  0x66   : > { %v458_v63 = vrot.slane %v457_v57, 4  ;;  %v476_v11 = vrot.slane %v474_v36, 5  ;;  %v480_v12 = vrot.slane %v478_v1, 4  ;;  %v2792_v14 = vrot.slane %v6612_v59, 5  ;;  %v6867_v1 = vld [vmem:[%s6531_s25 + $0x94] sm:$0xf] }
  0x67   : > { %v486_v13 = vrot.slane %v484_v62, 5  ;;  %5959 = vmatmul.mubr.msk.bf16.vlgmr.msra.gmra.mrb[0].mxu0 %vm658_vm4, %v5323_v58  ;;  %v471_v17 = vor.u32 %v470_v0, %v467_v60  ;;  %v2790_v22 = vsel %vm6778_vm8, %v5307_v2, %v2789_v6  ;;  %v2791_v23 = vrot.slane %v2789_v6, 4  ;;  %v217_v62 = vld [vmem:[%s6531_s25 + $0x98] sm:$0x1] }
  0x68   : > { %v463_v3 = vsel %vm6557_vm5, %v458_v63, %v462_v53  ;;  %5991 = vmatpush3.bf16.msra.mxu0 %v6563_v42  ;;  %v481_v52 = vor.u32 %v480_v12, %v476_v11  ;;  %v489_v27 = vshrl.u32 %v6830_v61, 16  ;;  %v492_v59 = vshll.u32 %v6830_v61, 16 }
  0x69   : > { %v5039_v24 = vcombine.low %v453_v34, %v463_v3  ;;  %v472_v31 = vrot.slane %v471_v17, 4  ;;  %v2793_v32 = vsel %vm6778_vm8, %v2791_v23, %v2792_v14  ;;  %v498_v33 = vshll.u32 %v6838_v29, 16  ;;  %v6876_v3 = vld [vmem:[%s6531_s25 + $0x9c] sm:$0xf] }
  0x6a   : > { %v502_v25 = vshrl.u32 %v6838_v29, 16  ;;  %v482_v42 = vrot.slane %v481_v52, 4  ;;  %v5324_v38 = vcombine.low %v2790_v22, %v2793_v32  ;;  %v491_v48 = vrot.slane %v489_v27, 4  ;;  %v6887_v27 = vld [vmem:[%s6531_s25 + $0xa0] sm:$0xf] }
  0x6b   : > { %5805 = vmatmul.mubr.msk.bf16.gmra.mrb[16].mxu1 %vm658_vm4, %v5039_v24  ;;  %v494_v50 = vrot.slane %v492_v59, 5  ;;  %v477_v53 = vsel %vm6557_vm5, %v472_v31, %v476_v11  ;;  %v500_v56 = vrot.slane %v498_v33, 5  ;;  %v508_v58 = vshll.u32 %v216_v20, 16  ;;  %v5293_v11 = vld [vmem:[%s6531_s25 + $0x3c] sm:$0xe] }
  0x6c   : > { %v504_v57 = vrot.slane %v502_v25, 4  ;;  %v487_v60 = vsel %vm6557_vm5, %v482_v42, %v486_v13  ;;  %5962 = vmatprep.mubr.msk.bf16.mxu0 %vm658_vm4, %v5324_v38  ;;  %v5308_v34 = vrot.slane %v5292_v5, 9  ;;  %v2796_v36 = vrot.slane %v6632_v39, 5 }
  0x6d   : > { %v495_v9 = vor.u32 %v494_v50, %v491_v48  ;;  %v5040_v63 = vcombine.low %v477_v53, %v487_v60  ;;  %v510_v2 = vrot.slane %v508_v58, 5  ;;  %v2799_v6 = vrot.slane %v6639_v47, 5  ;;  %v218_v50 = vld [vmem:[%s6531_s25 + $0xa4] sm:$0x1]  ;;  %v5294_v53 = vld [vmem:[%s6531_s25 + $0x48] sm:$0xe] }
  0x6e   : > { %v505_v0 = vor.u32 %v504_v57, %v500_v56  ;;  %v2797_v13 = vsel %vm6778_vm8, %v5308_v34, %v2796_v36  ;;  %v2798_v14 = vrot.slane %v2796_v36, 4  ;;  %v513_v20 = vshrl.u32 %v6857_v40, 16 }
  0x6f   : > { %v496_v12 = vrot.slane %v495_v9, 4  ;;  %5808 = vmatprep.mubr.msk.bf16.mxu1 %vm658_vm4, %v5040_v63  ;;  %v516_v17 = vshll.u32 %v6857_v40, 16  ;;  %v522_v22 = vshll.u32 %v6867_v1, 16  ;;  %v526_v47 = vshrl.u32 %v6867_v1, 16 }
  0x70   : > { %v506_v39 = vrot.slane %v505_v0, 4  ;;  %v2800_v5 = vsel %vm6778_vm8, %v2798_v14, %v2799_v6  ;;  %v515_v24 = vrot.slane %v513_v20, 4  ;;  %v532_v52 = vshll.u32 %v217_v62, 16 }
  0x71   : > { %v501_v23 = vsel %vm6557_vm5, %v496_v12, %v500_v56  ;;  %v5325_v31 = vcombine.low %v2797_v13, %v2800_v5  ;;  %v518_v32 = vrot.slane %v516_v17, 5  ;;  %v524_v33 = vrot.slane %v522_v22, 5  ;;  %v6908_v17 = vld [vmem:[%s6531_s25 + $0xa8] sm:$0xf] }
  0x72   : > { %v511_v59 = vsel %vm6557_vm5, %v506_v39, %v510_v2  ;;  %v528_v42 = vrot.slane %v526_v47, 4  ;;  %v534_v38 = vrot.slane %v532_v52, 5  ;;  %v5309_v48 = vrot.slane %v5293_v11, 9 }
  0x73   : > { %v5041_v25 = vcombine.low %v501_v23, %v511_v59  ;;  %5963 = vmatmul.mubr.msk.bf16.gmra.mrb[4].mxu0 %vm658_vm4, %v5325_v31  ;;  %v519_v56 = vor.u32 %v518_v32, %v515_v24  ;;  %v2803_v57 = vrot.slane %v6656_v30, 5  ;;  %v2806_v58 = vrot.slane %v6661_v43, 5  ;;  %v6913_v24 = vld [vmem:[%s6531_s25 + $0xac] sm:$0xf] }
  0x74   : > { %v537_v60 = vshrl.u32 %v6876_v3, 16  ;;  %v529_v9 = vor.u32 %v528_v42, %v524_v33  ;;  %v540_v34 = vshll.u32 %v6876_v3, 16  ;;  %v546_v36 = vshll.u32 %v6887_v27, 16 }
  0x75   : > { %5809 = vmatmul.mubr.msk.bf16.gmra.mrb[20].mxu1 %vm658_vm4, %v5041_v25  ;;  %v550_v62 = vshrl.u32 %v6887_v27, 16  ;;  %v520_v63 = vrot.slane %v519_v56, 4  ;;  %v2804_v0 = vsel %vm6778_vm8, %v5309_v48, %v2803_v57  ;;  %v2805_v30 = vrot.slane %v2803_v57, 4  ;;  %v5295_v25 = vld [vmem:[%s6531_s25 + $0x54] sm:$0xe] }
  0x76   : > { %v539_v2 = vrot.slane %v537_v60, 4  ;;  %v530_v43 = vrot.slane %v529_v9, 4  ;;  %v542_v6 = vrot.slane %v540_v34, 5  ;;  %v548_v11 = vrot.slane %v546_v36, 5  ;;  %v6928_v57 = vld [vmem:[%s6531_s25 + $0xb4] sm:$0xf] }
  0x77   : > { %v552_v12 = vrot.slane %v550_v62, 4  ;;  %v525_v13 = vsel %vm6557_vm5, %v520_v63, %v524_v33  ;;  %v2807_v14 = vsel %vm6778_vm8, %v2805_v30, %v2806_v58  ;;  %v556_v20 = vshll.u32 %v218_v50, 16  ;;  %v219_v33 = vld [vmem:[%s6531_s25 + $0xb0] sm:$0x1]  ;;  %v6937_v30 = vld [vmem:[%s6531_s25 + $0xb8] sm:$0xf] }
  0x78   : > { %v5310_v39 = vrot.slane %v5294_v53, 9  ;;  %v535_v22 = vsel %vm6557_vm5, %v530_v43, %v534_v38  ;;  %v5326_v47 = vcombine.low %v2804_v0, %v2807_v14  ;;  %v543_v23 = vor.u32 %v542_v6, %v539_v2 }
  0x79   : > { %v553_v5 = vor.u32 %v552_v12, %v548_v11  ;;  %v5042_v52 = vcombine.low %v525_v13, %v535_v22  ;;  %v558_v59 = vrot.slane %v556_v20, 5  ;;  %v2810_v31 = vrot.slane %v6679_v19, 5  ;;  %v6943_v20 = vld [vmem:[%s6531_s25 + $0xbc] sm:$0x1] }
  0x7a   : > { %v2813_v32 = vrot.slane %v6687_v35, 5  ;;  %5966 = vmatprep.mubr.msk.bf16.mxu0 %vm658_vm4, %v5326_v47  ;;  %v544_v42 = vrot.slane %v543_v23, 4  ;;  %v561_v38 = vshrl.u32 %v6908_v17, 16  ;;  %v564_v50 = vshll.u32 %v6908_v17, 16 }
  0x7b   : > { %v554_v48 = vrot.slane %v553_v5, 4  ;;  %5812 = vmatprep.mubr.msk.bf16.mxu1 %vm658_vm4, %v5042_v52  ;;  %v2811_v53 = vsel %vm6778_vm8, %v5310_v39, %v2810_v31  ;;  %v2812_v56 = vrot.slane %v2810_v31, 4  ;;  %v570_v19 = vshll.u32 %v6913_v24, 16  ;;  %v5296_v52 = vld [vmem:[%s6531_s25 + $0x60] sm:$0xe] }
  0x7c   : > { %v574_v35 = vshrl.u32 %v6913_v24, 16  ;;  %v549_v58 = vsel %vm6557_vm5, %v544_v42, %v548_v11  ;;  %v563_v9 = vrot.slane %v561_v38, 4  ;;  %v566_v34 = vrot.slane %v564_v50, 5 }
  0x7d   : > { %v559_v60 = vsel %vm6557_vm5, %v554_v48, %v558_v59  ;;  %v2814_v62 = vsel %vm6778_vm8, %v2812_v56, %v2813_v32  ;;  %v572_v63 = vrot.slane %v570_v19, 5  ;;  %v580_v6 = vshll.u32 %v219_v33, 16  ;;  %v5297_v48 = vld [vmem:[%s6531_s25 + $0x6c] sm:$0xe]  ;;  %v5233_v19 = vld [vmem:[%s6531_s25 + $0x70] sm:$0xf] }
  0x7e   : > { %v5043_v36 = vcombine.low %v549_v58, %v559_v60  ;;  %v576_v0 = vrot.slane %v574_v35, 4  ;;  %v5327_v2 = vcombine.low %v2811_v53, %v2814_v62  ;;  %v567_v43 = vor.u32 %v566_v34, %v563_v9  ;;  %v5234_v35 = vld [vmem:[%s6531_s25 + $0x74] sm:$0x1] }
  0x7f   : > { %v5311_v12 = vrot.slane %v5295_v25, 9  ;;  %v2817_v13 = vrot.slane %v6710_v8, 5  ;;  %v2820_v14 = vrot.slane %v6716_v28, 5  ;;  %v585_v39 = vshrl.u32 %v6928_v57, 16 }
  0x80   : > { %5813 = vmatmul.mubr.msk.bf16.gmra.mrb[24].mxu1 %vm658_vm4, %v5043_v36  ;;  %v577_v11 = vor.u32 %v576_v0, %v572_v63  ;;  %5967 = vmatmul.mubr.msk.bf16.gmra.mrb[8].mxu0 %vm658_vm4, %v5327_v2  ;;  %v568_v22 = vrot.slane %v567_v43, 4  ;;  %v582_v47 = vrot.slane %v580_v6, 5  ;;  %v588_v23 = vshll.u32 %v6928_v57, 16 }
  0x81   : > { %v594_v5 = vshll.u32 %v6937_v30, 16  ;;  %v2818_v8 = vsel %vm6778_vm8, %v5311_v12, %v2817_v13  ;;  %v2819_v28 = vrot.slane %v2817_v13, 4  ;;  %v587_v31 = vrot.slane %v585_v39, 4  ;;  %v5298_v13 = vld [vmem:[%s6531_s25 + $0x78] sm:$0xe] }
  0x82   : > { %v578_v59 = vrot.slane %v577_v11, 4  ;;  %v573_v32 = vsel %vm6557_vm5, %v568_v22, %v572_v63  ;;  %v590_v33 = vrot.slane %v588_v23, 5  ;;  %v598_v42 = vshrl.u32 %v6937_v30, 16  ;;  %v6408_v23 = vld [vmem:[%s6531_s25] sm:$0xf] }
  0x83   : > { %v596_v25 = vrot.slane %v594_v5, 5  ;;  %v2821_v50 = vsel %vm6778_vm8, %v2819_v28, %v2820_v14  ;;  %v604_v53 = vshll.u32 %v6943_v20, 16  ;;  %v5312_v56 = vrot.slane %v5296_v52, 9  ;;  %v6978_v5 = vld [vmem:[%s6531_s25 + $0x4] sm:$0xf] }
  0x84   : > { %v583_v38 = vsel %vm6557_vm5, %v578_v59, %v582_v47  ;;  %v5328_v60 = vcombine.low %v2818_v8, %v2821_v50  ;;  %v591_v9 = vor.u32 %v590_v33, %v587_v31  ;;  %v600_v34 = vrot.slane %v598_v42, 4  ;;  %v6982_v59 = vld [vmem:[%s6531_s25 + $0x7c] sm:$0xf]  ;;  %v6985_v8 = vld [vmem:[%s6531_s25 + $0x80] sm:$0x1] }
  0x85   : > { %v5044_v58 = vcombine.low %v573_v32, %v583_v38  ;;  %v606_v36 = vrot.slane %v604_v53, 5  ;;  %v2824_v62 = vrot.slane %v6740_v16, 5  ;;  %v2827_v63 = vrot.slane %v6747_v26, 5  ;;  %v5299_v28 = vld [vmem:[%s6531_s25 + $0x84] sm:$0xe] }
  0x86   : > { %v5313_v0 = vrot.slane %v5297_v48, 9  ;;  %5970 = vmatprep.mubr.msk.bf16.mxu0 %vm658_vm4, %v5328_v60  ;;  %v592_v2 = vrot.slane %v591_v9, 4  ;;  %v601_v43 = vor.u32 %v600_v34, %v596_v25  ;;  %v2831_v6 = vrot.slane %v5233_v19, 5  ;;  %v5239_v42 = vld [vmem:[%s6531_s25 + $0x88] sm:$0xf] }
  0x87   : > { %5816 = vmatprep.mubr.msk.bf16.mxu1 %vm658_vm4, %v5044_v58  ;;  %v2834_v12 = vrot.slane %v5234_v35, 5  ;;  %v2825_v11 = vsel %vm6778_vm8, %v5312_v56, %v2824_v62  ;;  %v2826_v16 = vrot.slane %v2824_v62, 4  ;;  %v5062_v52 = vcombine.low %v6408_v23, %v6978_v5  ;;  %v5240_v48 = vld [vmem:[%s6531_s25 + $0x8c] sm:$0x1]  ;;  %v5242_v53 = vld [vmem:[%s6531_s25 + $0x94] sm:$0xf] }
  0x88   : > { %v597_v26 = vsel %vm6557_vm5, %v592_v2, %v596_v25  ;;  %v602_v14 = vrot.slane %v601_v43, 4  ;;  %v2832_v39 = vsel %vm6778_vm8, %v5313_v0, %v2831_v6  ;;  %v2833_v22 = vrot.slane %v2831_v6, 4  ;;  %v5243_v9 = vld [vmem:[%s6531_s25 + $0x98] sm:$0x1]  ;;  %v5300_v34 = vld [vmem:[%s6531_s25 + $0x90] sm:$0xe] }
  0x89   : > { %v2828_v47 = vsel %vm6778_vm8, %v2826_v16, %v2827_v63  ;;  %v5314_v25 = vrot.slane %v5298_v13, 9  ;;  %v2838_v56 = vrot.slane %v6982_v59, 5  ;;  %v2841_v19 = vrot.slane %v6985_v8, 5  ;;  %v5245_v0 = vld [vmem:[%s6531_s25 + $0xa0] sm:$0xf] }
  0x8a   : > { %v607_v31 = vsel %vm6557_vm5, %v602_v14, %v606_v36  ;;  %v5329_v32 = vcombine.low %v2825_v11, %v2828_v47  ;;  %v2835_v33 = vsel %vm6778_vm8, %v2833_v22, %v2834_v12  ;;  %v5315_v35 = vrot.slane %v5299_v28, 9  ;;  %v5246_v6 = vld [vmem:[%s6531_s25 + $0xa4] sm:$0x1]  ;;  %v5301_v12 = vld [vmem:[%s6531_s25 + $0x9c] sm:$0xe] }
  0x8b   : > { %v5045_v38 = vcombine.low %v597_v26, %v607_v31  ;;  %v5330_v50 = vcombine.low %v2832_v39, %v2835_v33  ;;  %v2845_v58 = vrot.slane %v5239_v42, 5  ;;  %v2848_v60 = vrot.slane %v5240_v48, 5  ;;  %v6410_v11 = vld [vmem:[%s6531_s25 + $0xc] sm:$0xf]  ;;  %v7012_v16 = vld [vmem:[%s6531_s25 + $0x10] sm:$0xf] }
  0x8c   : > { %5971 = vmatmul.mubr.msk.bf16.gmra.mrb[12].mxu0 %vm658_vm4, %v5329_v32  ;;  %v2839_v36 = vsel %vm6778_vm8, %v5314_v25, %v2838_v56  ;;  %v2840_v62 = vrot.slane %v2838_v56, 4  ;;  %v2852_v63 = vrot.slane %v5242_v53, 5  ;;  %v5063_v13 = vcombine.low %v6410_v11, %v7012_v16  ;;  %v6412_v28 = vld [vmem:[%s6531_s25 + $0x18] sm:$0xf]  ;;  %v7021_v31 = vld [vmem:[%s6531_s25 + $0x1c] sm:$0xf] }
  0x8d   : > { %5817 = vmatmul.mubr.msk.bf16.gmra.mrb[28].mxu1 %vm658_vm4, %v5045_v38  ;;  %5974 = vmatprep.mubr.msk.bf16.mxu0 %vm658_vm4, %v5330_v50  ;;  %v2846_v2 = vsel %vm6778_vm8, %v5315_v35, %v2845_v58  ;;  %v2847_v43 = vrot.slane %v2845_v58, 4  ;;  %v5316_v14 = vrot.slane %v5300_v34, 9  ;;  %v2855_v39 = vrot.slane %v5243_v9, 5  ;;  %v5248_v48 = vld [vmem:[%s6531_s25 + $0xac] sm:$0xf] }
  0x8e   : > { %5822 = vmatprep.mubr.msk.bf16.mxu1 %vm658_vm4, %v5062_v52  ;;  %v2842_v26 = vsel %vm6778_vm8, %v2840_v62, %v2841_v19  ;;  %v2854_v23 = vrot.slane %v2852_v63, 4  ;;  %v2859_v52 = vrot.slane %v5245_v0, 5  ;;  %v5064_v32 = vcombine.low %v6412_v28, %v7021_v31  ;;  %v5251_v50 = vld [vmem:[%s6531_s25 + $0xb8] sm:$0xf]  ;;  %v5249_v53 = vld [vmem:[%s6531_s25 + $0xb0] sm:$0x1] }
  0x8f   : > { %v5331_v22 = vcombine.low %v2839_v36, %v2842_v26  ;;  %v2849_v47 = vsel %vm6778_vm8, %v2847_v43, %v2848_v60  ;;  %v5317_v25 = vrot.slane %v5301_v12, 9  ;;  %v2862_v42 = vrot.slane %v5246_v6, 5  ;;  %v5302_v56 = vld [vmem:[%s6531_s25 + $0xa8] sm:$0xe]  ;;  %v5467_v60 = vld [vmem:[%s8349_s1 + $0xe] sm:$0x3] }
  0x90   : > { %v5332_v33 = vcombine.low %v2846_v2, %v2849_v47  ;;  %v2861_v38 = vrot.slane %v2859_v52, 4  ;;  %v2853_v19 = vsel %vm6778_vm8, %v5316_v14, %v2852_v63  ;;  %v2856_v35 = vsel %vm6778_vm8, %v2854_v23, %v2855_v39  ;;  %v5303_v36 = vld [vmem:[%s6531_s25 + $0xb4] sm:$0xe]  ;;  %v5252_v63 = vld [vmem:[%s6531_s25 + $0xbc] sm:$0x1] }
  0x91   : > { %v2866_v58 = vrot.slane %v5248_v48, 5  ;;  %v2860_v9 = vsel %vm6778_vm8, %v5317_v25, %v2859_v52  ;;  %v2873_v62 = vrot.slane %v5251_v50, 5  ;;  %v6414_v0 = vld [vmem:[%s6531_s25 + $0x24] sm:$0xf]  ;;  %v7048_v2 = vld [vmem:[%s6531_s25 + $0x28] sm:$0xf]  ;;  %v5333_v6 = vcombine.low %v2853_v19, %v2856_v35 }
  0x92   : > { %v2863_v34 = vsel %vm6778_vm8, %v2861_v38, %v2862_v42  ;;  %v5065_v43 = vcombine.low %v6414_v0, %v7048_v2  ;;  %v5254_v12 = vld [vmem:[%s6531_s25 + $0xc4] sm:$0xf]  ;;  %v7053_v11 = vand.u32 %v5467_v60, %v6505_v4  ;;  %v2869_v14 = vrot.slane %v5249_v53, 5  ;;  %v6416_v47 = vld [vmem:[%s6531_s25 + $0x30] sm:$0xf] }
  0x93   : > { %v2868_v26 = vrot.slane %v2866_v58, 4  ;;  %v5319_v39 = vrot.slane %v5303_v36, 9  ;;  %v7060_v23 = vld [vmem:[%s6531_s25 + $0x34] sm:$0xf]  ;;  %v2875_v28 = vrot.slane %v2873_v62, 4  ;;  %v2880_v48 = vrot.slane %v5254_v12, 5 }
  0x94   : > { %5975 = vmatmul.mubr.msk.bf16.gmra.mrb[16].mxu0 %vm658_vm4, %v5331_v22  ;;  %v5175_v22 = vld [vmem:[%s8349_s1 + $0x6] sm:$0x3]  ;;  %v5066_v52 = vcombine.low %v6416_v47, %v7060_v23  ;;  %6024 = vmatprep.subr.bf16.mxu0 %v7053_v11  ;;  %v5255_v53 = vld [vmem:[%s6531_s25 + $0xc8] sm:$0x1]  ;;  %v6418_v19 = vld [vmem:[%s6531_s25 + $0x3c] sm:$0xf] }
  0x95   : > { %5823 = vmatmul.mubr.msk.bf16.vlgmr.msra.gmra.mrb[0].mxu1 %vm658_vm4, %v5063_v13  ;;  %5978 = vmatprep.mubr.msk.bf16.mxu0 %vm658_vm4, %v5332_v33  ;;  %v5334_v13 = vcombine.low %v2860_v9, %v2863_v34  ;;  %v7066_v33 = vand.u32 %v5175_v22, %v6505_v4  ;;  %v2870_v42 = vsel %vm6778_vm8, %v2868_v26, %v2869_v14  ;;  %v7084_v35 = vld [vmem:[%s6531_s25 + $0x40] sm:$0xf]  ;;  %v2882_v36 = vrot.slane %v2880_v48, 4  ;;  %v6369_v12 = vld [vmem:[%s6531_s25 + $0x18] sm:$0xff]   ;;  %v6420_v47 = vld [vmem:[%s6531_s25 + $0x8] sm:$0x1] }
  0x96   : > { %5855 = vmatpush3.bf16.msra.mxu1 %v6566_v46  ;;  %5826 = vmatprep.mubr.msk.bf16.mxu1 %vm658_vm4, %v5064_v32  ;;  %v5318_v46 = vrot.slane %v5302_v56, 9  ;;  %v2876_v32 = vrot.slane %v5252_v63, 5  ;;  %v2874_v38 = vsel %vm6778_vm8, %v5319_v39, %v2873_v62  ;;  %v5304_v56 = vld [vmem:[%s6531_s25 + $0xc0] sm:$0xe]  ;;  %v2883_v63 = vrot.slane %v5255_v53, 5 }
  0x97   : > { %5888 = vmatprep.subr.bf16.mxu1 %v7066_v33  ;;  %v5320_v34 = vrot.slane %v5304_v56, 9  ;;  %v5068_v62 = vcombine.low %v6691_v41, %v6694_v49  ;;  %v2261_v41 = vshrl.u32 %v6982_v59, 16  ;;  %v5070_v26 = vcombine.low %v6751_v44, %v6757_v54  ;;  %v1167_v22 = vld [vmem:[%s6531_s25] sm:$0xe]  ;;  %v6421_v44 = vld [vmem:[%s6531_s25 + $0x14] sm:$0x1] }
  0x98   : > { %v2867_v25 = vsel %vm6778_vm8, %v5318_v46, %v2866_v58  ;;  %v2877_v50 = vsel %vm6778_vm8, %v2875_v28, %v2876_v32  ;;  %v5067_v58 = vcombine.low %v6418_v19, %v7084_v35  ;;  %v5069_v46 = vcombine.low %v6720_v10, %v6726_v51  ;;  %v1169_v51 = vld [vmem:[%s6531_s25 + $0x18] sm:$0xe]  ;;  %v1171_v53 = vld [vmem:[%s6531_s25 + $0x30] sm:$0xe] }
  0x99   : > { %v5335_v60 = vcombine.low %v2867_v25, %v2870_v42  ;;  %v5336_v9 = vcombine.low %v2874_v38, %v2877_v50  ;;  %v2881_v0 = vsel %vm6778_vm8, %v5320_v34, %v2880_v48  ;;  %v2263_v39 = vrot.slane %v2261_v41, 4  ;;  %v1170_v25 = vld [vmem:[%s6531_s25 + $0x24] sm:$0xe]  ;;  %v6373_v56 = vld [vmem:[%s6531_s25 + $0x30] sm:$0xff]  }
  0x9a   : > { %v1220_v10 = vrot.slane %v6978_v5, 5  ;;  %v1230_v54 = vrot.slane %v6421_v44, 5  ;;  %v5094_v28 = vrot.slane %v1167_v22, 9  ;;  %v1234_v32 = vrot.slane %v7021_v31, 5  ;;  %v6371_v38 = vld [vmem:[%s6531_s25 + $0x24] sm:$0xff]  }
  0x9b   : > { %v5071_v48 = vcombine.low %v6772_v18, %v6785_v55  ;;  %v1241_v50 = vrot.slane %v7048_v2, 5  ;;  %v5073_v31 = vcombine.low %v6830_v61, %v6838_v29  ;;  %v5532_v18 = vld [vmem:[%s8349_s1 + $0x10] sm:$0x3]  ;;  %v5096_v2 = vrot.slane %v1169_v51, 9  ;;  %v6425_v22 = vld [vmem:[%s6531_s25 + $0x4c] sm:$0xf] }
  0x9c   : > { %5979 = vmatmul.mubr.msk.bf16.gmra.mrb[20].mxu0 %vm658_vm4, %v5333_v6  ;;  %v2257_v6 = vshll.u32 %v6982_v59, 16  ;;  %v1168_v59 = vld [vmem:[%s6531_s25 + $0xc] sm:$0xe]  ;;  %v1222_v55 = vrot.slane %v1220_v10, 4  ;;  %v5097_v34 = vrot.slane %v1170_v25, 9  ;;  %v6375_v25 = vld [vmem:[%s6531_s25 + $0x3c] sm:$0xff]  }
  0x9d   : > { %5827 = vmatmul.mubr.msk.bf16.gmra.mrb[4].mxu1 %vm658_vm4, %v5065_v43  ;;  %5982 = vmatprep.mubr.msk.bf16.mxu0 %vm658_vm4, %v5334_v13  ;;  %v2884_v43 = vsel %vm6778_vm8, %v2882_v36, %v2883_v63  ;;  %v1227_v13 = vrot.slane %v7012_v16, 5  ;;  %v2267_v16 = vshll.u32 %v6985_v8, 16  ;;  %v5095_v5 = vrot.slane %v1168_v59, 9  ;;  %v1172_v63 = vld [vmem:[%s6531_s25 + $0x3c] sm:$0xe] }
  0x9e   : > { %5830 = vmatprep.mubr.msk.bf16.mxu1 %vm658_vm4, %v5066_v52  ;;  %v5337_v49 = vcombine.low %v2881_v0, %v2884_v43  ;;  %v7105_v14 = vrot.slane %v2257_v6, 5  ;;  %v1223_v52 = vrot.slane %v6420_v47, 5  ;;  %v5072_v8 = vcombine.low %v6804_v15, %v6811_v21  ;;  %v6423_v6 = vld [vmem:[%s6531_s25 + $0x2c] sm:$0x1]  ;;  %v6431_v61 = vld [vmem:[%s6531_s25 + $0x68] sm:$0x1] }
  0x9f   : > { %v1229_v19 = vrot.slane %v1227_v13, 4  ;;  %v5074_v15 = vcombine.low %v6857_v40, %v6867_v1  ;;  %v7140_v21 = vsel %vm6778_vm8, %v5094_v28, %v1220_v10  ;;  %v1236_v36 = vrot.slane %v1234_v32, 4 }
  0xa0   : > { %8373 = vst [vmem:[#allocation3_spill] sm:$0xff] %v7105_v14  ;;  %v2264_v42 = vor.u32 %v2263_v39, %v7105_v14  ;;  %v7146_v0 = vsel %vm6778_vm8, %v5095_v5, %v1227_v13  ;;  %v1243_v43 = vrot.slane %v1241_v50, 4  ;;  %v1244_v41 = vrot.slane %v6423_v6, 5  ;;  %v6427_v5 = vld [vmem:[%s6531_s25 + $0x50] sm:$0x1] }
  0xa1   : > { %v1255_v39 = vrot.slane %v7084_v35, 5  ;;  %v1262_v59 = vrot.slane %v6425_v22, 5  ;;  %v7156_v47 = vrot.slane %v2267_v16, 5  ;;  %v7166_v13 = vsel %vm6778_vm8, %v1229_v19, %v1230_v54  ;;  %v6426_v16 = vld [vmem:[%s6531_s25 + $0x44] sm:$0x1] }
  0xa2   : > { %v7170_v35 = vsel %vm6778_vm8, %v5096_v2, %v1234_v32  ;;  %v7172_v10 = vrot.slane %v2264_v42, 4  ;;  %v7190_v44 = vsel %vm6778_vm8, %v1243_v43, %v1244_v41  ;;  %v5099_v54 = vrot.slane %v1172_v63, 9 }
  0xa3   : > { %8374 = vst [vmem:[#allocation4_spill] sm:$0xff] %v7156_v47  ;;  %v1258_v28 = vrot.slane %v6426_v16, 5  ;;  %v1279_v29 = vrot.slane %v6431_v61, 5  ;;  %v6381_v61 = vld [vmem:[%s6531_s25 + $0x60] sm:$0xff]  }
  0xa4   : > { %5983 = vmatmul.mubr.msk.bf16.gmra.mrb[24].mxu0 %vm658_vm4, %v5335_v60  ;;  %v6422_v60 = vld [vmem:[%s6531_s25 + $0x20] sm:$0x1]  ;;  %8375 = vst [vmem:[#allocation5_spill] sm:$0xff] %v7172_v10  ;;  %v7224_v6 = vsel %vm6778_vm8, %v5099_v54, %v1255_v39  ;;  %v5422_v54 = vld [vmem:[%s6531_s25 + $0x24] sm:$0xf] }
  0xa5   : > { %5831 = vmatmul.mubr.msk.bf16.gmra.mrb[8].mxu1 %vm658_vm4, %v5067_v58  ;;  %5986 = vmatprep.mubr.msk.bf16.mxu0 %vm658_vm4, %v5336_v9  ;;  %v1248_v58 = vrot.slane %v7060_v23, 5  ;;  %v1237_v9 = vrot.slane %v6422_v60, 5  ;;  %v5098_v23 = vrot.slane %v1171_v53, 9  ;;  %v6377_v53 = vld [vmem:[%s6531_s25 + $0x48] sm:$0xff]   ;;  %v3614_v40 = vshll.u32 %v5422_v54, 16 }
  0xa6   : > { %5834 = vmatprep.mubr.msk.bf16.mxu1 %vm658_vm4, %v5068_v62  ;;  %v1173_v62 = vld [vmem:[%s6531_s25 + $0x48] sm:$0xe]  ;;  %v1178_v10 = vld [vmem:[%s6531_s25 + $0x84] sm:$0xe] }
  0xa7   : > { %v7186_v51 = vsel %vm6778_vm8, %v5098_v23, %v1248_v58  ;;  %v5100_v32 = vrot.slane %v1173_v62, 9  ;;  %v6429_v23 = vld [vmem:[%s6531_s25 + $0x64] sm:$0xf]  ;;  %v6432_v62 = vld [vmem:[%s6531_s25 + $0x70] sm:$0xf] }
  0xa8   : > { %v1276_v63 = vrot.slane %v6429_v23, 5 }
  0xa9   : > { %v7228_v41 = vsel %vm6778_vm8, %v5100_v32, %v1262_v59 }
  0xac   : > { %5987 = vmatmul.mubr.msk.bf16.gmra.mrb[28].mxu0 %vm658_vm4, %v5337_v49  ;;  %v7150_v49 = vand.u32 %v5532_v18, %v6505_v4  ;;  %v7162_v4 = vsel %vm6778_vm8, %v1222_v55, %v1223_v52  ;;  %v7182_v52 = vsel %vm6778_vm8, %v5097_v34, %v1241_v50  ;;  %v1265_v50 = vrot.slane %v6427_v5, 5  ;;  %v5419_v55 = vld [vmem:[%s6531_s25 + $0x18] sm:$0xf]  ;;  %v1174_v34 = vld [vmem:[%s6531_s25 + $0x54] sm:$0xe] }
  0xad   : > { %5835 = vmatmul.mubr.msk.bf16.gmra.mrb[12].mxu1 %vm658_vm4, %v5069_v46  ;;  %5992 = vmatprep.mubr.msk.bf16.mxu0 %vm658_vm4, %v6369_v12  ;;  %v1250_v46 = vrot.slane %v1248_v58, 4  ;;  %v6424_v12 = vld [vmem:[%s6531_s25 + $0x38] sm:$0x1]  ;;  %v3590_v22 = vshll.u32 %v5419_v55, 16  ;;  %v5421_v5 = vld [vmem:[%s6531_s25 + $0x20] sm:$0x1] }
  0xae   : > { %5838 = vmatprep.mubr.msk.bf16.mxu1 %vm658_vm4, %v5070_v26  ;;  %v1251_v26 = vrot.slane %v6424_v12, 5  ;;  %v6428_v58 = vld [vmem:[%s6531_s25 + $0x58] sm:$0xf] }
  0xaf   : > { %v1269_v18 = vrot.slane %v6428_v58, 5 }
  0xb0   : > { %v7197_v42 = vsel %vm6778_vm8, %v1250_v46, %v1251_v26  ;;  %v5420_v46 = vld [vmem:[%s6531_s25 + $0x1c] sm:$0xf] }
  0xb1   : > { %v1271_v16 = vrot.slane %v1269_v18, 4 }
  0xb4   : > { %5993 = vmatmul.mubr.msk.bf16.vlgmr.msra.gmra.mrb[0].mxu0 %vm658_vm4, %v6371_v38  ;;  %v1264_v38 = vrot.slane %v1262_v59, 4  ;;  %v5101_v59 = vrot.slane %v1174_v34, 9  ;;  %v3611_v34 = vshrl.u32 %v5422_v54, 16  ;;  %v1176_v54 = vld [vmem:[%s6531_s25 + $0x6c] sm:$0xe] }
  0xb5   : > { %5839 = vmatmul.mubr.msk.bf16.gmra.mrb[16].mxu1 %vm658_vm4, %v5071_v48  ;;  %6025 = vmatpush3.bf16.msra.mxu0 %v7053_v11  ;;  %v7178_v11 = vsel %vm6778_vm8, %v1236_v36, %v1237_v9  ;;  %v1257_v48 = vrot.slane %v1255_v39, 4  ;;  %v1175_v36 = vld [vmem:[%s6531_s25 + $0x60] sm:$0xe]  ;;  %v3587_v39 = vshrl.u32 %v5419_v55, 16  ;;  %v5424_v9 = vld [vmem:[%s6531_s25 + $0x2c] sm:$0x1] }
  0xb6   : > { %5842 = vmatprep.mubr.msk.bf16.mxu1 %vm658_vm4, %v5072_v8  ;;  %5996 = vmatprep.mubr.msk.bf16.mxu0 %vm658_vm4, %v6373_v56  ;;  %v5075_v8 = vcombine.low %v6876_v3, %v6887_v27  ;;  %v5076_v56 = vcombine.low %v6908_v17, %v6913_v24  ;;  %v7238_v26 = vsel %vm6778_vm8, %v1264_v38, %v1265_v50  ;;  %v1278_v38 = vrot.slane %v1276_v63, 4 }
  0xb7   : > { %6058 = vmatprep.subr.bf16.mxu0 %v7150_v49  ;;  %v7234_v12 = vsel %vm6778_vm8, %v1257_v48, %v1258_v28  ;;  %v6430_v28 = vld [vmem:[%s6531_s25 + $0x5c] sm:$0x1]  ;;  %v5423_v48 = vld [vmem:[%s6531_s25 + $0x28] sm:$0xf]  ;;  %v3600_v50 = vshrl.u32 %v5420_v46, 16  ;;  %v3589_v1 = vrot.slane %v3587_v39, 4 }
  0xb8   : > { %v1272_v32 = vrot.slane %v6430_v28, 5  ;;  %v3624_v23 = vshrl.u32 %v5423_v48, 16  ;;  %v5425_v28 = vld [vmem:[%s6531_s25 + $0x30] sm:$0xf]  ;;  %v3606_v39 = vshll.u32 %v5421_v5, 16  ;;  %v3613_v60 = vrot.slane %v3611_v34, 4 }
  0xb9   : > { %v3602_v43 = vrot.slane %v3600_v50, 4  ;;  %v3638_v2 = vshll.u32 %v5425_v28, 16  ;;  %v3630_v34 = vshll.u32 %v5424_v9, 16  ;;  %v7312_v9 = vld [vmem:[%s6531_s25 + $0x38] sm:$0x1] }
  0xba   : > { %v7267_v58 = vsel %vm6778_vm8, %v1271_v16, %v1272_v32  ;;  %v3616_v16 = vrot.slane %v3614_v40, 5  ;;  %v3635_v32 = vshrl.u32 %v5425_v28, 16  ;;  %v5428_v40 = vld [vmem:[%s6531_s25 + $0x3c] sm:$0xf]  ;;  %8376 = vst [vmem:[#allocation6_spill] sm:$0xff] %v7312_v9  ;;  %v3654_v14 = vshll.u32 %v7312_v9, 16 }
  0xbb   : > { %v6390_v9 = vld [vmem:[%s6531_s25 + $0xc0] sm:$0xff]  }
  0xbc   : > { %5997 = vmatmul.mubr.msk.bf16.gmra.mrb[4].mxu0 %vm658_vm4, %v6375_v25  ;;  %v5102_v25 = vrot.slane %v1175_v36, 9  ;;  %v3620_v36 = vshll.u32 %v5423_v48, 16  ;;  %v3637_v28 = vrot.slane %v3635_v32, 4  ;;  %v3662_v32 = vshll.u32 %v5428_v40, 16 }
  0xbd   : > { %5843 = vmatmul.mubr.msk.bf16.gmra.mrb[20].mxu1 %vm658_vm4, %v5073_v31  ;;  %6000 = vmatprep.mubr.msk.bf16.mxu0 %vm658_vm4, %v6377_v53  ;;  %v3596_v31 = vshll.u32 %v5420_v46, 16  ;;  %v6379_v53 = vld [vmem:[%s6531_s25 + $0x54] sm:$0xff]   ;;  %v7263_v46 = vsel %vm6778_vm8, %v5101_v59, %v1269_v18  ;;  %v1283_v18 = vrot.slane %v6432_v62, 5  ;;  %v6435_v62 = vld [vmem:[%s6531_s25 + $0x80] sm:$0x1] }
  0xbe   : > { %5846 = vmatprep.mubr.msk.bf16.mxu1 %vm658_vm4, %v5074_v15  ;;  %v3592_v15 = vrot.slane %v3590_v22, 5  ;;  %v7271_v55 = vsel %vm6778_vm8, %v5102_v25, %v1276_v63  ;;  %v7276_v22 = vsel %vm6778_vm8, %v1278_v38, %v1279_v29  ;;  %v5426_v59 = vld [vmem:[%s6531_s25 + $0x34] sm:$0xf]  ;;  %v5103_v25 = vrot.slane %v1176_v54, 9  ;;  %v6383_v54 = vld [vmem:[%s6531_s25 + $0x6c] sm:$0xff]  }
  0xbf   : > { %v7278_v48 = vrot.slane %v3596_v31, 5  ;;  %v7284_v5 = vrot.slane %v3620_v36, 5  ;;  %v3626_v38 = vrot.slane %v3624_v23, 4  ;;  %v3644_v31 = vshll.u32 %v5426_v59, 16  ;;  %v6434_v36 = vld [vmem:[%s6531_s25 + $0x7c] sm:$0xf] }
  0xc0   : > { %v3593_v63 = vor.u32 %v3592_v15, %v3589_v1  ;;  %v3648_v50 = vshrl.u32 %v5426_v59, 16  ;;  %v1285_v27 = vrot.slane %v1283_v18, 4  ;;  %v3617_v1 = vor.u32 %v3616_v16, %v3613_v60  ;;  %v1177_v15 = vld [vmem:[%s6531_s25 + $0x78] sm:$0xe]  ;;  %v7317_v16 = vld [vmem:[%s6531_s25 + $0x40] sm:$0xf] }
  0xc1   : > { %v3603_v3 = vor.u32 %v3602_v43, %v7278_v48  ;;  %v1290_v23 = vrot.slane %v6434_v36, 5  ;;  %v6384_v59 = vld [vmem:[%s6531_s25 + $0x78] sm:$0xff]   ;;  %v7308_v43 = vsel %vm6778_vm8, %v5103_v25, %v1283_v18  ;;  %v7314_v29 = vrot.slane %v3644_v31, 5  ;;  %8377 = vst [vmem:[#allocation7_spill] sm:$0xff] %v7317_v16 }
  0xc2   : > { %v3594_v17 = vrot.slane %v3593_v63, 4  ;;  %v3650_v60 = vrot.slane %v3648_v50, 4  ;;  %v3632_v63 = vrot.slane %v3630_v34, 5  ;;  %v5104_v18 = vrot.slane %v1177_v15, 9 }
  0xc3   : > { %v3604_v36 = vrot.slane %v3603_v3, 4  ;;  %v3618_v25 = vrot.slane %v3617_v1, 4  ;;  %v1293_v19 = vrot.slane %v6435_v62, 5  ;;  %v3668_v3 = vshll.u32 %v7317_v16, 16 }
  0xc4   : > { %6001 = vmatmul.mubr.msk.bf16.gmra.mrb[8].mxu0 %vm658_vm4, %v6379_v53  ;;  %v3651_v62 = vor.u32 %v3650_v60, %v7314_v29  ;;  %v3664_v15 = vrot.slane %v3662_v32, 5  ;;  %v6385_v60 = vld [vmem:[%s6531_s25 + $0x84] sm:$0xff]  }
  0xc5   : > { %5847 = vmatmul.mubr.msk.bf16.gmra.mrb[24].mxu1 %vm658_vm4, %v5075_v8  ;;  %6004 = vmatprep.mubr.msk.bf16.mxu0 %vm658_vm4, %v6381_v61  ;;  %v6433_v8 = vld [vmem:[%s6531_s25 + $0x74] sm:$0x1]  ;;  %v3640_v61 = vrot.slane %v3638_v2, 5  ;;  %v3659_v2 = vshrl.u32 %v5428_v40, 16  ;;  %v3672_v40 = vshrl.u32 %v7317_v16, 16  ;;  %v7365_v32 = vrot.slane %v3668_v3, 5 }
  0xc6   : > { %5850 = vmatprep.mubr.msk.bf16.mxu1 %vm658_vm4, %v5076_v56  ;;  %v1286_v53 = vrot.slane %v6433_v8, 5  ;;  %v3608_v56 = vrot.slane %v3606_v39, 5  ;;  %v3627_v8 = vor.u32 %v3626_v38, %v7284_v5  ;;  %v1292_v38 = vrot.slane %v1290_v23, 4 }
  0xc7   : > { %v3641_v31 = vor.u32 %v3640_v61, %v3637_v28  ;;  %v3661_v1 = vrot.slane %v3659_v2, 4  ;;  %v8379_v28 = vcombine.low %v7140_v21, %v7162_v4  ;;  %v3623_v21 = vsel %vm6557_vm5, %v3618_v25, %v7284_v5  ;;  %v6386_v5 = vld [vmem:[%s6531_s25 + $0x90] sm:$0xff]   ;;  %v6437_v25 = vld [vmem:[%s6531_s25 + $0x8c] sm:$0x1] }
  0xc8   : > { %v7321_v39 = vsel %vm6778_vm8, %v1285_v27, %v1286_v53  ;;  %v3628_v50 = vrot.slane %v3627_v8, 4  ;;  %v8378_v27 = vcombine.low %v6928_v57, %v6937_v30  ;;  %v6436_v53 = vld [vmem:[%s6531_s25 + $0x88] sm:$0xf]  ;;  %v3599_v57 = vsel %vm6557_vm5, %v3594_v17, %v7278_v48 }
  0xc9   : > { %v1297_v34 = vrot.slane %v6436_v53, 5  ;;  %v3609_v61 = vsel %vm6557_vm5, %v3604_v36, %v3608_v56  ;;  %v7356_v4 = vsel %vm6778_vm8, %v1292_v38, %v1293_v19  ;;  %v3642_v48 = vrot.slane %v3641_v31, 4  ;;  %v7359_v56 = vld [vmem:[%s6531_s25 + $0x44] sm:$0x1]  ;;  %v5431_v8 = vld [vmem:[%s6531_s25 + $0x48] sm:$0xf] }
  0xca   : > { %v5105_v17 = vrot.slane %v1178_v10, 9  ;;  %8380 = vst [vmem:[#allocation8_spill] sm:$0xff] %v7359_v56  ;;  %v3656_v2 = vrot.slane %v3654_v14, 5  ;;  %v3674_v36 = vrot.slane %v3672_v40, 4  ;;  %v1300_v38 = vrot.slane %v6437_v25, 5 }
  0xcb   : > { %v1299_v19 = vrot.slane %v1297_v34, 4  ;;  %v3665_v10 = vor.u32 %v3664_v15, %v3661_v1  ;;  %v7370_v31 = vld [vmem:[%s6531_s25 + $0x4c] sm:$0xf]  ;;  %v3678_v53 = vshll.u32 %v7359_v56, 16  ;;  %v3683_v14 = vshrl.u32 %v5431_v8, 16 }
  0xcc   : > { %6005 = vmatmul.mubr.msk.bf16.gmra.mrb[12].mxu0 %vm658_vm4, %v6383_v54  ;;  %v7385_v1 = vsel %vm6778_vm8, %v5105_v17, %v1297_v34  ;;  %v5434_v15 = vld [vmem:[%s6531_s25 + $0x54] sm:$0xf] }
  0xcd   : > { %5851 = vmatmul.mubr.msk.bf16.gmra.mrb[28].mxu1 %vm658_vm4, %v8378_v27  ;;  %6008 = vmatprep.mubr.msk.bf16.mxu0 %vm658_vm4, %v6384_v59  ;;  %v7349_v59 = vsel %vm6778_vm8, %v5104_v18, %v1290_v23  ;;  %v3633_v23 = vsel %vm6557_vm5, %v3628_v50, %v3632_v63  ;;  %v3652_v18 = vrot.slane %v3651_v62, 4  ;;  %v7372_v27 = vcombine.low %v3599_v57, %v3609_v61  ;;  %v1179_v63 = vld [vmem:[%s6531_s25 + $0x90] sm:$0xe]  ;;  %v6438_v57 = vld [vmem:[%s6531_s25 + $0x94] sm:$0xf] }
  0xce   : > { %5856 = vmatprep.mubr.msk.bf16.mxu1 %vm658_vm4, %v8379_v28  ;;  %v3686_v50 = vshll.u32 %v5431_v8, 16  ;;  %v7376_v3 = vcombine.low %v3623_v21, %v3633_v23  ;;  %v3647_v62 = vsel %vm6557_vm5, %v3642_v48, %v7314_v29  ;;  %v3675_v28 = vor.u32 %v3674_v36, %v7365_v32  ;;  %v7394_v23 = vld [vmem:[%s6531_s25 + $0x58] sm:$0xf] }
  0xcf   : > { %v1304_v61 = vrot.slane %v6438_v57, 5  ;;  %v3692_v21 = vshll.u32 %v7370_v31, 16  ;;  %v3696_v8 = vshrl.u32 %v7370_v31, 16  ;;  %v8381_v29 = vcombine.low %v7146_v0, %v7166_v13  ;;  %v6439_v36 = vld [vmem:[%s6531_s25 + $0x98] sm:$0x1] }
  0xd0   : > { %v3657_v34 = vsel %vm6557_vm5, %v3652_v18, %v3656_v2  ;;  %v7405_v48 = vsel %vm6778_vm8, %v1299_v19, %v1300_v38  ;;  %v7407_v17 = vrot.slane %v3665_v10, 4  ;;  %v8382_v0 = vcombine.low %v7170_v35, %v7178_v11  ;;  %v5437_v10 = vld [vmem:[%s6531_s25 + $0x60] sm:$0xf] }
  0xd1   : > { %v7414_v13 = vrot.slane %v3678_v53, 5  ;;  %v1307_v2 = vrot.slane %v6439_v36, 5  ;;  %v3688_v18 = vrot.slane %v3686_v50, 5  ;;  %v3707_v19 = vshrl.u32 %v5434_v15, 16  ;;  %v6387_v35 = vld [vmem:[%s6531_s25 + $0x9c] sm:$0xff]   ;;  %v6388_v50 = vld [vmem:[%s6531_s25 + $0xa8] sm:$0xff]  }
  0xd2   : > { %v3710_v25 = vshll.u32 %v5434_v15, 16  ;;  %v3716_v38 = vshll.u32 %v7394_v23, 16  ;;  %v7422_v11 = vrot.slane %v3675_v28, 4  ;;  %v1306_v53 = vrot.slane %v1304_v61, 4  ;;  %v7440_v28 = vld [vmem:[%s6531_s25 + $0x50] sm:$0x1] }
  0xd3   : > { %v7427_v57 = vcombine.low %v3647_v62, %v3657_v34  ;;  %v6440_v36 = vld [vmem:[%s6531_s25 + $0xa0] sm:$0xf]  ;;  %v7445_v34 = vld [vmem:[%s6531_s25 + $0x64] sm:$0xf]  ;;  %v3731_v15 = vshrl.u32 %v5437_v10, 16  ;;  %v3734_v40 = vshll.u32 %v5437_v10, 16 }
  0xd4   : > { %6009 = vmatmul.mubr.msk.bf16.gmra.mrb[16].mxu0 %vm658_vm4, %v6385_v60  ;;  %v5106_v60 = vrot.slane %v1179_v63, 9  ;;  %v7424_v63 = vrot.slane %v3692_v21, 5  ;;  %v1180_v21 = vld [vmem:[%s6531_s25 + $0x9c] sm:$0xe]  ;;  %v1311_v62 = vrot.slane %v6440_v36, 5  ;;  %8383 = vst [vmem:[#allocation9_spill] sm:$0xff] %v7445_v34 }
  0xd5   : > { %5857 = vmatmul.mubr.msk.bf16.vlgmr.msra.gmra.mrb[0].mxu1 %vm658_vm4, %v8381_v29  ;;  %6012 = vmatprep.mubr.msk.bf16.mxu0 %vm658_vm4, %v6386_v5  ;;  %v3685_v5 = vrot.slane %v3683_v14, 4  ;;  %v3698_v14 = vrot.slane %v3696_v8, 4  ;;  %v3709_v54 = vrot.slane %v3707_v19, 4  ;;  %v3712_v56 = vrot.slane %v3710_v25, 5  ;;  %v7461_v19 = vld [vmem:[%s6531_s25 + $0x5c] sm:$0x1] }
  0xd6   : > { %5889 = vmatpush3.bf16.msra.mxu1 %v7066_v33  ;;  %5860 = vmatprep.mubr.msk.bf16.mxu1 %vm658_vm4, %v8382_v0  ;;  %v3720_v33 = vshrl.u32 %v7394_v23, 16  ;;  %v7437_v0 = vsel %vm6778_vm8, %v5106_v60, %v1304_v61  ;;  %v7447_v16 = vrot.slane %v3716_v38, 5  ;;  %v3681_v61 = vsel %vm6557_vm5, %v7422_v11, %v7414_v13  ;;  %v1181_v13 = vld [vmem:[%s6531_s25 + $0xa8] sm:$0xe] }
  0xd7   : > { %6092 = vmatprep.subr.bf16.mxu1 %v6514_v7  ;;  %v3689_v8 = vor.u32 %v3688_v18, %v3685_v5  ;;  %v7456_v60 = vsel %vm6778_vm8, %v1306_v53, %v1307_v2  ;;  %v3699_v5 = vor.u32 %v3698_v14, %v7424_v63  ;;  %v3702_v18 = vshll.u32 %v7440_v28, 16  ;;  %v7484_v7 = vld [vmem:[%s6531_s25 + $0x68] sm:$0x1] }
  0xd8   : > { %v3722_v29 = vrot.slane %v3720_v33, 4  ;;  %v8384_v25 = vcombine.low %v7182_v52, %v7190_v44  ;;  %v5107_v38 = vrot.slane %v1180_v21, 9  ;;  %v1318_v2 = vrot.slane %v6913_v24, 5  ;;  %v6441_v44 = vld [vmem:[%s6531_s25 + $0xa4] sm:$0x1]  ;;  %8386 = vst [vmem:[#allocation10_spill] sm:$0xff] %v7484_v7 }
  0xd9   : > { %v3740_v33 = vshll.u32 %v7445_v34, 16  ;;  %v3744_v10 = vshrl.u32 %v7445_v34, 16  ;;  %v3690_v52 = vrot.slane %v3689_v8, 4  ;;  %v1314_v11 = vrot.slane %v6441_v44, 5 }
  0xda   : > { %v3733_v53 = vrot.slane %v3731_v15, 4  ;;  %v3736_v14 = vrot.slane %v3734_v40, 5  ;;  %v1313_v21 = vrot.slane %v1311_v62, 4  ;;  %v3713_v24 = vor.u32 %v3712_v56, %v3709_v54  ;;  %v6442_v40 = vld [vmem:[%s6531_s25 + $0xb0] sm:$0x1] }
  0xdb   : > { %v3723_v36 = vor.u32 %v3722_v29, %v7447_v16  ;;  %v3704_v8 = vrot.slane %v3702_v18, 5  ;;  %v1320_v15 = vrot.slane %v1318_v2, 4  ;;  %v1321_v44 = vrot.slane %v6442_v40, 5  ;;  %v1182_v56 = vld [vmem:[%s6531_s25 + $0xb4] sm:$0xe] }
  0xdc   : > { %6013 = vmatmul.mubr.msk.bf16.gmra.mrb[20].mxu0 %vm658_vm4, %v6387_v35  ;;  %v8385_v35 = vcombine.low %v7186_v51, %v7197_v42  ;;  %v3700_v42 = vrot.slane %v3699_v5, 4  ;;  %v7487_v47 = vrot.slane %v3740_v33, 5  ;;  %v3746_v54 = vrot.slane %v3744_v10, 4 }
  0xdd   : > { %5861 = vmatmul.mubr.msk.bf16.gmra.mrb[4].mxu1 %vm658_vm4, %v8384_v25  ;;  %6016 = vmatprep.mubr.msk.bf16.mxu0 %vm658_vm4, %v6388_v50  ;;  %v6389_v50 = vld [vmem:[%s6531_s25 + $0xb4] sm:$0xff]   ;;  %v3726_v25 = vshll.u32 %v7461_v19, 16  ;;  %v3695_v29 = vsel %vm6557_vm5, %v3690_v52, %v7424_v63  ;;  %v7495_v34 = vsel %vm6778_vm8, %v5107_v38, %v1311_v62  ;;  %v3737_v5 = vor.u32 %v3736_v14, %v3733_v53 }
  0xde   : > { %5864 = vmatprep.mubr.msk.bf16.mxu1 %vm658_vm4, %v8385_v35  ;;  %v5108_v35 = vrot.slane %v1181_v13, 9  ;;  %v1325_v18 = vrot.slane %v6937_v30, 5  ;;  %v5440_v13 = vld [vmem:[%s6531_s25 + $0x6c] sm:$0xf]  ;;  %v7501_v40 = vsel %vm6778_vm8, %v1313_v21, %v1314_v11  ;;  %v7503_v33 = vrot.slane %v3713_v24, 4 }
  0xdf   : > { %8387 = vst [vmem:[#allocation11_spill] sm:$0xff] %v7501_v40  ;;  %v7505_v10 = vrot.slane %v3723_v36, 4  ;;  %v7507_v51 = vrot.slane %v3726_v25, 5  ;;  %v3705_v63 = vsel %vm6557_vm5, %v3700_v42, %v3704_v8  ;;  %v3750_v62 = vshll.u32 %v7484_v7, 16  ;;  %v6391_v25 = vld [vmem:[%s6531_s25 + $0xcc] sm:$0xff]  }
  0xe0   : > { %v7514_v30 = vsel %vm6778_vm8, %v5108_v35, %v1318_v2  ;;  %v5109_v38 = vrot.slane %v1182_v56, 9  ;;  %v8389_v52 = vcombine.low %v7224_v6, %v7234_v12  ;;  %v7524_v11 = vsel %vm6778_vm8, %v1320_v15, %v1321_v44  ;;  %v7528_v2 = vld [vmem:[%s6531_s25 + $0x70] sm:$0xf]  ;;  %v7571_v44 = vld [vmem:[%s6531_s25 + $0x7c] sm:$0xf] }
  0xe1   : > { %8388 = vst [vmem:[#allocation12_spill] sm:$0xff] %v7514_v30  ;;  %8390 = vst [vmem:[#allocation13_spill] sm:$0xff] %v7524_v11  ;;  %v3747_v53 = vor.u32 %v3746_v54, %v7487_v47  ;;  %v3755_v14 = vshrl.u32 %v5440_v13, 16  ;;  %v8392_v21 = vcombine.low %v7228_v41, %v7238_v26  ;;  %v8393_v6 = vsel %vm6557_vm5, %v7407_v17, %v7365_v32  ;;  %v7558_v17 = vld [vmem:[%s6531_s25 + $0x74] sm:$0x1] }
  0xe2   : > { %8391 = vst [vmem:[#allocation14_spill] sm:$0xff] %v7528_v2  ;;  %v7539_v12 = vcombine.low %v8393_v6, %v3681_v61  ;;  %v1327_v24 = vrot.slane %v1325_v18, 4  ;;  %v1328_v36 = vrot.slane %v6943_v20, 5  ;;  %v7545_v42 = vcombine.low %v3695_v29, %v3705_v63  ;;  %8394 = vst [vmem:[#allocation15_spill] sm:$0xff] %v7558_v17  ;;  %v5443_v20 = vld [vmem:[%s6531_s25 + $0x78] sm:$0xf] }
  0xe3   : > { %v7563_v8 = vrot.slane %v3750_v62, 5  ;;  %v7567_v35 = vsel %vm6778_vm8, %v5109_v38, %v1325_v18  ;;  %v3764_v15 = vshll.u32 %v7528_v2, 16  ;;  %8395 = vst [vmem:[#allocation16_spill] sm:$0xff] %v7571_v44  ;;  %v5446_v54 = vld [vmem:[%s6531_s25 + $0x84] sm:$0xf]  ;;  %v7574_v56 = vrot.slane %v3747_v53, 4 }
  0xe4   : > { %6017 = vmatmul.mubr.msk.bf16.gmra.mrb[24].mxu0 %vm658_vm4, %v6389_v50  ;;  %v3758_v50 = vshll.u32 %v5440_v13, 16  ;;  %v7576_v29 = vrot.slane %v3755_v14, 4  ;;  %v3768_v13 = vshrl.u32 %v7528_v2, 16  ;;  %v7582_v63 = vld [vmem:[%s6531_s25 + $0x88] sm:$0xf]  ;;  %v7590_v62 = vsel %vm6778_vm8, %v1327_v24, %v1328_v36 }
  0xe5   : > { %5865 = vmatmul.mubr.msk.bf16.gmra.mrb[8].mxu1 %vm658_vm4, %v8389_v52  ;;  %6020 = vmatprep.mubr.msk.bf16.mxu0 %vm658_vm4, %v6390_v9  ;;  %v7541_v9 = vrot.slane %v3737_v5, 4  ;;  %8396 = vst [vmem:[#allocation17_spill] sm:$0xff] %v7582_v63  ;;  %v3779_v38 = vshrl.u32 %v5443_v20, 16  ;;  %v3782_v52 = vshll.u32 %v5443_v20, 16  ;;  %v5449_v53 = vld [vmem:[%s6531_s25 + $0x90] sm:$0xf]  ;;  %v8398_v18 = vcombine.low %v7263_v46, %v7267_v58 }
  0xe6   : > { %5868 = vmatprep.mubr.msk.bf16.mxu1 %vm658_vm4, %v8392_v21  ;;  %v7578_v5 = vrot.slane %v3758_v50, 5  ;;  %v7594_v14 = vld [vmem:[%s6531_s25 + $0x94] sm:$0xf]  ;;  %v3788_v50 = vshll.u32 %v7571_v44, 16  ;;  %v3792_v21 = vshrl.u32 %v7571_v44, 16  ;;  %v3803_v6 = vshrl.u32 %v5446_v54, 16 }
  0xe7   : > { %8397 = vst [vmem:[#allocation18_spill] sm:$0xff] %v7594_v14  ;;  %v3806_v61 = vshll.u32 %v5446_v54, 16  ;;  %v7599_v41 = vrot.slane %v3764_v15, 5  ;;  %v3774_v24 = vshll.u32 %v7558_v17, 16  ;;  %v3812_v36 = vshll.u32 %v7582_v63, 16 }
  0xe8   : > { %v3816_v20 = vshrl.u32 %v7582_v63, 16  ;;  %v3827_v54 = vshrl.u32 %v5449_v53, 16  ;;  %v3836_v15 = vshll.u32 %v7594_v14, 16  ;;  %v3840_v26 = vshrl.u32 %v7594_v14, 16  ;;  %v5452_v32 = vld [vmem:[%s6531_s25 + $0x9c] sm:$0xf] }
  0xe9   : > { %v8399_v44 = vcombine.low %v7271_v55, %v7276_v22  ;;  %v3770_v46 = vrot.slane %v3768_v13, 4  ;;  %v7624_v63 = vrot.slane %v3788_v50, 5  ;;  %v3794_v14 = vrot.slane %v3792_v21, 4  ;;  %v7627_v55 = vld [vmem:[%s6531_s25 + $0x8c] sm:$0x1] }
  0xea   : > { %v3805_v17 = vrot.slane %v3803_v6, 4  ;;  %v3808_v2 = vrot.slane %v3806_v61, 5  ;;  %v7629_v22 = vrot.slane %v3812_v36, 5  ;;  %v3851_v7 = vshrl.u32 %v5452_v32, 16  ;;  %v7632_v58 = vld [vmem:[%s6531_s25 + $0x98] sm:$0x1] }
  0xeb   : > { %v3854_v11 = vshll.u32 %v5452_v32, 16  ;;  %v3829_v13 = vrot.slane %v3827_v54, 4  ;;  %v3842_v50 = vrot.slane %v3840_v26, 4  ;;  %v3761_v21 = vor.u32 %v7578_v5, %v7576_v29 }
  0xec   : > { %6021 = vmatmul.mubr.msk.bf16.gmra.mrb[28].mxu0 %vm658_vm4, %v6391_v25  ;;  %v3830_v25 = vshll.u32 %v5449_v53, 16  ;;  %v7622_v53 = vld [vmem:[%s6531_s25 + $0x80] sm:$0x1]  ;;  %v3771_v61 = vor.u32 %v3770_v46, %v7599_v41  ;;  %v7639_v6 = vrot.slane %v3774_v24, 5  ;;  %v3795_v32 = vor.u32 %v3794_v14, %v7624_v63 }
  0xed   : > { %5869 = vmatmul.mubr.msk.bf16.gmra.mrb[12].mxu1 %vm658_vm4, %v8398_v18  ;;  %6026 = vmatprep.mubr.msk.bf16.mxu0 %vm658_vm4, %v7372_v27  ;;  %v3781_v27 = vrot.slane %v3779_v38, 4  ;;  %v3784_v18 = vrot.slane %v3782_v52, 5  ;;  %v7634_v52 = vrot.slane %v3836_v15, 5  ;;  %v3798_v36 = vshll.u32 %v7622_v53, 16 }
  0xee   : > { %5872 = vmatprep.mubr.msk.bf16.mxu1 %vm658_vm4, %v8399_v44  ;;  %v3818_v44 = vrot.slane %v3816_v20, 4  ;;  %v3832_v38 = vrot.slane %v3830_v25, 5  ;;  %v7643_v20 = vld [vmem:[%s6531_s25 + $0xa0] sm:$0xf]  ;;  %v3809_v40 = vor.u32 %v3808_v2, %v3805_v17  ;;  %v3822_v54 = vshll.u32 %v7627_v55, 16 }
  0xef   : > { %8400 = vst [vmem:[#allocation19_spill] sm:$0xff] %v7643_v20  ;;  %v3785_v30 = vor.u32 %v3784_v18, %v3781_v27  ;;  %v5455_v25 = vld [vmem:[%s6531_s25 + $0xa8] sm:$0xf]  ;;  %v3846_v29 = vshll.u32 %v7632_v58, 16  ;;  %v3853_v5 = vrot.slane %v3851_v7, 4  ;;  %v3856_v24 = vrot.slane %v3854_v11, 5 }
  0xf0   : > { %v3819_v26 = vor.u32 %v3818_v44, %v7629_v22  ;;  %v8401_v15 = vcombine.low %v7308_v43, %v7321_v39  ;;  %v3833_v2 = vor.u32 %v3832_v38, %v3829_v13  ;;  %v3843_v17 = vor.u32 %v3842_v50, %v7634_v52 }
  0xf1   : > { %v3860_v14 = vshll.u32 %v7643_v20, 16  ;;  %v8402_v46 = vcombine.low %v7349_v59, %v7356_v4  ;;  %v3762_v7 = vrot.slane %v3761_v21, 4  ;;  %v3772_v43 = vrot.slane %v3771_v61, 4  ;;  %v7672_v21 = vld [vmem:[%s6531_s25 + $0xac] sm:$0xf] }
  0xf2   : > { %v3878_v39 = vshll.u32 %v5455_v25, 16  ;;  %v3786_v11 = vrot.slane %v3785_v30, 4  ;;  %v3796_v27 = vrot.slane %v3795_v32, 4  ;;  %v3800_v18 = vrot.slane %v3798_v36, 5  ;;  %v7681_v61 = vld [vmem:[%s6531_s25 + $0xb0] sm:$0x1] }
  0xf3   : > { %v3810_v44 = vrot.slane %v3809_v40, 4  ;;  %v3820_v13 = vrot.slane %v3819_v26, 4  ;;  %v3824_v38 = vrot.slane %v3822_v54, 5  ;;  %v3848_v50 = vrot.slane %v3846_v29, 5 }
  0xf4   : > { %6027 = vmatmul.mubr.msk.bf16.vlgmr.msra.gmra.mrb[0].mxu0 %vm658_vm4, %v7376_v3  ;;  %v3864_v3 = vshrl.u32 %v7643_v20, 16  ;;  %v3857_v59 = vor.u32 %v3856_v24, %v3853_v5  ;;  %v3834_v4 = vrot.slane %v3833_v2, 4  ;;  %v7669_v20 = vrot.slane %v3860_v14, 5 }
  0xf5   : > { %5873 = vmatmul.mubr.msk.bf16.gmra.mrb[16].mxu1 %vm658_vm4, %v8401_v15  ;;  %6059 = vmatpush3.bf16.msra.mxu0 %v7150_v49  ;;  %v3875_v49 = vshrl.u32 %v5455_v25, 16  ;;  %v7667_v15 = vld [vmem:[%s6531_s25 + $0xa4] sm:$0x1]  ;;  %v3767_v30 = vsel %vm6557_vm5, %v3762_v7, %v7599_v41  ;;  %v3777_v40 = vsel %vm6557_vm5, %v3772_v43, %v7639_v6  ;;  %v3880_v32 = vrot.slane %v3878_v39, 5 }
  0xf6   : > { %5876 = vmatprep.mubr.msk.bf16.mxu1 %vm658_vm4, %v8402_v46  ;;  %6030 = vmatprep.mubr.msk.bf16.mxu0 %vm658_vm4, %v7427_v57  ;;  %v3844_v46 = vrot.slane %v3843_v17, 4  ;;  %v3866_v57 = vrot.slane %v3864_v3, 4  ;;  %v3791_v54 = vsel %vm6557_vm5, %v3786_v11, %v7624_v63  ;;  %v3801_v25 = vsel %vm6557_vm5, %v3796_v27, %v3800_v18  ;;  %v5458_v3 = vld [vmem:[%s6531_s25 + $0xb4] sm:$0xf] }
  0xf7   : > { %v3877_v36 = vrot.slane %v3875_v49, 4  ;;  %v3815_v26 = vsel %vm6557_vm5, %v3810_v44, %v7629_v22  ;;  %v3870_v41 = vshll.u32 %v7667_v15, 16  ;;  %v3825_v6 = vsel %vm6557_vm5, %v3820_v13, %v3824_v38  ;;  %v5505_v11 = vld [vmem:[%s6531_s25 + $0x54] sm:$0xe]  ;;  %v5506_v38 = vld [vmem:[%s6531_s25 + $0x60] sm:$0xe] }
  0xf8   : > { %v7696_v29 = vrot.slane %v3857_v59, 4  ;;  %v3884_v63 = vshll.u32 %v7672_v21, 16  ;;  %v3888_v5 = vshrl.u32 %v7672_v21, 16  ;;  %v8403_v24 = vcombine.low %v7385_v1, %v7405_v48 }
  0xf9   : > { %v3849_v22 = vsel %vm6557_vm5, %v3844_v46, %v3848_v50  ;;  %v3867_v2 = vor.u32 %v3866_v57, %v7669_v20  ;;  %v3894_v17 = vshll.u32 %v7681_v61, 16  ;;  %v8404_v1 = vcombine.low %v7437_v0, %v7456_v60 }
  0xfa   : > { %v8405_v48 = vsel %vm6557_vm5, %v7505_v10, %v7507_v51  ;;  %v8407_v14 = vsel %vm6557_vm5, %v7574_v56, %v7563_v8  ;;  %v8408_v0 = vsel %vm6557_vm5, %v7541_v9, %v7487_v47  ;;  %v5126_v51 = vcombine.low %v7567_v35, %v7590_v62  ;;  %v7750_v56 = vld [vmem:[%s6531_s25 + $0xb8] sm:$0xf] }
  0xfb   : > { %v5474_v60 = vcombine.low %v8408_v0, %v8407_v14  ;;  %v3881_v10 = vor.u32 %v3880_v32, %v3877_v36  ;;  %v7743_v7 = vcombine.low %v3791_v54, %v3801_v25  ;;  %v7745_v43 = vcombine.low %v3815_v26, %v3825_v6  ;;  %v5507_v32 = vld [vmem:[%s6531_s25 + $0x6c] sm:$0xe] }
  0xfc   : > { %6031 = vmatmul.mubr.msk.bf16.gmra.mrb[4].mxu0 %vm658_vm4, %v7539_v12  ;;  %v3839_v12 = vsel %vm6557_vm5, %v3834_v4, %v7634_v52  ;;  %v7747_v8 = vrot.slane %v3870_v41, 5  ;;  %v3863_v47 = vsel %vm6557_vm5, %v7696_v29, %v7669_v20  ;;  %v7758_v9 = vrot.slane %v3884_v63, 5  ;;  %v8411_v63 = vld [vmem:[#allocation9_spill] sm:$0xff]  ;;  %v5464_v29 = vld [vmem:[%s6531_s25 + $0xcc] sm:$0xf] }
  0xfd   : > { %5877 = vmatmul.mubr.msk.bf16.gmra.mrb[20].mxu1 %vm658_vm4, %v8403_v24  ;;  %6034 = vmatprep.mubr.msk.bf16.mxu0 %vm658_vm4, %v7545_v42  ;;  %v8406_v42 = vsel %vm6557_vm5, %v7503_v33, %v7447_v16  ;;  %v5504_v16 = vld [vmem:[%s6531_s25 + $0x48] sm:$0xe]  ;;  %v7741_v33 = vcombine.low %v3767_v30, %v3777_v40  ;;  %v7752_v49 = vcombine.low %v3839_v12, %v3849_v22  ;;  %v3890_v39 = vrot.slane %v3888_v5, 4  ;;  %v8412_v24 = vld [vmem:[#allocation12_spill] sm:$0xff]  ;;  %v8413_v12 = vld [vmem:[#allocation13_spill] sm:$0xff] }
  0xfe   : > { %5880 = vmatprep.mubr.msk.bf16.mxu1 %vm658_vm4, %v8404_v1  ;;  %v5473_v52 = vcombine.low %v8406_v42, %v8405_v48  ;;  %v7761_v27 = vrot.slane %v3867_v2, 4  ;;  %v7763_v18 = vrot.slane %v3894_v17, 5  ;;  %v3899_v44 = vshrl.u32 %v5458_v3, 16  ;;  %v8415_v2 = vld [vmem:[#allocation10_spill] sm:$0xff] }
  0xff   : > { %v5520_v13 = vrot.slane %v5504_v16, 9  ;;  %v7766_v50 = vrot.slane %v3881_v10, 4  ;;  %v3902_v59 = vshll.u32 %v5458_v3, 16  ;;  %v3908_v4 = vshll.u32 %v7750_v56, 16  ;;  %v8416_v48 = vld [vmem:[#allocation14_spill] sm:$0xff] }
 0x100   : > { %v4358_v46 = vrot.slane %v7370_v31, 5  ;;  %v4361_v57 = vrot.slane %v7440_v28, 5  ;;  %v5521_v30 = vrot.slane %v5505_v11, 9  ;;  %v4365_v40 = vrot.slane %v7394_v23, 5  ;;  %v8409_v31 = vld [vmem:[#allocation11_spill] sm:$0xff] }
 0x101   : > { %v4368_v36 = vrot.slane %v7461_v19, 5  ;;  %v3891_v54 = vor.u32 %v3890_v39, %v7758_v9  ;;  %v5522_v41 = vrot.slane %v5506_v38, 9  ;;  %v8410_v28 = vcombine.low %v7495_v34, %v8409_v31  ;;  %v7813_v3 = vld [vmem:[%s6531_s25 + $0xbc] sm:$0x1] }
 0x102   : > { %v7778_v25 = vsel %vm6778_vm8, %v5520_v13, %v4358_v46  ;;  %v4360_v26 = vrot.slane %v4358_v46, 4  ;;  %v3912_v23 = vshrl.u32 %v7750_v56, 16  ;;  %v7788_v19 = vsel %vm6778_vm8, %v5521_v30, %v4365_v40  ;;  %v8417_v13 = vld [vmem:[#allocation15_spill] sm:$0xff] }
 0x103   : > { %v4367_v6 = vrot.slane %v4365_v40, 4  ;;  %v4372_v5 = vrot.slane %v8411_v63, 5  ;;  %v8414_v22 = vcombine.low %v8412_v24, %v8413_v12  ;;  %v4375_v17 = vrot.slane %v8415_v2, 5  ;;  %v7831_v40 = vld [vmem:[%s6531_s25 + $0xc4] sm:$0xf]  ;;  %v8418_v12 = vld [vmem:[#allocation16_spill] sm:$0xff] }
 0x104   : > { %6035 = vmatmul.mubr.msk.bf16.gmra.mrb[8].mxu0 %vm658_vm4, %v5473_v52  ;;  %v7797_v34 = vsel %vm6778_vm8, %v4360_v26, %v4361_v57  ;;  %v5523_v1 = vrot.slane %v5507_v32, 9  ;;  %v4379_v42 = vrot.slane %v8416_v48, 5  ;;  %v5461_v52 = vld [vmem:[%s6531_s25 + $0xc0] sm:$0xf]  ;;  %v4382_v38 = vrot.slane %v8417_v13, 5  ;;  %v6392_v26 = vld [vmem:[%s6531_s25 + $0xc] sm:$0xff]  }
 0x105   : > { %5881 = vmatmul.mubr.msk.bf16.gmra.mrb[24].mxu1 %vm658_vm4, %v8410_v28  ;;  %6038 = vmatprep.mubr.msk.bf16.mxu0 %vm658_vm4, %v5474_v60  ;;  %v5537_v14 = vcombine.low %v7778_v25, %v7797_v34  ;;  %v7806_v0 = vsel %vm6778_vm8, %v4367_v6, %v4368_v36  ;;  %v7810_v60 = vsel %vm6778_vm8, %v5522_v41, %v4372_v5  ;;  %v4374_v10 = vrot.slane %v4372_v5, 4  ;;  %v5508_v32 = vld [vmem:[%s6531_s25 + $0x78] sm:$0xe]  ;;  %v5509_v2 = vld [vmem:[%s6531_s25 + $0x84] sm:$0xe] }
 0x106   : > { %5884 = vmatprep.mubr.msk.bf16.mxu1 %vm658_vm4, %v8414_v22  ;;  %v5538_v16 = vcombine.low %v7788_v19, %v7806_v0  ;;  %v7819_v39 = vsel %vm6778_vm8, %v5523_v1, %v4379_v42  ;;  %v4381_v11 = vrot.slane %v4379_v42, 4  ;;  %v3873_v46 = vsel %vm6557_vm5, %v7761_v27, %v7747_v8  ;;  %v5235_v27 = vld [vmem:[%s6531_s25 + $0x78] sm:$0xf]  ;;  %v6453_v0 = vld [vmem:[%s6531_s25 + $0xa0] sm:$0xf] }
 0x107   : > { %v7826_v57 = vrot.slane %v3899_v44, 4  ;;  %v7828_v30 = vrot.slane %v3902_v59, 5  ;;  %v7835_v36 = vsel %vm6778_vm8, %v4374_v10, %v4375_v17  ;;  %v7839_v41 = vrot.slane %v3908_v4, 5  ;;  %v8420_v48 = vld [vmem:[#allocation5_spill] sm:$0xff] }
 0x108   : > { %v3923_v31 = vshrl.u32 %v5461_v52, 16  ;;  %v5539_v28 = vcombine.low %v7810_v60, %v7835_v36  ;;  %v7845_v8 = vsel %vm6778_vm8, %v4381_v11, %v4382_v38  ;;  %v7848_v44 = vrot.slane %v3891_v54, 4  ;;  %v8421_v38 = vld [vmem:[#allocation17_spill] sm:$0xff] }
 0x109   : > { %v3918_v59 = vshll.u32 %v7813_v3, 16  ;;  %v3926_v6 = vshll.u32 %v5461_v52, 16  ;;  %v5540_v63 = vcombine.low %v7819_v39, %v7845_v8  ;;  %v7855_v4 = vrot.slane %v3912_v23, 4  ;;  %v6456_v8 = vld [vmem:[%s6531_s25 + $0xac] sm:$0xf] }
 0x10a   : > { %v3932_v5 = vshll.u32 %v7831_v40, 16  ;;  %v5524_v24 = vrot.slane %v5508_v32, 9  ;;  %v4386_v22 = vrot.slane %v8418_v12, 5  ;;  %v3936_v54 = vshrl.u32 %v7831_v40, 16 }
 0x10b   : > { %v2248_v23 = vshrl.u32 %v5235_v27, 16  ;;  %v2251_v17 = vshll.u32 %v5235_v27, 16  ;;  %v3925_v1 = vrot.slane %v3923_v31, 4  ;;  %v5525_v10 = vrot.slane %v5509_v2, 9  ;;  %v6393_v31 = vld [vmem:[%s6531_s25 + $0x18] sm:$0xff]  }
 0x10c   : > { %6039 = vmatmul.mubr.msk.bf16.gmra.mrb[12].mxu0 %vm658_vm4, %v7741_v33  ;;  %v4389_v33 = vrot.slane %v7622_v53, 5  ;;  %v7871_v35 = vsel %vm6778_vm8, %v5524_v24, %v4386_v22  ;;  %v4388_v62 = vrot.slane %v4386_v22, 4  ;;  %v3928_v53 = vrot.slane %v3926_v6, 5  ;;  %v6394_v24 = vld [vmem:[%s6531_s25 + $0x24] sm:$0xff]  }
 0x10d   : > { %5885 = vmatmul.mubr.msk.bf16.gmra.mrb[28].mxu1 %vm658_vm4, %v5126_v51  ;;  %6042 = vmatprep.mubr.msk.bf16.mxu0 %vm658_vm4, %v7743_v7  ;;  %v8419_v51 = vld [vmem:[#allocation4_spill] sm:$0xff]  ;;  %v2250_v42 = vrot.slane %v2248_v23, 4  ;;  %v2253_v52 = vrot.slane %v2251_v17, 5  ;;  %v5479_v11 = vcombine.low %v3863_v47, %v3873_v46  ;;  %v4393_v32 = vrot.slane %v8421_v38, 5  ;;  %v8424_v38 = vld [vmem:[#allocation18_spill] sm:$0xff] }
 0x10e   : > { %5890 = vmatprep.mubr.msk.bf16.mxu1 %vm658_vm4, %v6392_v26  ;;  %v2270_v7 = vsel %vm6557_vm5, %v8420_v48, %v8419_v51  ;;  %v7884_v13 = vsel %vm6778_vm8, %v4388_v62, %v4389_v33  ;;  %v4396_v26 = vrot.slane %v7627_v55, 5  ;;  %v3887_v27 = vsel %vm6557_vm5, %v7766_v50, %v7758_v9  ;;  %v7897_v47 = vld [vmem:[%s6531_s25 + $0xd0] sm:$0xf]  ;;  %v8423_v51 = vld [vmem:[#allocation2_spill] sm:$0xff] }
 0x10f   : > { %v3905_v20 = vor.u32 %v7828_v30, %v7826_v57  ;;  %v5541_v46 = vcombine.low %v7871_v35, %v7884_v13  ;;  %v2254_v6 = vor.u32 %v2253_v52, %v2250_v42  ;;  %v7902_v12 = vrot.slane %v3932_v5, 5  ;;  %v5510_v9 = vld [vmem:[%s6531_s25 + $0x90] sm:$0xe]  ;;  %v7916_v30 = vld [vmem:[%s6531_s25 + $0xc8] sm:$0x1] }
 0x110   : > { %v3938_v55 = vrot.slane %v3936_v54, 4  ;;  %v7906_v22 = vsel %vm6778_vm8, %v5525_v10, %v4393_v32  ;;  %v4395_v2 = vrot.slane %v4393_v32, 4  ;;  %v3897_v50 = vsel %vm6557_vm5, %v7848_v44, %v7763_v18  ;;  %v8422_v44 = vld [vmem:[#allocation3_spill] sm:$0xff] }
 0x111   : > { %v3915_v57 = vor.u32 %v7855_v4, %v7839_v41  ;;  %v3929_v33 = vor.u32 %v3928_v53, %v3925_v1  ;;  %v2255_v5 = vrot.slane %v2254_v6, 4  ;;  %v3947_v54 = vshrl.u32 %v5464_v29, 16 }
 0x112   : > { %v3950_v23 = vshll.u32 %v5464_v29, 16  ;;  %v3956_v17 = vshll.u32 %v7897_v47, 16  ;;  %v7923_v62 = vsel %vm6778_vm8, %v4395_v2, %v4396_v26  ;;  %v3960_v18 = vshrl.u32 %v7897_v47, 16 }
 0x113   : > { %v2260_v4 = vsel %vm6557_vm5, %v2255_v5, %v8422_v44  ;;  %v5526_v1 = vrot.slane %v5510_v9, 9  ;;  %v3920_v48 = vrot.slane %v3918_v59, 5  ;;  %v3942_v53 = vshll.u32 %v7916_v30, 16  ;;  %v5511_v9 = vld [vmem:[%s6531_s25 + $0x9c] sm:$0xe]  ;;  %v8425_v44 = vld [vmem:[#allocation19_spill] sm:$0xff] }
 0x114   : > { %6043 = vmatmul.mubr.msk.bf16.gmra.mrb[16].mxu0 %vm658_vm4, %v7745_v43  ;;  %v5542_v43 = vcombine.low %v7906_v22, %v7923_v62  ;;  %v7938_v42 = vcombine.low %v2260_v4, %v2270_v7  ;;  %v5480_v52 = vcombine.low %v3887_v27, %v3897_v50  ;;  %v3906_v10 = vrot.slane %v3905_v20, 4  ;;  %v7945_v59 = vld [vmem:[%s6531_s25 + $0xd4] sm:$0x1]  ;;  %v6396_v20 = vld [vmem:[%s6531_s25 + $0x3c] sm:$0xff]  }
 0x115   : > { %5891 = vmatmul.mubr.msk.bf16.vlgmr.msra.gmra.mrb[0].mxu1 %vm658_vm4, %v6393_v31  ;;  %6046 = vmatprep.mubr.msk.bf16.mxu0 %vm658_vm4, %v7752_v49  ;;  %v3939_v49 = vor.u32 %v3938_v55, %v7902_v12  ;;  %v4400_v32 = vrot.slane %v8424_v38, 5  ;;  %v4403_v26 = vrot.slane %v7632_v58, 5  ;;  %v3916_v31 = vrot.slane %v3915_v57, 4  ;;  %v5512_v38 = vld [vmem:[%s6531_s25 + $0xa8] sm:$0xe] }
 0x116   : > { %6093 = vmatpush3.bf16.msra.mxu1 %v8423_v51  ;;  %5894 = vmatprep.mubr.msk.bf16.mxu1 %vm658_vm4, %v6394_v24  ;;  %v3930_v29 = vrot.slane %v3929_v33, 4  ;;  %v3949_v6 = vrot.slane %v3947_v54, 4  ;;  %v3952_v2 = vrot.slane %v3950_v23, 5  ;;  %v6395_v24 = vld [vmem:[%s6531_s25 + $0x30] sm:$0xff]   ;;  %v7947_v55 = vrot.slane %v3956_v17, 5 }
 0x117   : > { %v3962_v5 = vrot.slane %v3960_v18, 4  ;;  %v7951_v7 = vsel %vm6778_vm8, %v5526_v1, %v4400_v32  ;;  %v4402_v27 = vrot.slane %v4400_v32, 4  ;;  %v3940_v50 = vrot.slane %v3939_v49, 4  ;;  %v5500_v51 = vld [vmem:[%s6531_s25 + $0x18] sm:$0xe] }
 0x118   : > { %v3944_v58 = vrot.slane %v3942_v53, 5  ;;  %v3911_v57 = vsel %vm6557_vm5, %v3906_v10, %v7839_v41  ;;  %v5527_v54 = vrot.slane %v5511_v9, 9  ;;  %v3921_v23 = vsel %vm6557_vm5, %v3916_v31, %v3920_v48  ;;  %v6443_v53 = vld [vmem:[%s6531_s25 + $0x1c] sm:$0xf] }
 0x119   : > { %v7959_v33 = vsel %vm6778_vm8, %v4402_v27, %v4403_v26  ;;  %v3966_v17 = vshll.u32 %v7945_v59, 16  ;;  %v4407_v4 = vrot.slane %v8425_v44, 5  ;;  %v3935_v41 = vsel %vm6557_vm5, %v3930_v29, %v7902_v12  ;;  %v6397_v29 = vld [vmem:[%s6531_s25 + $0x48] sm:$0xff]  }
 0x11a   : > { %v5543_v18 = vcombine.low %v7951_v7, %v7959_v33  ;;  %v3963_v1 = vor.u32 %v3962_v5, %v7947_v55  ;;  %v4410_v48 = vrot.slane %v7667_v15, 5  ;;  %v3945_v49 = vsel %vm6557_vm5, %v3940_v50, %v3944_v58  ;;  %v6398_v5 = vld [vmem:[%s6531_s25 + $0x54] sm:$0xff]  }
 0x11b   : > { %v7982_v10 = vsel %vm6778_vm8, %v5527_v54, %v4407_v4  ;;  %v4409_v12 = vrot.slane %v4407_v4, 4  ;;  %v5481_v32 = vcombine.low %v3911_v57, %v3921_v23  ;;  %v3968_v26 = vrot.slane %v3966_v17, 5  ;;  %v5501_v23 = vld [vmem:[%s6531_s25 + $0x24] sm:$0xe]  ;;  %v6445_v4 = vld [vmem:[%s6531_s25 + $0x28] sm:$0xf] }
 0x11c   : > { %6047 = vmatmul.mubr.msk.bf16.gmra.mrb[20].mxu0 %vm658_vm4, %v5479_v11  ;;  %v3953_v11 = vor.u32 %v3952_v2, %v3949_v6  ;;  %v5516_v31 = vrot.slane %v5500_v51, 9  ;;  %v5482_v6 = vcombine.low %v3935_v41, %v3945_v49  ;;  %v3964_v9 = vrot.slane %v3963_v1, 4  ;;  %v6446_v49 = vld [vmem:[%s6531_s25 + $0x34] sm:$0xf] }
 0x11d   : > { %5895 = vmatmul.mubr.msk.bf16.gmra.mrb[4].mxu1 %vm658_vm4, %v6395_v24  ;;  %6050 = vmatprep.mubr.msk.bf16.mxu0 %vm658_vm4, %v5480_v52  ;;  %v4330_v52 = vrot.slane %v6443_v53, 5  ;;  %v7987_v15 = vsel %vm6778_vm8, %v4409_v12, %v4410_v48  ;;  %v5528_v58 = vrot.slane %v5512_v38, 9  ;;  %v4414_v57 = vrot.slane %v7672_v21, 5  ;;  %v5502_v48 = vld [vmem:[%s6531_s25 + $0x30] sm:$0xe] }
 0x11e   : > { %5898 = vmatprep.mubr.msk.bf16.mxu1 %vm658_vm4, %v6396_v20  ;;  %v3954_v2 = vrot.slane %v3953_v11, 4  ;;  %v5544_v24 = vcombine.low %v7982_v10, %v7987_v15  ;;  %v6444_v20 = vld [vmem:[%s6531_s25 + $0x20] sm:$0x1]  ;;  %v4417_v54 = vrot.slane %v7681_v61, 5  ;;  %v3969_v61 = vsel %vm6557_vm5, %v3964_v9, %v3968_v26  ;;  %v5513_v11 = vld [vmem:[%s6531_s25 + $0xb4] sm:$0xe] }
 0x11f   : > { %v4332_v27 = vrot.slane %v4330_v52, 4  ;;  %v4333_v50 = vrot.slane %v6444_v20, 5  ;;  %v8000_v17 = vsel %vm6778_vm8, %v5528_v58, %v4414_v57  ;;  %v4416_v44 = vrot.slane %v4414_v57, 4  ;;  %v6447_v26 = vld [vmem:[%s6531_s25 + $0x2c] sm:$0x1]  ;;  %v8426_v58 = vld [vmem:[#allocation6_spill] sm:$0xff] }
 0x120   : > { %v3959_v21 = vsel %vm6557_vm5, %v3954_v2, %v7947_v55  ;;  %v4337_v41 = vrot.slane %v6445_v4, 5  ;;  %v4331_v1 = vsel %vm6778_vm8, %v5516_v31, %v4330_v52  ;;  %v4344_v53 = vrot.slane %v6446_v49, 5  ;;  %v6400_v20 = vld [vmem:[%s6531_s25 + $0x6c] sm:$0xff]   ;;  %v6461_v10 = vld [vmem:[%s6531_s25 + $0xc8] sm:$0x1] }
 0x121   : > { %v4334_v51 = vsel %vm6778_vm8, %v4332_v27, %v4333_v50  ;;  %v8020_v55 = vsel %vm6778_vm8, %v4416_v44, %v4417_v54  ;;  %v5517_v12 = vrot.slane %v5501_v23, 9  ;;  %v5529_v52 = vrot.slane %v5513_v11, 9  ;;  %v5514_v44 = vld [vmem:[%s6531_s25 + $0xc0] sm:$0xe]  ;;  %v5503_v11 = vld [vmem:[%s6531_s25 + $0x3c] sm:$0xe] }
 0x122   : > { %v5545_v38 = vcombine.low %v8000_v17, %v8020_v55  ;;  %v4421_v31 = vrot.slane %v7750_v56, 5  ;;  %v5533_v2 = vcombine.low %v4331_v1, %v4334_v51  ;;  %v4339_v9 = vrot.slane %v4337_v41, 4  ;;  %v8427_v56 = vld [vmem:[#allocation7_spill] sm:$0xff] }
 0x123   : > { %v4424_v27 = vrot.slane %v7813_v3, 5  ;;  %v4346_v50 = vrot.slane %v4344_v53, 4  ;;  %v4347_v57 = vrot.slane %v8426_v58, 5  ;;  %v4338_v3 = vsel %vm6778_vm8, %v5517_v12, %v4337_v41 }
 0x124   : > { %6051 = vmatmul.mubr.msk.bf16.gmra.mrb[24].mxu0 %vm658_vm4, %v5481_v32  ;;  %v5483_v32 = vcombine.low %v3959_v21, %v3969_v61  ;;  %v8032_v54 = vsel %vm6778_vm8, %v5529_v52, %v4421_v31  ;;  %v4423_v23 = vrot.slane %v4421_v31, 4  ;;  %v4351_v21 = vrot.slane %v8427_v56, 5  ;;  %v8428_v31 = vld [vmem:[#allocation8_spill] sm:$0xff] }
 0x125   : > { %5899 = vmatmul.mubr.msk.bf16.gmra.mrb[8].mxu1 %vm658_vm4, %v6397_v29  ;;  %6054 = vmatprep.mubr.msk.bf16.mxu0 %vm658_vm4, %v5482_v6  ;;  %v4340_v29 = vrot.slane %v6447_v26, 5  ;;  %v6399_v6 = vld [vmem:[%s6531_s25 + $0x60] sm:$0xff]   ;;  %v5530_v49 = vrot.slane %v5514_v44, 9  ;;  %v4428_v41 = vrot.slane %v7831_v40, 5  ;;  %v4431_v12 = vrot.slane %v7916_v30, 5 }
 0x126   : > { %5902 = vmatprep.mubr.msk.bf16.mxu1 %vm658_vm4, %v6398_v5  ;;  %v5518_v5 = vrot.slane %v5502_v48, 9  ;;  %v8039_v61 = vsel %vm6778_vm8, %v4423_v23, %v4424_v27  ;;  %v4348_v48 = vsel %vm6778_vm8, %v4346_v50, %v4347_v57  ;;  %v4353_v52 = vrot.slane %v4351_v21, 4  ;;  %v6448_v56 = vld [vmem:[%s6531_s25 + $0x70] sm:$0xf] }
 0x127   : > { %v4341_v4 = vsel %vm6778_vm8, %v4339_v9, %v4340_v29  ;;  %v5546_v1 = vcombine.low %v8032_v54, %v8039_v61  ;;  %v5519_v29 = vrot.slane %v5503_v11, 9  ;;  %v6401_v9 = vld [vmem:[%s6531_s25 + $0x78] sm:$0xff]   ;;  %v4435_v11 = vrot.slane %v7897_v47, 5 }
 0x128   : > { %v4345_v51 = vsel %vm6778_vm8, %v5518_v5, %v4344_v53  ;;  %v5534_v26 = vcombine.low %v4338_v3, %v4341_v4  ;;  %v8063_v53 = vsel %vm6778_vm8, %v5530_v49, %v4428_v41  ;;  %v4430_v5 = vrot.slane %v4428_v41, 4 }
 0x129   : > { %v5535_v27 = vcombine.low %v4345_v51, %v4348_v48  ;;  %v4352_v57 = vsel %vm6778_vm8, %v5519_v29, %v4351_v21  ;;  %v2233_v3 = vshll.u32 %v6448_v56, 16  ;;  %v2237_v4 = vshrl.u32 %v6448_v56, 16 }
 0x12a   : > { %v8068_v40 = vsel %vm6778_vm8, %v4430_v5, %v4431_v12  ;;  %v4438_v21 = vrot.slane %v7945_v59, 5  ;;  %v6403_v12 = vld [vmem:[%s6531_s25 + $0x90] sm:$0xff]   ;;  %v6404_v59 = vld [vmem:[%s6531_s25 + $0x9c] sm:$0xff]   ;;  %v2411_v15 = vshll.u32 %v6461_v10, 16 }
 0x12b   : > { %v5547_v44 = vcombine.low %v8063_v53, %v8068_v40  ;;  %v2239_v29 = vrot.slane %v2237_v4, 4  ;;  %v6406_v4 = vld [vmem:[%s6531_s25 + $0xb4] sm:$0xff]  }
 0x12c   : > { %6055 = vmatmul.mubr.msk.bf16.gmra.mrb[28].mxu0 %vm658_vm4, %v5483_v32  ;;  %v5232_v32 = vld [vmem:[%s6531_s25 + $0x6c] sm:$0xf] }
 0x12d   : > { %5903 = vmatmul.mubr.msk.bf16.gmra.mrb[12].mxu1 %vm658_vm4, %v6399_v6  ;;  %6060 = vmatprep.mubr.msk.bf16.mxu0 %vm658_vm4, %v5533_v2  ;;  %v4354_v6 = vrot.slane %v8428_v31, 5  ;;  %v5515_v2 = vld [vmem:[%s6531_s25 + $0xcc] sm:$0xe]  ;;  %v2224_v50 = vshrl.u32 %v5232_v32, 16  ;;  %v2227_v58 = vshll.u32 %v5232_v32, 16  ;;  %v4437_v32 = vrot.slane %v4435_v11, 4 }
 0x12e   : > { %5906 = vmatprep.mubr.msk.bf16.mxu1 %vm658_vm4, %v6400_v20  ;;  %v6402_v20 = vld [vmem:[%s6531_s25 + $0x84] sm:$0xff]   ;;  %v5531_v30 = vrot.slane %v5515_v2, 9  ;;  %v6449_v2 = vld [vmem:[%s6531_s25 + $0x74] sm:$0x1] }
 0x12f   : > { %v4355_v23 = vsel %vm6778_vm8, %v4353_v52, %v4354_v6  ;;  %v2226_v51 = vrot.slane %v2224_v50, 4  ;;  %v2229_v48 = vrot.slane %v2227_v58, 5  ;;  %v8090_v47 = vsel %vm6778_vm8, %v4437_v32, %v4438_v21  ;;  %v5238_v52 = vld [vmem:[%s6531_s25 + $0x84] sm:$0xf] }
 0x130   : > { %v8085_v49 = vsel %vm6778_vm8, %v5531_v30, %v4435_v11  ;;  %v5536_v41 = vcombine.low %v4352_v57, %v4355_v23  ;;  %v2275_v5 = vshll.u32 %v5238_v52, 16  ;;  %v5241_v57 = vld [vmem:[%s6531_s25 + $0x90] sm:$0xf]  ;;  %v6405_v23 = vld [vmem:[%s6531_s25 + $0xa8] sm:$0xff]  }
 0x131   : > { %v5548_v31 = vcombine.low %v8085_v49, %v8090_v47  ;;  %v2230_v6 = vor.u32 %v2229_v48, %v2226_v51  ;;  %v2296_v51 = vshrl.u32 %v5241_v57, 16  ;;  %v2299_v48 = vshll.u32 %v5241_v57, 16 }
 0x133   : > { %v2231_v30 = vrot.slane %v2230_v6, 4  ;;  %v6452_v6 = vld [vmem:[%s6531_s25 + $0x8c] sm:$0x1]  ;;  %v2301_v60 = vrot.slane %v2299_v48, 5  ;;  %v6455_v48 = vld [vmem:[%s6531_s25 + $0xa4] sm:$0x1] }
 0x134   : > { %6061 = vmatmul.mubr.msk.bf16.vlgmr.msra.gmra.mrb[0].mxu0 %vm658_vm4, %v5534_v26  ;;  %v2235_v26 = vrot.slane %v2233_v3, 5  ;;  %v5244_v3 = vld [vmem:[%s6531_s25 + $0x9c] sm:$0xf]  ;;  %v2291_v19 = vshll.u32 %v6452_v6, 16 }
 0x135   : > { %5907 = vmatmul.mubr.msk.bf16.gmra.mrb[16].mxu1 %vm658_vm4, %v6401_v9  ;;  %6064 = vmatprep.mubr.msk.bf16.mxu0 %vm658_vm4, %v5535_v27  ;;  %v2243_v9 = vshll.u32 %v6449_v2, 16  ;;  %v2272_v27 = vshrl.u32 %v5238_v52, 16  ;;  %v2323_v52 = vshll.u32 %v5244_v3, 16 }
 0x136   : > { %5910 = vmatprep.mubr.msk.bf16.mxu1 %vm658_vm4, %v6402_v20  ;;  %v2240_v45 = vor.u32 %v2239_v29, %v2235_v26  ;;  %v6450_v20 = vld [vmem:[%s6531_s25 + $0x88] sm:$0xf]  ;;  %v2236_v32 = vsel %vm6557_vm5, %v2231_v30, %v2235_v26  ;;  %v2293_v30 = vrot.slane %v2291_v19, 5 }
 0x137   : > { %v2281_v50 = vshll.u32 %v6450_v20, 16  ;;  %v2285_v58 = vshrl.u32 %v6450_v20, 16  ;;  %v2245_v25 = vrot.slane %v2243_v9, 5  ;;  %v2274_v34 = vrot.slane %v2272_v27, 4 }
 0x138   : > { %v2241_v56 = vrot.slane %v2240_v45, 4  ;;  %v2333_v45 = vshrl.u32 %v6453_v0, 16  ;;  %v2298_v27 = vrot.slane %v2296_v51, 4  ;;  %v2325_v20 = vrot.slane %v2323_v52, 5 }
 0x139   : > { %v8109_v11 = vrot.slane %v2281_v50, 5  ;;  %v2287_v21 = vrot.slane %v2285_v58, 4  ;;  %v6407_v50 = vld [vmem:[%s6531_s25 + $0xc0] sm:$0xff]  }
 0x13a   : > { %v2246_v26 = vsel %vm6557_vm5, %v2241_v56, %v2245_v25  ;;  %v5247_v56 = vld [vmem:[%s6531_s25 + $0xa8] sm:$0xf] }
 0x13b   : > { %v2288_v9 = vor.u32 %v2287_v21, %v8109_v11  ;;  %v5265_v58 = vcombine.low %v2236_v32, %v2246_v26  ;;  %v2339_v32 = vshll.u32 %v6455_v48, 16  ;;  %v2347_v39 = vshll.u32 %v5247_v56, 16 }
 0x13c   : > { %6065 = vmatmul.mubr.msk.bf16.gmra.mrb[4].mxu0 %vm658_vm4, %v5536_v41  ;;  %v6451_v41 = vld [vmem:[%s6531_s25 + $0x94] sm:$0xf] }
 0x13d   : > { %5911 = vmatmul.mubr.msk.bf16.gmra.mrb[20].mxu1 %vm658_vm4, %v6403_v12  ;;  %6068 = vmatprep.mubr.msk.bf16.mxu0 %vm658_vm4, %v5537_v14  ;;  %v2277_v14 = vrot.slane %v2275_v5, 5  ;;  %v2305_v12 = vshll.u32 %v6451_v41, 16  ;;  %v2309_v29 = vshrl.u32 %v6451_v41, 16  ;;  %v2344_v41 = vshrl.u32 %v5247_v56, 16  ;;  %v5253_v56 = vld [vmem:[%s6531_s25 + $0xc0] sm:$0xf] }
 0x13e   : > { %5914 = vmatprep.mubr.msk.bf16.mxu1 %vm658_vm4, %v6404_v59  ;;  %v2320_v59 = vshrl.u32 %v5244_v3, 16  ;;  %v6454_v3 = vld [vmem:[%s6531_s25 + $0x98] sm:$0x1] }
 0x13f   : > { %v2278_v2 = vor.u32 %v2277_v14, %v2274_v34  ;;  %v8129_v36 = vrot.slane %v2305_v12, 5  ;;  %v2289_v34 = vrot.slane %v2288_v9, 4  ;;  %v2302_v14 = vor.u32 %v2301_v60, %v2298_v27  ;;  %v5250_v12 = vld [vmem:[%s6531_s25 + $0xb4] sm:$0xf] }
 0x140   : > { %v2322_v5 = vrot.slane %v2320_v59, 4  ;;  %v2357_v59 = vshrl.u32 %v6456_v8, 16  ;;  %v2368_v35 = vshrl.u32 %v5250_v12, 16  ;;  %v2371_v13 = vshll.u32 %v5250_v12, 16 }
 0x141   : > { %v2279_v25 = vrot.slane %v2278_v2, 4  ;;  %v2294_v26 = vsel %vm6557_vm5, %v2289_v34, %v2293_v30  ;;  %v2303_v6 = vrot.slane %v2302_v14, 4  ;;  %v2341_v9 = vrot.slane %v2339_v32, 5 }
 0x142   : > { %v2326_v51 = vor.u32 %v2325_v20, %v2322_v5  ;;  %v2346_v27 = vrot.slane %v2344_v41, 4  ;;  %v2359_v20 = vrot.slane %v2357_v59, 4  ;;  %v6460_v41 = vld [vmem:[%s6531_s25 + $0xbc] sm:$0x1] }
 0x143   : > { %v2284_v52 = vsel %vm6557_vm5, %v2279_v25, %v8109_v11  ;;  %v2308_v25 = vsel %vm6557_vm5, %v2303_v6, %v8129_v36  ;;  %v2387_v7 = vshll.u32 %v6460_v41, 16 }
 0x144   : > { %6069 = vmatmul.mubr.msk.bf16.gmra.mrb[8].mxu0 %vm658_vm4, %v5538_v16  ;;  %v2329_v16 = vshll.u32 %v6453_v0, 16  ;;  %v2327_v2 = vrot.slane %v2326_v51, 4  ;;  %v5267_v11 = vcombine.low %v2284_v52, %v2294_v26 }
 0x145   : > { %5915 = vmatmul.mubr.msk.bf16.gmra.mrb[24].mxu1 %vm658_vm4, %v6405_v23  ;;  %6072 = vmatprep.mubr.msk.bf16.mxu0 %vm658_vm4, %v5539_v28  ;;  %v2311_v28 = vrot.slane %v2309_v29, 4  ;;  %v2335_v23 = vrot.slane %v2333_v45, 4 }
 0x146   : > { %5918 = vmatprep.mubr.msk.bf16.mxu1 %vm658_vm4, %v6406_v4  ;;  %v8132_v57 = vrot.slane %v2329_v16, 5  ;;  %v2315_v4 = vshll.u32 %v6454_v3, 16 }
 0x147   : > { %v2312_v21 = vor.u32 %v2311_v28, %v8129_v36  ;;  %v2349_v28 = vrot.slane %v2347_v39, 5  ;;  %v6458_v36 = vld [vmem:[%s6531_s25 + $0xb0] sm:$0x1] }
 0x148   : > { %v2336_v29 = vor.u32 %v2335_v23, %v8132_v57  ;;  %v2317_v19 = vrot.slane %v2315_v4, 5  ;;  %v2332_v14 = vsel %vm6557_vm5, %v2327_v2, %v8132_v57  ;;  %v2363_v3 = vshll.u32 %v6458_v36, 16 }
 0x149   : > { %v2313_v45 = vrot.slane %v2312_v21, 4  ;;  %v2350_v62 = vor.u32 %v2349_v28, %v2346_v27  ;;  %v2392_v4 = vshrl.u32 %v5253_v56, 16  ;;  %v2395_v57 = vshll.u32 %v5253_v56, 16  ;;  %v6459_v21 = vld [vmem:[%s6531_s25 + $0xc4] sm:$0xf] }
 0x14a   : > { %v2337_v60 = vrot.slane %v2336_v29, 4  ;;  %v2401_v51 = vshll.u32 %v6459_v21, 16  ;;  %v2405_v48 = vshrl.u32 %v6459_v21, 16  ;;  %v2365_v39 = vrot.slane %v2363_v3, 5 }
 0x14b   : > { %v2318_v34 = vsel %vm6557_vm5, %v2313_v45, %v2317_v19  ;;  %v2351_v12 = vrot.slane %v2350_v62, 4  ;;  %v2389_v19 = vrot.slane %v2387_v7, 5  ;;  %v2413_v2 = vrot.slane %v2411_v15, 5 }
 0x14c   : > { %6073 = vmatmul.mubr.msk.bf16.gmra.mrb[12].mxu0 %vm658_vm4, %v5540_v63  ;;  %v2353_v63 = vshll.u32 %v6456_v8, 16  ;;  %v2342_v22 = vsel %vm6557_vm5, %v2337_v60, %v2341_v9  ;;  %v5268_v33 = vcombine.low %v2308_v25, %v2318_v34  ;;  %v2394_v8 = vrot.slane %v2392_v4, 4 }
 0x14d   : > { %5919 = vmatmul.mubr.msk.bf16.gmra.mrb[28].mxu1 %vm658_vm4, %v6407_v50  ;;  %6076 = vmatprep.mubr.msk.bf16.mxu0 %vm658_vm4, %v5541_v46  ;;  %v6457_v46 = vld [vmem:[%s6531_s25 + $0xb8] sm:$0xf]  ;;  %v2370_v50 = vrot.slane %v2368_v35, 4  ;;  %v2403_v59 = vrot.slane %v2401_v51, 5  ;;  %v2407_v52 = vrot.slane %v2405_v48, 4 }
 0x14e   : > { %5940 = vmatprep.mubr.msk.bf16.mxu1 %vm658_vm4, %v5265_v58  ;;  %v2377_v0 = vshll.u32 %v6457_v46, 16  ;;  %v2381_v16 = vshrl.u32 %v6457_v46, 16  ;;  %v2355_v5 = vrot.slane %v2353_v63, 5  ;;  %v2373_v58 = vrot.slane %v2371_v13, 5 }
 0x14f   : > { %v2397_v63 = vrot.slane %v2395_v57, 5 }
 0x150   : > { %v2379_v30 = vrot.slane %v2377_v0, 5  ;;  %v2383_v23 = vrot.slane %v2381_v16, 4  ;;  %v2356_v35 = vsel %vm6557_vm5, %v2351_v12, %v2355_v5  ;;  %v2408_v0 = vor.u32 %v2407_v52, %v2403_v59 }
 0x151   : > { %v2398_v46 = vor.u32 %v2397_v63, %v2394_v8 }
 0x152   : > { %v2384_v32 = vor.u32 %v2383_v23, %v2379_v30  ;;  %v2409_v45 = vrot.slane %v2408_v0, 4  ;;  %v8235_v23 = vld [vmem:[%s8350_s2] ss:$0 sm:$0xff] }
 0x153   : > { %v2399_v16 = vrot.slane %v2398_v46, 4 }
 0x154   : > { %6077 = vmatmul.mubr.msk.bf16.gmra.mrb[16].mxu0 %vm658_vm4, %v5542_v43  ;;  %v2360_v43 = vor.u32 %v2359_v20, %v2355_v5  ;;  %v2385_v6 = vrot.slane %v2384_v32, 4  ;;  %v2414_v27 = vsel %vm6557_vm5, %v2409_v45, %v2413_v2 }
 0x155   : > { %5941 = vmatmul.mubr.msk.bf16.vlgmr.msra.gmra.mrb[16].mxu1 %vm658_vm4, %v7938_v42  ;;  %6080 = vmatprep.mubr.msk.bf16.mxu0 %vm658_vm4, %v5543_v18  ;;  %v2374_v42 = vor.u32 %v2373_v58, %v2370_v50  ;;  %v5269_v18 = vcombine.low %v2332_v14, %v2342_v22  ;;  %v2404_v9 = vsel %vm6557_vm5, %v2399_v16, %v2403_v59 }
 0x156   : > { %5944 = vmatprep.mubr.msk.bf16.mxu1 %vm658_vm4, %v5267_v11  ;;  %v2361_v29 = vrot.slane %v2360_v43, 4  ;;  %v2390_v17 = vsel %vm6557_vm5, %v2385_v6, %v2389_v19  ;;  %v5272_v60 = vcombine.low %v2404_v9, %v2414_v27 }
 0x157   : > { %v2375_v26 = vrot.slane %v2374_v42, 4 }
 0x158   : > { %v2366_v13 = vsel %vm6557_vm5, %v2361_v29, %v2365_v39 }
 0x159   : > { %v5270_v55 = vcombine.low %v2356_v35, %v2366_v13 }
 0x15c   : > { %6081 = vmatmul.mubr.msk.bf16.gmra.mrb[20].mxu0 %vm658_vm4, %v5544_v24  ;;  %v2380_v24 = vsel %vm6557_vm5, %v2375_v26, %v2379_v30 }
 0x15d   : > { %5945 = vmatmul.mubr.msk.bf16.gmra.mrb[20].mxu1 %vm658_vm4, %v5268_v33  ;;  %6084 = vmatprep.mubr.msk.bf16.mxu0 %vm658_vm4, %v5545_v38  ;;  %v5271_v38 = vcombine.low %v2380_v24, %v2390_v17 }
 0x15e   : > { %5948 = vmatprep.mubr.msk.bf16.mxu1 %vm658_vm4, %v5269_v18 }
 0x164   : > { %6085 = vmatmul.mubr.msk.bf16.gmra.mrb[24].mxu0 %vm658_vm4, %v5546_v1 }
 0x165   : > { %5949 = vmatmul.mubr.msk.bf16.gmra.mrb[24].mxu1 %vm658_vm4, %v5270_v55  ;;  %6088 = vmatprep.mubr.msk.bf16.mxu0 %vm658_vm4, %v5547_v44 }
 0x166   : > { %5952 = vmatprep.mubr.msk.bf16.mxu1 %vm658_vm4, %v5271_v38 }
 0x16c   : > { %6089 = vmatmul.mubr.msk.bf16.gmra.mrb[28].mxu0 %vm658_vm4, %v5548_v31 }
 0x16d   : > { %5953 = vmatmul.mubr.msk.bf16.gmra.mrb[28].mxu1 %vm658_vm4, %v5272_v60 }
 0x1e8   : > { %v5892_v54 = vpop.f32.mrb[0].mxu1 }
 0x1e9   : > { %v1824_v61 = vpop.f32.mrb[1].mxu1 }
 0x1ea   : > { %v5893_v1 = vpop.f32.mrb[2].mxu1 }
 0x1eb   : > { %v1827_v53 = vpop.f32.mrb[3].mxu1 }
 0x1f0   : > { %v5896_v40 = vpop.f32.mrb[4].mxu1 }
 0x1f1   : > { %v1840_v44 = vpop.f32.mrb[5].mxu1 }
 0x1f2   : > { %v5897_v28 = vpop.f32.mrb[6].mxu1 }
 0x1f3   : > { %v1843_v5 = vpop.f32.mrb[7].mxu1 }
 0x1f8   : > { %v5900_v20 = vpop.f32.mrb[8].mxu1 }
 0x1f9   : > { %v1856_v37 = vpop.f32.mrb[9].mxu1 }
 0x1fa   : > { %v8220_v11 = vpop.f32.mrb[10].mxu1 }
 0x1fb   : > { %v8222_v50 = vpop.f32.mrb[11].mxu1 }
 0x200   : > { %v8224_v49 = vpop.f32.mrb[12].mxu1 }
 0x201   : > { %v8226_v47 = vpop.f32.mrb[13].mxu1 }
 0x202   : > { %v8228_v31 = vpop.f32.mrb[14].mxu1 }
 0x203   : > { %v8230_v58 = vpop.f32.mrb[15].mxu1 }
 0x207   : > { %v6062_v30 = vpop.f32.mrb[0].mxu0 }
 0x208   : > { %v6094_v56 = vadd.f32 %v6062_v30, %v5892_v54  ;;  %v4575_v25 = vpop.f32.mrb[1].mxu0 }
 0x209   : > { %v6095_v34 = vadd.f32 %v4575_v25, %v1824_v61  ;;  %v6063_v14 = vpop.f32.mrb[2].mxu0 }
 0x20a   : > { %v4743_v22 = vadd.f32 %v6094_v56, %v8235_v23  ;;  %v6096_v62 = vadd.f32 %v6063_v14, %v5893_v1  ;;  %v4578_v43 = vpop.f32.mrb[3].mxu0 }
 0x20b   : > { %v4741_v36 = vadd.f32 %v6095_v34, %v8235_v23  ;;  %v6097_v3 = vadd.f32 %v4578_v43, %v1827_v53 }
 0x20c   : > { %v4775_v4 = vmax.f32 %v4743_v22, 0.0  ;;  %v4744_v57 = vadd.f32 %v6096_v62, %v8235_v23 }
 0x20d   : > { %v4773_v21 = vmax.f32 %v4741_v36, 0.0  ;;  %v4742_v51 = vadd.f32 %v6097_v3, %v8235_v23 }
 0x20e   : > { %v5603_v48 = vpack.c.bf16 %v4775_v4, %v4775_v4  ;;  %v4776_v42 = vmax.f32 %v4744_v57, 0.0 }
 0x20f   : > { %v5601_v32 = vpack.c.bf16 %v4773_v21, %v4773_v21  ;;  %v4774_v41 = vmax.f32 %v4742_v51, 0.0  ;;  %v6066_v7 = vpop.f32.mrb[4].mxu0 }
 0x210   : > { %4936 = vst.msk [vmem:[%s8244_s16 + $0x8] sm:$0xf] %vm4933_vm9, %v5603_v48  ;;  %v5604_v33 = vpack.c.bf16 %v4776_v42, %v4776_v42  ;;  %v6098_v18 = vadd.f32 %v6066_v7, %v5896_v40  ;;  %v4591_v12 = vpop.f32.mrb[5].mxu0 }
 0x211   : > { %4934 = vst.msk [vmem:[%s8244_s16] sm:$0xf] %vm4933_vm9, %v5601_v32  ;;  %v5602_v29 = vpack.c.bf16 %v4774_v41, %v4774_v41  ;;  %v6099_v39 = vadd.f32 %v4591_v12, %v1840_v44  ;;  %v6067_v8 = vpop.f32.mrb[6].mxu0 }
 0x212   : > { %4937 = vst.msk [vmem:[%s8244_s16 + $0xc] sm:$0xf] %vm4933_vm9, %v5604_v33  ;;  %v4747_v63 = vadd.f32 %v6098_v18, %v8235_v23  ;;  %v6100_v59 = vadd.f32 %v6067_v8, %v5897_v28  ;;  %v4594_v52 = vpop.f32.mrb[7].mxu0 }
 0x213   : > { %4935 = vst.msk [vmem:[%s8244_s16 + $0x4] sm:$0xf] %vm4933_vm9, %v5602_v29  ;;  %v4745_v26 = vadd.f32 %v6099_v39, %v8235_v23  ;;  %v6101_v6 = vadd.f32 %v4594_v52, %v1843_v5 }
 0x214   : > { %v4779_v19 = vmax.f32 %v4747_v63, 0.0  ;;  %v4748_v35 = vadd.f32 %v6100_v59, %v8235_v23 }
 0x215   : > { %v4777_v13 = vmax.f32 %v4745_v26, 0.0  ;;  %v4746_v46 = vadd.f32 %v6101_v6, %v8235_v23 }
 0x216   : > { %v5607_v0 = vpack.c.bf16 %v4779_v19, %v4779_v19  ;;  %v4780_v10 = vmax.f32 %v4748_v35, 0.0 }
 0x217   : > { %v5605_v15 = vpack.c.bf16 %v4777_v13, %v4777_v13  ;;  %v4778_v24 = vmax.f32 %v4746_v46, 0.0  ;;  %v6070_v17 = vpop.f32.mrb[8].mxu0 }
 0x218   : > { %4940 = vst.msk [vmem:[%s8244_s16 + $0x18] sm:$0xf] %vm4933_vm9, %v5607_v0  ;;  %v5608_v55 = vpack.c.bf16 %v4780_v10, %v4780_v10  ;;  %v6102_v38 = vadd.f32 %v6070_v17, %v5900_v20  ;;  %v4607_v16 = vpop.f32.mrb[9].mxu0 }
 0x219   : > { %4938 = vst.msk [vmem:[%s8244_s16 + $0x10] sm:$0xf] %vm4933_vm9, %v5605_v15  ;;  %v5606_v45 = vpack.c.bf16 %v4778_v24, %v4778_v24  ;;  %v6103_v2 = vadd.f32 %v4607_v16, %v1856_v37  ;;  %v6071_v9 = vpop.f32.mrb[10].mxu0 }
 0x21a   : > { %4941 = vst.msk [vmem:[%s8244_s16 + $0x1c] sm:$0xf] %vm4933_vm9, %v5608_v55  ;;  %v4751_v27 = vadd.f32 %v6102_v38, %v8235_v23  ;;  %v6104_v60 = vadd.f32 %v6071_v9, %v8220_v11  ;;  %v4610_v54 = vpop.f32.mrb[11].mxu0 }
 0x21b   : > { %4939 = vst.msk [vmem:[%s8244_s16 + $0x14] sm:$0xf] %vm4933_vm9, %v5606_v45  ;;  %v4749_v61 = vadd.f32 %v6103_v2, %v8235_v23  ;;  %v6105_v1 = vadd.f32 %v4610_v54, %v8222_v50 }
 0x21c   : > { %v4783_v53 = vmax.f32 %v4751_v27, 0.0  ;;  %v4752_v40 = vadd.f32 %v6104_v60, %v8235_v23 }
 0x21d   : > { %v4781_v44 = vmax.f32 %v4749_v61, 0.0  ;;  %v4750_v28 = vadd.f32 %v6105_v1, %v8235_v23 }
 0x21e   : > { %v5611_v5 = vpack.c.bf16 %v4783_v53, %v4783_v53  ;;  %v4784_v20 = vmax.f32 %v4752_v40, 0.0 }
 0x21f   : > { %v5609_v37 = vpack.c.bf16 %v4781_v44, %v4781_v44  ;;  %v4782_v11 = vmax.f32 %v4750_v28, 0.0  ;;  %v6074_v30 = vpop.f32.mrb[12].mxu0 }
 0x220   : > { %4944 = vst.msk [vmem:[%s8244_s16 + $0x28] sm:$0xf] %vm4933_vm9, %v5611_v5  ;;  %v5612_v56 = vpack.c.bf16 %v4784_v20, %v4784_v20  ;;  %v6106_v25 = vadd.f32 %v6074_v30, %v8224_v49  ;;  %v4623_v34 = vpop.f32.mrb[13].mxu0 }
 0x221   : > { %4942 = vst.msk [vmem:[%s8244_s16 + $0x20] sm:$0xf] %vm4933_vm9, %v5609_v37  ;;  %v5610_v50 = vpack.c.bf16 %v4782_v11, %v4782_v11  ;;  %v6107_v14 = vadd.f32 %v4623_v34, %v8226_v47  ;;  %v6075_v22 = vpop.f32.mrb[14].mxu0 }
 0x222   : > { %4945 = vst.msk [vmem:[%s8244_s16 + $0x2c] sm:$0xf] %vm4933_vm9, %v5612_v56  ;;  %v4755_v62 = vadd.f32 %v6106_v25, %v8235_v23  ;;  %v6108_v43 = vadd.f32 %v6075_v22, %v8228_v31  ;;  %v4626_v36 = vpop.f32.mrb[15].mxu0 }
 0x223   : > { %4943 = vst.msk [vmem:[%s8244_s16 + $0x24] sm:$0xf] %vm4933_vm9, %v5610_v50  ;;  %v4753_v49 = vadd.f32 %v6107_v14, %v8235_v23  ;;  %v6109_v3 = vadd.f32 %v4626_v36, %v8230_v58 }
 0x224   : > { %v4787_v4 = vmax.f32 %v4755_v62, 0.0  ;;  %v4756_v57 = vadd.f32 %v6108_v43, %v8235_v23 }
 0x225   : > { %v4785_v47 = vmax.f32 %v4753_v49, 0.0  ;;  %v4754_v21 = vadd.f32 %v6109_v3, %v8235_v23 }
 0x226   : > { %v5615_v51 = vpack.c.bf16 %v4787_v4, %v4787_v4  ;;  %v4788_v48 = vmax.f32 %v4756_v57, 0.0 }
 0x227   : > { %v5613_v42 = vpack.c.bf16 %v4785_v47, %v4785_v47  ;;  %v4786_v31 = vmax.f32 %v4754_v21, 0.0  ;;  %v6078_v32 = vpop.f32.mrb[16].mxu0 }
 0x228   : > { %4948 = vst.msk [vmem:[%s8244_s16 + $0x38] sm:$0xf] %vm4933_vm9, %v5615_v51  ;;  %v5616_v41 = vpack.c.bf16 %v4788_v48, %v4788_v48  ;;  %v5942_v7 = vpop.f32.mrb[16].mxu1  ;;  %v4639_v33 = vpop.f32.mrb[17].mxu0 }
 0x229   : > { %4946 = vst.msk [vmem:[%s8244_s16 + $0x30] sm:$0xf] %vm4933_vm9, %v5613_v42  ;;  %v5614_v58 = vpack.c.bf16 %v4786_v31, %v4786_v31  ;;  %v6110_v18 = vadd.f32 %v6078_v32, %v5942_v7  ;;  %v2614_v12 = vpop.f32.mrb[17].mxu1  ;;  %v6079_v29 = vpop.f32.mrb[18].mxu0 }
 0x22a   : > { %4949 = vst.msk [vmem:[%s8244_s16 + $0x3c] sm:$0xf] %vm4933_vm9, %v5616_v41  ;;  %v6111_v39 = vadd.f32 %v4639_v33, %v2614_v12  ;;  %v5943_v8 = vpop.f32.mrb[18].mxu1  ;;  %v4642_v63 = vpop.f32.mrb[19].mxu0 }
 0x22b   : > { %4947 = vst.msk [vmem:[%s8244_s16 + $0x34] sm:$0xf] %vm4933_vm9, %v5614_v58  ;;  %v4759_v59 = vadd.f32 %v6110_v18, %v8235_v23  ;;  %v6112_v52 = vadd.f32 %v6079_v29, %v5943_v8  ;;  %v2617_v26 = vpop.f32.mrb[19].mxu1 }
 0x22c   : > { %v4757_v6 = vadd.f32 %v6111_v39, %v8235_v23  ;;  %v6113_v19 = vadd.f32 %v4642_v63, %v2617_v26 }
 0x22d   : > { %v4791_v35 = vmax.f32 %v4759_v59, 0.0  ;;  %v4760_v13 = vadd.f32 %v6112_v52, %v8235_v23 }
 0x22e   : > { %v4789_v46 = vmax.f32 %v4757_v6, 0.0  ;;  %v4758_v0 = vadd.f32 %v6113_v19, %v8235_v23 }
 0x22f   : > { %v5619_v10 = vpack.c.bf16 %v4791_v35, %v4791_v35  ;;  %v4792_v15 = vmax.f32 %v4760_v13, 0.0  ;;  %v6082_v24 = vpop.f32.mrb[20].mxu0 }
 0x230   : > { %v5617_v17 = vpack.c.bf16 %v4789_v46, %v4789_v46  ;;  %v4790_v55 = vmax.f32 %v4758_v0, 0.0  ;;  %v5946_v38 = vpop.f32.mrb[20].mxu1  ;;  %v4655_v16 = vpop.f32.mrb[21].mxu0 }
 0x231   : > { %4952 = vst.msk [vmem:[%s8244_s16 + $0x48] sm:$0xf] %vm4933_vm9, %v5619_v10  ;;  %v5620_v45 = vpack.c.bf16 %v4792_v15, %v4792_v15  ;;  %v6114_v2 = vadd.f32 %v6082_v24, %v5946_v38  ;;  %v2630_v9 = vpop.f32.mrb[21].mxu1  ;;  %v6083_v27 = vpop.f32.mrb[22].mxu0 }
 0x232   : > { %4950 = vst.msk [vmem:[%s8244_s16 + $0x40] sm:$0xf] %vm4933_vm9, %v5617_v17  ;;  %v5618_v60 = vpack.c.bf16 %v4790_v55, %v4790_v55  ;;  %v6115_v54 = vadd.f32 %v4655_v16, %v2630_v9  ;;  %v5947_v61 = vpop.f32.mrb[22].mxu1  ;;  %v4658_v1 = vpop.f32.mrb[23].mxu0 }
 0x233   : > { %4953 = vst.msk [vmem:[%s8244_s16 + $0x4c] sm:$0xf] %vm4933_vm9, %v5620_v45  ;;  %v4763_v53 = vadd.f32 %v6114_v2, %v8235_v23  ;;  %v6116_v40 = vadd.f32 %v6083_v27, %v5947_v61  ;;  %v2633_v44 = vpop.f32.mrb[23].mxu1 }
 0x234   : > { %4951 = vst.msk [vmem:[%s8244_s16 + $0x44] sm:$0xf] %vm4933_vm9, %v5618_v60  ;;  %v4761_v28 = vadd.f32 %v6115_v54, %v8235_v23  ;;  %v6117_v5 = vadd.f32 %v4658_v1, %v2633_v44 }
 0x235   : > { %v4795_v20 = vmax.f32 %v4763_v53, 0.0  ;;  %v4764_v37 = vadd.f32 %v6116_v40, %v8235_v23 }
 0x236   : > { %v4793_v11 = vmax.f32 %v4761_v28, 0.0  ;;  %v4762_v30 = vadd.f32 %v6117_v5, %v8235_v23 }
 0x237   : > { %v5623_v56 = vpack.c.bf16 %v4795_v20, %v4795_v20  ;;  %v4796_v25 = vmax.f32 %v4764_v37, 0.0  ;;  %v6086_v34 = vpop.f32.mrb[24].mxu0 }
 0x238   : > { %v5621_v50 = vpack.c.bf16 %v4793_v11, %v4793_v11  ;;  %v4794_v14 = vmax.f32 %v4762_v30, 0.0  ;;  %v5950_v22 = vpop.f32.mrb[24].mxu1  ;;  %v4671_v62 = vpop.f32.mrb[25].mxu0 }
 0x239   : > { %4956 = vst.msk [vmem:[%s8244_s16 + $0x58] sm:$0xf] %vm4933_vm9, %v5623_v56  ;;  %v5624_v43 = vpack.c.bf16 %v4796_v25, %v4796_v25  ;;  %v6118_v36 = vadd.f32 %v6086_v34, %v5950_v22  ;;  %v2646_v49 = vpop.f32.mrb[25].mxu1  ;;  %v6087_v3 = vpop.f32.mrb[26].mxu0 }
 0x23a   : > { %4954 = vst.msk [vmem:[%s8244_s16 + $0x50] sm:$0xf] %vm4933_vm9, %v5621_v50  ;;  %v5622_v4 = vpack.c.bf16 %v4794_v14, %v4794_v14  ;;  %v6119_v57 = vadd.f32 %v4671_v62, %v2646_v49  ;;  %v5951_v47 = vpop.f32.mrb[26].mxu1  ;;  %v4674_v21 = vpop.f32.mrb[27].mxu0 }
 0x23b   : > { %4957 = vst.msk [vmem:[%s8244_s16 + $0x5c] sm:$0xf] %vm4933_vm9, %v5624_v43  ;;  %v4767_v51 = vadd.f32 %v6118_v36, %v8235_v23  ;;  %v6120_v48 = vadd.f32 %v6087_v3, %v5951_v47  ;;  %v2649_v42 = vpop.f32.mrb[27].mxu1 }
 0x23c   : > { %4955 = vst.msk [vmem:[%s8244_s16 + $0x54] sm:$0xf] %vm4933_vm9, %v5622_v4  ;;  %v4765_v31 = vadd.f32 %v6119_v57, %v8235_v23  ;;  %v6121_v32 = vadd.f32 %v4674_v21, %v2649_v42 }
 0x23d   : > { %v4799_v41 = vmax.f32 %v4767_v51, 0.0  ;;  %v4768_v7 = vadd.f32 %v6120_v48, %v8235_v23 }
 0x23e   : > { %v4797_v33 = vmax.f32 %v4765_v31, 0.0  ;;  %v4766_v58 = vadd.f32 %v6121_v32, %v8235_v23 }
 0x23f   : > { %v5627_v18 = vpack.c.bf16 %v4799_v41, %v4799_v41  ;;  %v4800_v12 = vmax.f32 %v4768_v7, 0.0  ;;  %v6090_v29 = vpop.f32.mrb[28].mxu0 }
 0x240   : > { %v5625_v39 = vpack.c.bf16 %v4797_v33, %v4797_v33  ;;  %v4798_v8 = vmax.f32 %v4766_v58, 0.0  ;;  %v5954_v63 = vpop.f32.mrb[28].mxu1  ;;  %v4687_v59 = vpop.f32.mrb[29].mxu0 }
 0x241   : > { %4960 = vst.msk [vmem:[%s8244_s16 + $0x68] sm:$0xf] %vm4933_vm9, %v5627_v18  ;;  %v5628_v52 = vpack.c.bf16 %v4800_v12, %v4800_v12  ;;  %v6122_v26 = vadd.f32 %v6090_v29, %v5954_v63  ;;  %v2662_v6 = vpop.f32.mrb[29].mxu1  ;;  %v6091_v19 = vpop.f32.mrb[30].mxu0 }
 0x242   : > { %4958 = vst.msk [vmem:[%s8244_s16 + $0x60] sm:$0xf] %vm4933_vm9, %v5625_v39  ;;  %v5626_v35 = vpack.c.bf16 %v4798_v8, %v4798_v8  ;;  %v6123_v13 = vadd.f32 %v4687_v59, %v2662_v6  ;;  %v5955_v46 = vpop.f32.mrb[30].mxu1  ;;  %v4690_v0 = vpop.f32.mrb[31].mxu0 }
 0x243   : > { %4961 = vst.msk [vmem:[%s8244_s16 + $0x6c] sm:$0xf] %vm4933_vm9, %v5628_v52  ;;  %v4771_v10 = vadd.f32 %v6122_v26, %v8235_v23  ;;  %v6124_v15 = vadd.f32 %v6091_v19, %v5955_v46  ;;  %v2665_v24 = vpop.f32.mrb[31].mxu1 }
 0x244   : > { %4959 = vst.msk [vmem:[%s8244_s16 + $0x64] sm:$0xf] %vm4933_vm9, %v5626_v35  ;;  %v4769_v17 = vadd.f32 %v6123_v13, %v8235_v23  ;;  %v6125_v55 = vadd.f32 %v4690_v0, %v2665_v24 }
 0x245   : > { %v4803_v38 = vmax.f32 %v4771_v10, 0.0  ;;  %v4772_v16 = vadd.f32 %v6124_v15, %v8235_v23 }
 0x246   : > { %v4801_v45 = vmax.f32 %v4769_v17, 0.0  ;;  %v4770_v2 = vadd.f32 %v6125_v55, %v8235_v23 }
 0x247   : > { %v5631_v9 = vpack.c.bf16 %v4803_v38, %v4803_v38  ;;  %v4804_v27 = vmax.f32 %v4772_v16, 0.0 }
 0x248   : > { %v5629_v60 = vpack.c.bf16 %v4801_v45, %v4801_v45  ;;  %v4802_v54 = vmax.f32 %v4770_v2, 0.0 }
 0x249   : > { %4964 = vst.msk [vmem:[%s8244_s16 + $0x78] sm:$0xf] %vm4933_vm9, %v5631_v9  ;;  %v5632_v61 = vpack.c.bf16 %v4804_v27, %v4804_v27 }
 0x24a   : > { %4962 = vst.msk [vmem:[%s8244_s16 + $0x70] sm:$0xf] %vm4933_vm9, %v5629_v60  ;;  %v5630_v1 = vpack.c.bf16 %v4802_v54, %v4802_v54 }
 0x24b   : > { %4965 = vst.msk [vmem:[%s8244_s16 + $0x7c] sm:$0xf] %vm4933_vm9, %v5632_v61 }
 0x24c   : > { %4963 = vst.msk [vmem:[%s8244_s16 + $0x74] sm:$0xf] %vm4933_vm9, %v5630_v1 }
 0x24d PF: > { %s13_s12 = sadd.s32 1, %s6468_s12  }
 0x24e   : > { %p10_p4 = scmp.ge.s32.totalorder %s13_s12, 4  }
 0x250   :  { %12 = sbr.rel (!%p10_p4) target bundleno = 1 (0x1), region = 72 }

// kernel: tpu_custom_call.1
= control target key start
LH: loop header
LB: loop body
LE: loop exit
PB: predicated region body
PF: predicated region fallthrough
CT: control target
= control target key end

     0   :  { %vm358_vm0 = vcmask 1044480   ;;  %vm359_vm1 = vcmask 1045504   ;;  %vm261_vm2 = vcmask 220160   ;;  %v1315_v1 = vmov 65535   ;;  %s1795_s1 = inlined_call_operand.vmem [shape: bf16[27,32], index: 1, kind: input, shape index: {}]   ;;  %s1796_s0 = inlined_call_operand.vmem [shape: bf16[512,27], index: 0, kind: input, shape index: {}]   ;;  %s1797_s2 = inlined_call_operand.vmem [shape: f32[1,32], index: 2, kind: input, shape index: {}]   ;;  %s1798_s3 = inlined_call_operand.vmem [shape: bf16[512,32], index: 3, kind: output, shape index: {}]  }
   0x1   :  { %v1281_v0 = vld [vmem:[%s1795_s1] sm:$0xff]   ;;  %v360_v2 = vsel %vm358_vm0, 4294967295, %v1315_v1  ;;  %v1282_v3 = vld [vmem:[%s1795_s1 + $0x8] sm:$0x3f]   ;;  %v1287_v10 = vld [vmem:[%s1796_s0 + $0x10] sm:$0xff]   ;;  %vm910_vm3 = vcmask 257024  }
   0x2   :  { %1208 = vmatprep.subr.bf16.mxu0 %v1281_v0  ;;  %1276 = vmatprep.subr.bf16.mxu1 %v1281_v0  ;;  %v361_v4 = vsel %vm359_vm1, %v360_v2, 0  ;;  %v1283_v5 = vld [vmem:[%s1796_s0] sm:$0xff]   ;;  %v1285_v8 = vld [vmem:[%s1796_s0 + $0x8] sm:$0xff]   ;;  %v1288_v11 = vld [vmem:[%s1796_s0 + $0x90] sm:$0xff]  }
   0x3   :  { %1209 = vmatpush3.bf16.msra.mxu0 %v1281_v0  ;;  %1278 = vmatpush3.bf16.msra.mxu1 %v1281_v0  ;;  %v363_v6 = vand.u32 %v1282_v3, %v361_v4  ;;  %v1284_v7 = vld [vmem:[%s1796_s0 + $0x80] sm:$0xff]   ;;  %v1286_v9 = vld [vmem:[%s1796_s0 + $0x88] sm:$0xff]   ;;  %v1289_v12 = vld [vmem:[%s1796_s0 + $0x18] sm:$0xff]  }
   0x4   :  { %1212 = vmatprep.mubr.msk.bf16.mxu0 %vm261_vm2, %v1283_v5  ;;  %1244 = vmatprep.mubr.msk.bf16.mxu1 %vm261_vm2, %v1284_v7  ;;  %v1290_v13 = vld [vmem:[%s1796_s0 + $0x98] sm:$0xff]   ;;  %v1291_v14 = vld [vmem:[%s1796_s0 + $0x20] sm:$0xff]   ;;  %v1293_v16 = vld [vmem:[%s1796_s0 + $0x28] sm:$0xff]  }
   0x5   :  { %1210 = vmatprep.subr.bf16.mxu0 %v363_v6  ;;  %1277 = vmatprep.subr.bf16.mxu1 %v363_v6  ;;  %v1292_v15 = vld [vmem:[%s1796_s0 + $0xa0] sm:$0xff]   ;;  %v1294_v17 = vld [vmem:[%s1796_s0 + $0xa8] sm:$0xff]   ;;  %v1295_v18 = vld [vmem:[%s1796_s0 + $0x30] sm:$0xff]  }
   0x6   :  { %v1296_v19 = vld [vmem:[%s1796_s0 + $0xb0] sm:$0xff]   ;;  %v1297_v20 = vld [vmem:[%s1796_s0 + $0x38] sm:$0xff]   ;;  %v1299_v22 = vld [vmem:[%s1796_s0 + $0x40] sm:$0xff]  }
   0x7   :  { %1211 = vmatpush3.bf16.msra.mxu0 %v363_v6  ;;  %1279 = vmatpush3.bf16.msra.mxu1 %v363_v6  ;;  %v1298_v21 = vld [vmem:[%s1796_s0 + $0xb8] sm:$0xff]   ;;  %v1300_v23 = vld [vmem:[%s1796_s0 + $0xc0] sm:$0xff]   ;;  %v1301_v24 = vld [vmem:[%s1796_s0 + $0x48] sm:$0xff]  }
   0x8   :  { %v1302_v25 = vld [vmem:[%s1796_s0 + $0xc8] sm:$0xff]   ;;  %v1303_v26 = vld [vmem:[%s1796_s0 + $0x50] sm:$0xff]   ;;  %v1305_v28 = vld [vmem:[%s1796_s0 + $0x58] sm:$0xff]  }
   0x9   :  { %v1304_v27 = vld [vmem:[%s1796_s0 + $0xd0] sm:$0xff]   ;;  %v1306_v29 = vld [vmem:[%s1796_s0 + $0xd8] sm:$0xff]   ;;  %v1307_v30 = vld [vmem:[%s1796_s0 + $0x60] sm:$0xff]  }
   0xa   :  { %1213 = vmatmul.mubr.msk.bf16.vlgmr.msra.gmra.mrb[0].mxu0 %vm261_vm2, %v1285_v8  ;;  %1245 = vmatmul.mubr.msk.bf16.vlgmr.msra.gmra.mrb[0].mxu1 %vm261_vm2, %v1286_v9  ;;  %v1308_v31 = vld [vmem:[%s1796_s0 + $0xe0] sm:$0xff]   ;;  %v1309_v32 = vld [vmem:[%s1796_s0 + $0x68] sm:$0xff]   ;;  %v1311_v34 = vld [vmem:[%s1796_s0 + $0x70] sm:$0xff]  }
   0xb   :  { %1216 = vmatprep.mubr.msk.bf16.mxu0 %vm261_vm2, %v1287_v10  ;;  %1248 = vmatprep.mubr.msk.bf16.mxu1 %vm261_vm2, %v1288_v11  ;;  %v1310_v33 = vld [vmem:[%s1796_s0 + $0xe8] sm:$0xff]   ;;  %v1312_v35 = vld [vmem:[%s1796_s0 + $0xf0] sm:$0xff]   ;;  %v1313_v36 = vld [vmem:[%s1796_s0 + $0x78] sm:$0xff]  }
   0xc   :  { %v1314_v37 = vld [vmem:[%s1796_s0 + $0xf8] sm:$0xff]   ;;  %v1473_v38 = vld [vmem:[%s1797_s2] ss:$0 sm:$0xff] }
  0x12   :  { %1217 = vmatmul.mubr.msk.bf16.gmra.mrb[4].mxu0 %vm261_vm2, %v1289_v12  ;;  %1249 = vmatmul.mubr.msk.bf16.gmra.mrb[4].mxu1 %vm261_vm2, %v1290_v13 }
  0x13   :  { %1220 = vmatprep.mubr.msk.bf16.mxu0 %vm261_vm2, %v1291_v14  ;;  %1252 = vmatprep.mubr.msk.bf16.mxu1 %vm261_vm2, %v1292_v15 }
  0x1a   :  { %1221 = vmatmul.mubr.msk.bf16.gmra.mrb[8].mxu0 %vm261_vm2, %v1293_v16  ;;  %1253 = vmatmul.mubr.msk.bf16.gmra.mrb[8].mxu1 %vm261_vm2, %v1294_v17 }
  0x1b   :  { %1224 = vmatprep.mubr.msk.bf16.mxu0 %vm261_vm2, %v1295_v18  ;;  %1256 = vmatprep.mubr.msk.bf16.mxu1 %vm261_vm2, %v1296_v19 }
  0x22   :  { %1225 = vmatmul.mubr.msk.bf16.gmra.mrb[12].mxu0 %vm261_vm2, %v1297_v20  ;;  %1257 = vmatmul.mubr.msk.bf16.gmra.mrb[12].mxu1 %vm261_vm2, %v1298_v21 }
  0x23   :  { %1228 = vmatprep.mubr.msk.bf16.mxu0 %vm261_vm2, %v1299_v22  ;;  %1260 = vmatprep.mubr.msk.bf16.mxu1 %vm261_vm2, %v1300_v23 }
  0x2a   :  { %1229 = vmatmul.mubr.msk.bf16.gmra.mrb[16].mxu0 %vm261_vm2, %v1301_v24  ;;  %1261 = vmatmul.mubr.msk.bf16.gmra.mrb[16].mxu1 %vm261_vm2, %v1302_v25 }
  0x2b   :  { %1232 = vmatprep.mubr.msk.bf16.mxu0 %vm261_vm2, %v1303_v26  ;;  %1264 = vmatprep.mubr.msk.bf16.mxu1 %vm261_vm2, %v1304_v27 }
  0x32   :  { %1233 = vmatmul.mubr.msk.bf16.gmra.mrb[20].mxu0 %vm261_vm2, %v1305_v28  ;;  %1265 = vmatmul.mubr.msk.bf16.gmra.mrb[20].mxu1 %vm261_vm2, %v1306_v29 }
  0x33   :  { %1236 = vmatprep.mubr.msk.bf16.mxu0 %vm261_vm2, %v1307_v30  ;;  %1268 = vmatprep.mubr.msk.bf16.mxu1 %vm261_vm2, %v1308_v31 }
  0x3a   :  { %1237 = vmatmul.mubr.msk.bf16.gmra.mrb[24].mxu0 %vm261_vm2, %v1309_v32  ;;  %1269 = vmatmul.mubr.msk.bf16.gmra.mrb[24].mxu1 %vm261_vm2, %v1310_v33 }
  0x3b   :  { %1240 = vmatprep.mubr.msk.bf16.mxu0 %vm261_vm2, %v1311_v34  ;;  %1272 = vmatprep.mubr.msk.bf16.mxu1 %vm261_vm2, %v1312_v35 }
  0x42   :  { %1241 = vmatmul.mubr.msk.bf16.gmra.mrb[28].mxu0 %vm261_vm2, %v1313_v36  ;;  %1273 = vmatmul.mubr.msk.bf16.gmra.mrb[28].mxu1 %vm261_vm2, %v1314_v37 }
  0xdd   :  { %v1214_v39 = vpop.f32.mrb[0].mxu0  ;;  %v1246_v40 = vpop.f32.mrb[0].mxu1 }
  0xde   :  { %v408_v41 = vadd.f32 %v1214_v39, %v1473_v38  ;;  %v536_v42 = vadd.f32 %v1246_v40, %v1473_v38  ;;  %v399_v43 = vpop.f32.mrb[1].mxu0  ;;  %v527_v44 = vpop.f32.mrb[1].mxu1 }
  0xdf   :  { %v400_v45 = vadd.f32 %v1473_v38, %v399_v43  ;;  %v528_v46 = vadd.f32 %v1473_v38, %v527_v44  ;;  %v1215_v47 = vpop.f32.mrb[2].mxu0  ;;  %v1247_v48 = vpop.f32.mrb[2].mxu1 }
  0xe0   :  { %v1112_v49 = vpack.c.bf16 %v408_v41, %v408_v41  ;;  %v1144_v50 = vpack.c.bf16 %v536_v42, %v536_v42  ;;  %v411_v51 = vadd.f32 %v1215_v47, %v1473_v38  ;;  %v539_v52 = vadd.f32 %v1247_v48, %v1473_v38  ;;  %v402_v53 = vpop.f32.mrb[3].mxu0  ;;  %v530_v54 = vpop.f32.mrb[3].mxu1 }
  0xe1   :  { %v1110_v55 = vpack.c.bf16 %v400_v45, %v400_v45  ;;  %v1142_v56 = vpack.c.bf16 %v528_v46, %v528_v46  ;;  %v403_v57 = vadd.f32 %v1473_v38, %v402_v53  ;;  %v531_v58 = vadd.f32 %v1473_v38, %v530_v54 }
  0xe2   :  { %913 = vst.msk [vmem:[%s1798_s3 + $0x8] sm:$0xf] %vm910_vm3, %v1112_v49  ;;  %945 = vst.msk [vmem:[%s1798_s3 + $0x88] sm:$0xf] %vm910_vm3, %v1144_v50  ;;  %v1113_v59 = vpack.c.bf16 %v411_v51, %v411_v51  ;;  %v1145_v60 = vpack.c.bf16 %v539_v52, %v539_v52 }
  0xe3   :  { %911 = vst.msk [vmem:[%s1798_s3] sm:$0xf] %vm910_vm3, %v1110_v55  ;;  %943 = vst.msk [vmem:[%s1798_s3 + $0x80] sm:$0xf] %vm910_vm3, %v1142_v56  ;;  %v1111_v61 = vpack.c.bf16 %v403_v57, %v403_v57  ;;  %v1143_v62 = vpack.c.bf16 %v531_v58, %v531_v58 }
  0xe4   :  { %914 = vst.msk [vmem:[%s1798_s3 + $0xc] sm:$0xf] %vm910_vm3, %v1113_v59  ;;  %946 = vst.msk [vmem:[%s1798_s3 + $0x8c] sm:$0xf] %vm910_vm3, %v1145_v60 }
  0xe5   :  { %912 = vst.msk [vmem:[%s1798_s3 + $0x4] sm:$0xf] %vm910_vm3, %v1111_v61  ;;  %944 = vst.msk [vmem:[%s1798_s3 + $0x84] sm:$0xf] %vm910_vm3, %v1143_v62  ;;  %v1218_v63 = vpop.f32.mrb[4].mxu0  ;;  %v1250_v0 = vpop.f32.mrb[4].mxu1 }
  0xe6   :  { %v424_v1 = vadd.f32 %v1218_v63, %v1473_v38  ;;  %v552_v2 = vadd.f32 %v1250_v0, %v1473_v38  ;;  %v415_v3 = vpop.f32.mrb[5].mxu0  ;;  %v543_v4 = vpop.f32.mrb[5].mxu1 }
  0xe7   :  { %v416_v5 = vadd.f32 %v1473_v38, %v415_v3  ;;  %v544_v6 = vadd.f32 %v1473_v38, %v543_v4  ;;  %v1219_v7 = vpop.f32.mrb[6].mxu0  ;;  %v1251_v8 = vpop.f32.mrb[6].mxu1 }
  0xe8   :  { %v1116_v9 = vpack.c.bf16 %v424_v1, %v424_v1  ;;  %v1148_v10 = vpack.c.bf16 %v552_v2, %v552_v2  ;;  %v427_v11 = vadd.f32 %v1219_v7, %v1473_v38  ;;  %v555_v12 = vadd.f32 %v1251_v8, %v1473_v38  ;;  %v418_v13 = vpop.f32.mrb[7].mxu0  ;;  %v546_v14 = vpop.f32.mrb[7].mxu1 }
  0xe9   :  { %v1114_v15 = vpack.c.bf16 %v416_v5, %v416_v5  ;;  %v1146_v16 = vpack.c.bf16 %v544_v6, %v544_v6  ;;  %v419_v17 = vadd.f32 %v1473_v38, %v418_v13  ;;  %v547_v18 = vadd.f32 %v1473_v38, %v546_v14 }
  0xea   :  { %917 = vst.msk [vmem:[%s1798_s3 + $0x18] sm:$0xf] %vm910_vm3, %v1116_v9  ;;  %949 = vst.msk [vmem:[%s1798_s3 + $0x98] sm:$0xf] %vm910_vm3, %v1148_v10  ;;  %v1117_v19 = vpack.c.bf16 %v427_v11, %v427_v11  ;;  %v1149_v20 = vpack.c.bf16 %v555_v12, %v555_v12 }
  0xeb   :  { %915 = vst.msk [vmem:[%s1798_s3 + $0x10] sm:$0xf] %vm910_vm3, %v1114_v15  ;;  %947 = vst.msk [vmem:[%s1798_s3 + $0x90] sm:$0xf] %vm910_vm3, %v1146_v16  ;;  %v1115_v21 = vpack.c.bf16 %v419_v17, %v419_v17  ;;  %v1147_v22 = vpack.c.bf16 %v547_v18, %v547_v18 }
  0xec   :  { %918 = vst.msk [vmem:[%s1798_s3 + $0x1c] sm:$0xf] %vm910_vm3, %v1117_v19  ;;  %950 = vst.msk [vmem:[%s1798_s3 + $0x9c] sm:$0xf] %vm910_vm3, %v1149_v20 }
  0xed   :  { %916 = vst.msk [vmem:[%s1798_s3 + $0x14] sm:$0xf] %vm910_vm3, %v1115_v21  ;;  %948 = vst.msk [vmem:[%s1798_s3 + $0x94] sm:$0xf] %vm910_vm3, %v1147_v22  ;;  %v1222_v23 = vpop.f32.mrb[8].mxu0  ;;  %v1254_v24 = vpop.f32.mrb[8].mxu1 }
  0xee   :  { %v440_v25 = vadd.f32 %v1222_v23, %v1473_v38  ;;  %v568_v26 = vadd.f32 %v1254_v24, %v1473_v38  ;;  %v431_v27 = vpop.f32.mrb[9].mxu0  ;;  %v559_v28 = vpop.f32.mrb[9].mxu1 }
  0xef   :  { %v432_v29 = vadd.f32 %v1473_v38, %v431_v27  ;;  %v560_v30 = vadd.f32 %v1473_v38, %v559_v28  ;;  %v1223_v31 = vpop.f32.mrb[10].mxu0  ;;  %v1255_v32 = vpop.f32.mrb[10].mxu1 }
  0xf0   :  { %v1120_v33 = vpack.c.bf16 %v440_v25, %v440_v25  ;;  %v1152_v34 = vpack.c.bf16 %v568_v26, %v568_v26  ;;  %v443_v35 = vadd.f32 %v1223_v31, %v1473_v38  ;;  %v571_v36 = vadd.f32 %v1255_v32, %v1473_v38  ;;  %v434_v37 = vpop.f32.mrb[11].mxu0  ;;  %v562_v39 = vpop.f32.mrb[11].mxu1 }
  0xf1   :  { %v1118_v40 = vpack.c.bf16 %v432_v29, %v432_v29  ;;  %v1150_v41 = vpack.c.bf16 %v560_v30, %v560_v30  ;;  %v435_v42 = vadd.f32 %v1473_v38, %v434_v37  ;;  %v563_v43 = vadd.f32 %v1473_v38, %v562_v39 }
  0xf2   :  { %921 = vst.msk [vmem:[%s1798_s3 + $0x28] sm:$0xf] %vm910_vm3, %v1120_v33  ;;  %953 = vst.msk [vmem:[%s1798_s3 + $0xa8] sm:$0xf] %vm910_vm3, %v1152_v34  ;;  %v1121_v44 = vpack.c.bf16 %v443_v35, %v443_v35  ;;  %v1153_v45 = vpack.c.bf16 %v571_v36, %v571_v36 }
  0xf3   :  { %919 = vst.msk [vmem:[%s1798_s3 + $0x20] sm:$0xf] %vm910_vm3, %v1118_v40  ;;  %951 = vst.msk [vmem:[%s1798_s3 + $0xa0] sm:$0xf] %vm910_vm3, %v1150_v41  ;;  %v1119_v46 = vpack.c.bf16 %v435_v42, %v435_v42  ;;  %v1151_v47 = vpack.c.bf16 %v563_v43, %v563_v43 }
  0xf4   :  { %922 = vst.msk [vmem:[%s1798_s3 + $0x2c] sm:$0xf] %vm910_vm3, %v1121_v44  ;;  %954 = vst.msk [vmem:[%s1798_s3 + $0xac] sm:$0xf] %vm910_vm3, %v1153_v45 }
  0xf5   :  { %920 = vst.msk [vmem:[%s1798_s3 + $0x24] sm:$0xf] %vm910_vm3, %v1119_v46  ;;  %952 = vst.msk [vmem:[%s1798_s3 + $0xa4] sm:$0xf] %vm910_vm3, %v1151_v47  ;;  %v1226_v48 = vpop.f32.mrb[12].mxu0  ;;  %v1258_v49 = vpop.f32.mrb[12].mxu1 }
  0xf6   :  { %v456_v50 = vadd.f32 %v1226_v48, %v1473_v38  ;;  %v584_v51 = vadd.f32 %v1258_v49, %v1473_v38  ;;  %v447_v52 = vpop.f32.mrb[13].mxu0  ;;  %v575_v53 = vpop.f32.mrb[13].mxu1 }
  0xf7   :  { %v448_v54 = vadd.f32 %v1473_v38, %v447_v52  ;;  %v576_v55 = vadd.f32 %v1473_v38, %v575_v53  ;;  %v1227_v56 = vpop.f32.mrb[14].mxu0  ;;  %v1259_v57 = vpop.f32.mrb[14].mxu1 }
  0xf8   :  { %v1124_v58 = vpack.c.bf16 %v456_v50, %v456_v50  ;;  %v1156_v59 = vpack.c.bf16 %v584_v51, %v584_v51  ;;  %v459_v60 = vadd.f32 %v1227_v56, %v1473_v38  ;;  %v587_v61 = vadd.f32 %v1259_v57, %v1473_v38  ;;  %v450_v62 = vpop.f32.mrb[15].mxu0  ;;  %v578_v63 = vpop.f32.mrb[15].mxu1 }
  0xf9   :  { %v1122_v0 = vpack.c.bf16 %v448_v54, %v448_v54  ;;  %v1154_v1 = vpack.c.bf16 %v576_v55, %v576_v55  ;;  %v451_v2 = vadd.f32 %v1473_v38, %v450_v62  ;;  %v579_v3 = vadd.f32 %v1473_v38, %v578_v63 }
  0xfa   :  { %925 = vst.msk [vmem:[%s1798_s3 + $0x38] sm:$0xf] %vm910_vm3, %v1124_v58  ;;  %957 = vst.msk [vmem:[%s1798_s3 + $0xb8] sm:$0xf] %vm910_vm3, %v1156_v59  ;;  %v1125_v4 = vpack.c.bf16 %v459_v60, %v459_v60  ;;  %v1157_v5 = vpack.c.bf16 %v587_v61, %v587_v61 }
  0xfb   :  { %923 = vst.msk [vmem:[%s1798_s3 + $0x30] sm:$0xf] %vm910_vm3, %v1122_v0  ;;  %955 = vst.msk [vmem:[%s1798_s3 + $0xb0] sm:$0xf] %vm910_vm3, %v1154_v1  ;;  %v1123_v6 = vpack.c.bf16 %v451_v2, %v451_v2  ;;  %v1155_v7 = vpack.c.bf16 %v579_v3, %v579_v3 }
  0xfc   :  { %926 = vst.msk [vmem:[%s1798_s3 + $0x3c] sm:$0xf] %vm910_vm3, %v1125_v4  ;;  %958 = vst.msk [vmem:[%s1798_s3 + $0xbc] sm:$0xf] %vm910_vm3, %v1157_v5 }
  0xfd   :  { %924 = vst.msk [vmem:[%s1798_s3 + $0x34] sm:$0xf] %vm910_vm3, %v1123_v6  ;;  %956 = vst.msk [vmem:[%s1798_s3 + $0xb4] sm:$0xf] %vm910_vm3, %v1155_v7  ;;  %v1230_v8 = vpop.f32.mrb[16].mxu0  ;;  %v1262_v9 = vpop.f32.mrb[16].mxu1 }
  0xfe   :  { %v472_v10 = vadd.f32 %v1230_v8, %v1473_v38  ;;  %v600_v11 = vadd.f32 %v1262_v9, %v1473_v38  ;;  %v463_v12 = vpop.f32.mrb[17].mxu0  ;;  %v591_v13 = vpop.f32.mrb[17].mxu1 }
  0xff   :  { %v464_v14 = vadd.f32 %v1473_v38, %v463_v12  ;;  %v592_v15 = vadd.f32 %v1473_v38, %v591_v13  ;;  %v1231_v16 = vpop.f32.mrb[18].mxu0  ;;  %v1263_v17 = vpop.f32.mrb[18].mxu1 }
 0x100   :  { %v1128_v18 = vpack.c.bf16 %v472_v10, %v472_v10  ;;  %v1160_v19 = vpack.c.bf16 %v600_v11, %v600_v11  ;;  %v475_v20 = vadd.f32 %v1231_v16, %v1473_v38  ;;  %v603_v21 = vadd.f32 %v1263_v17, %v1473_v38  ;;  %v466_v22 = vpop.f32.mrb[19].mxu0  ;;  %v594_v23 = vpop.f32.mrb[19].mxu1 }
 0x101   :  { %v1126_v24 = vpack.c.bf16 %v464_v14, %v464_v14  ;;  %v1158_v25 = vpack.c.bf16 %v592_v15, %v592_v15  ;;  %v467_v26 = vadd.f32 %v1473_v38, %v466_v22  ;;  %v595_v27 = vadd.f32 %v1473_v38, %v594_v23 }
 0x102   :  { %929 = vst.msk [vmem:[%s1798_s3 + $0x48] sm:$0xf] %vm910_vm3, %v1128_v18  ;;  %961 = vst.msk [vmem:[%s1798_s3 + $0xc8] sm:$0xf] %vm910_vm3, %v1160_v19  ;;  %v1129_v28 = vpack.c.bf16 %v475_v20, %v475_v20  ;;  %v1161_v29 = vpack.c.bf16 %v603_v21, %v603_v21 }
 0x103   :  { %927 = vst.msk [vmem:[%s1798_s3 + $0x40] sm:$0xf] %vm910_vm3, %v1126_v24  ;;  %959 = vst.msk [vmem:[%s1798_s3 + $0xc0] sm:$0xf] %vm910_vm3, %v1158_v25  ;;  %v1127_v30 = vpack.c.bf16 %v467_v26, %v467_v26  ;;  %v1159_v31 = vpack.c.bf16 %v595_v27, %v595_v27 }
 0x104   :  { %930 = vst.msk [vmem:[%s1798_s3 + $0x4c] sm:$0xf] %vm910_vm3, %v1129_v28  ;;  %962 = vst.msk [vmem:[%s1798_s3 + $0xcc] sm:$0xf] %vm910_vm3, %v1161_v29 }
 0x105   :  { %928 = vst.msk [vmem:[%s1798_s3 + $0x44] sm:$0xf] %vm910_vm3, %v1127_v30  ;;  %960 = vst.msk [vmem:[%s1798_s3 + $0xc4] sm:$0xf] %vm910_vm3, %v1159_v31  ;;  %v1234_v32 = vpop.f32.mrb[20].mxu0  ;;  %v1266_v33 = vpop.f32.mrb[20].mxu1 }
 0x106   :  { %v488_v34 = vadd.f32 %v1234_v32, %v1473_v38  ;;  %v616_v35 = vadd.f32 %v1266_v33, %v1473_v38  ;;  %v479_v36 = vpop.f32.mrb[21].mxu0  ;;  %v607_v37 = vpop.f32.mrb[21].mxu1 }
 0x107   :  { %v480_v39 = vadd.f32 %v1473_v38, %v479_v36  ;;  %v608_v40 = vadd.f32 %v1473_v38, %v607_v37  ;;  %v1235_v41 = vpop.f32.mrb[22].mxu0  ;;  %v1267_v42 = vpop.f32.mrb[22].mxu1 }
 0x108   :  { %v1132_v43 = vpack.c.bf16 %v488_v34, %v488_v34  ;;  %v1164_v44 = vpack.c.bf16 %v616_v35, %v616_v35  ;;  %v491_v45 = vadd.f32 %v1235_v41, %v1473_v38  ;;  %v619_v46 = vadd.f32 %v1267_v42, %v1473_v38  ;;  %v482_v47 = vpop.f32.mrb[23].mxu0  ;;  %v610_v48 = vpop.f32.mrb[23].mxu1 }
 0x109   :  { %v1130_v49 = vpack.c.bf16 %v480_v39, %v480_v39  ;;  %v1162_v50 = vpack.c.bf16 %v608_v40, %v608_v40  ;;  %v483_v51 = vadd.f32 %v1473_v38, %v482_v47  ;;  %v611_v52 = vadd.f32 %v1473_v38, %v610_v48 }
 0x10a   :  { %933 = vst.msk [vmem:[%s1798_s3 + $0x58] sm:$0xf] %vm910_vm3, %v1132_v43  ;;  %965 = vst.msk [vmem:[%s1798_s3 + $0xd8] sm:$0xf] %vm910_vm3, %v1164_v44  ;;  %v1133_v53 = vpack.c.bf16 %v491_v45, %v491_v45  ;;  %v1165_v54 = vpack.c.bf16 %v619_v46, %v619_v46 }
 0x10b   :  { %931 = vst.msk [vmem:[%s1798_s3 + $0x50] sm:$0xf] %vm910_vm3, %v1130_v49  ;;  %963 = vst.msk [vmem:[%s1798_s3 + $0xd0] sm:$0xf] %vm910_vm3, %v1162_v50  ;;  %v1131_v55 = vpack.c.bf16 %v483_v51, %v483_v51  ;;  %v1163_v56 = vpack.c.bf16 %v611_v52, %v611_v52 }
 0x10c   :  { %934 = vst.msk [vmem:[%s1798_s3 + $0x5c] sm:$0xf] %vm910_vm3, %v1133_v53  ;;  %966 = vst.msk [vmem:[%s1798_s3 + $0xdc] sm:$0xf] %vm910_vm3, %v1165_v54 }
 0x10d   :  { %932 = vst.msk [vmem:[%s1798_s3 + $0x54] sm:$0xf] %vm910_vm3, %v1131_v55  ;;  %964 = vst.msk [vmem:[%s1798_s3 + $0xd4] sm:$0xf] %vm910_vm3, %v1163_v56  ;;  %v1238_v57 = vpop.f32.mrb[24].mxu0  ;;  %v1270_v58 = vpop.f32.mrb[24].mxu1 }
 0x10e   :  { %v504_v59 = vadd.f32 %v1238_v57, %v1473_v38  ;;  %v632_v60 = vadd.f32 %v1270_v58, %v1473_v38  ;;  %v495_v61 = vpop.f32.mrb[25].mxu0  ;;  %v623_v62 = vpop.f32.mrb[25].mxu1 }
 0x10f   :  { %v496_v63 = vadd.f32 %v1473_v38, %v495_v61  ;;  %v624_v0 = vadd.f32 %v1473_v38, %v623_v62  ;;  %v1239_v1 = vpop.f32.mrb[26].mxu0  ;;  %v1271_v2 = vpop.f32.mrb[26].mxu1 }
 0x110   :  { %v1136_v3 = vpack.c.bf16 %v504_v59, %v504_v59  ;;  %v1168_v4 = vpack.c.bf16 %v632_v60, %v632_v60  ;;  %v507_v5 = vadd.f32 %v1239_v1, %v1473_v38  ;;  %v635_v6 = vadd.f32 %v1271_v2, %v1473_v38  ;;  %v498_v7 = vpop.f32.mrb[27].mxu0  ;;  %v626_v8 = vpop.f32.mrb[27].mxu1 }
 0x111   :  { %v1134_v9 = vpack.c.bf16 %v496_v63, %v496_v63  ;;  %v1166_v10 = vpack.c.bf16 %v624_v0, %v624_v0  ;;  %v499_v11 = vadd.f32 %v1473_v38, %v498_v7  ;;  %v627_v12 = vadd.f32 %v1473_v38, %v626_v8 }
 0x112   :  { %937 = vst.msk [vmem:[%s1798_s3 + $0x68] sm:$0xf] %vm910_vm3, %v1136_v3  ;;  %969 = vst.msk [vmem:[%s1798_s3 + $0xe8] sm:$0xf] %vm910_vm3, %v1168_v4  ;;  %v1137_v13 = vpack.c.bf16 %v507_v5, %v507_v5  ;;  %v1169_v14 = vpack.c.bf16 %v635_v6, %v635_v6 }
 0x113   :  { %935 = vst.msk [vmem:[%s1798_s3 + $0x60] sm:$0xf] %vm910_vm3, %v1134_v9  ;;  %967 = vst.msk [vmem:[%s1798_s3 + $0xe0] sm:$0xf] %vm910_vm3, %v1166_v10  ;;  %v1135_v15 = vpack.c.bf16 %v499_v11, %v499_v11  ;;  %v1167_v16 = vpack.c.bf16 %v627_v12, %v627_v12 }
 0x114   :  { %938 = vst.msk [vmem:[%s1798_s3 + $0x6c] sm:$0xf] %vm910_vm3, %v1137_v13  ;;  %970 = vst.msk [vmem:[%s1798_s3 + $0xec] sm:$0xf] %vm910_vm3, %v1169_v14 }
 0x115   :  { %936 = vst.msk [vmem:[%s1798_s3 + $0x64] sm:$0xf] %vm910_vm3, %v1135_v15  ;;  %968 = vst.msk [vmem:[%s1798_s3 + $0xe4] sm:$0xf] %vm910_vm3, %v1167_v16  ;;  %v1242_v17 = vpop.f32.mrb[28].mxu0  ;;  %v1274_v18 = vpop.f32.mrb[28].mxu1 }
 0x116   :  { %v520_v19 = vadd.f32 %v1242_v17, %v1473_v38  ;;  %v648_v20 = vadd.f32 %v1274_v18, %v1473_v38  ;;  %v511_v21 = vpop.f32.mrb[29].mxu0  ;;  %v639_v22 = vpop.f32.mrb[29].mxu1 }
 0x117   :  { %v512_v23 = vadd.f32 %v1473_v38, %v511_v21  ;;  %v640_v24 = vadd.f32 %v1473_v38, %v639_v22  ;;  %v1243_v25 = vpop.f32.mrb[30].mxu0  ;;  %v1275_v26 = vpop.f32.mrb[30].mxu1 }
 0x118   :  { %v1140_v27 = vpack.c.bf16 %v520_v19, %v520_v19  ;;  %v1172_v28 = vpack.c.bf16 %v648_v20, %v648_v20  ;;  %v523_v29 = vadd.f32 %v1243_v25, %v1473_v38  ;;  %v651_v30 = vadd.f32 %v1275_v26, %v1473_v38  ;;  %v514_v31 = vpop.f32.mrb[31].mxu0  ;;  %v642_v32 = vpop.f32.mrb[31].mxu1 }
 0x119   :  { %v1138_v33 = vpack.c.bf16 %v512_v23, %v512_v23  ;;  %v1170_v34 = vpack.c.bf16 %v640_v24, %v640_v24  ;;  %v515_v35 = vadd.f32 %v1473_v38, %v514_v31  ;;  %v643_v36 = vadd.f32 %v1473_v38, %v642_v32 }
 0x11a   :  { %941 = vst.msk [vmem:[%s1798_s3 + $0x78] sm:$0xf] %vm910_vm3, %v1140_v27  ;;  %973 = vst.msk [vmem:[%s1798_s3 + $0xf8] sm:$0xf] %vm910_vm3, %v1172_v28  ;;  %v1141_v37 = vpack.c.bf16 %v523_v29, %v523_v29  ;;  %v1173_v39 = vpack.c.bf16 %v651_v30, %v651_v30 }
 0x11b   :  { %939 = vst.msk [vmem:[%s1798_s3 + $0x70] sm:$0xf] %vm910_vm3, %v1138_v33  ;;  %971 = vst.msk [vmem:[%s1798_s3 + $0xf0] sm:$0xf] %vm910_vm3, %v1170_v34  ;;  %v1139_v38 = vpack.c.bf16 %v515_v35, %v515_v35  ;;  %v1171_v40 = vpack.c.bf16 %v643_v36, %v643_v36 }
 0x11c   :  { %942 = vst.msk [vmem:[%s1798_s3 + $0x7c] sm:$0xf] %vm910_vm3, %v1141_v37  ;;  %974 = vst.msk [vmem:[%s1798_s3 + $0xfc] sm:$0xf] %vm910_vm3, %v1173_v39 }
 0x11d   :  { %940 = vst.msk [vmem:[%s1798_s3 + $0x74] sm:$0xf] %vm910_vm3, %v1139_v38  ;;  %972 = vst.msk [vmem:[%s1798_s3 + $0xf4] sm:$0xf] %vm910_vm3, %v1171_v40 }

</bundles_post_ra>
